<compile_context>
chip_gen: v7x
topology: tpu7x:2x2x1
jax: 0.10.0
libtpu: 0.0.40
codegen_flags: <defaults>
</compile_context>

<pallas_src>
import functools

import jax
import jax.numpy as jnp
import numpy as np
from jax import lax
from jax.experimental import pallas as pl
from jax.experimental.pallas import tpu as pltpu

LANE = 128
_EPS = 1e-5


def _round_up(x, m):
    return (x + m - 1) // m * m


# --------------------------------------------------------------------------
# Kernels
# --------------------------------------------------------------------------
def _conv3x3_stats_kernel(x_ref, w_ref, scale_ref, shift_ref,
                          y_ref, sum_ref, sq_ref, xpad_ref,
                          *, stride, apply_input_bn_relu):
    """One batch element: [BN+ReLU of prev stage] -> zero-pad -> conv3x3 -> stats.

    x_ref:     (1, H, W, Cin_p)      un-padded input block (channels padded)
    w_ref:     (9*Cin_p, Cout_p)     packed conv weights ((kh,kw,cin) x cout)
    scale_ref: (1, Cin_p)            BN scale of previous stage (if fused)
    shift_ref: (1, Cin_p)            BN shift of previous stage (if fused)
    y_ref:     (1, Ho, Wo, Cout_p)   raw conv output (pre-BN)
    sum_ref:   (1, 1, Cout_p)        per-image per-channel sum of conv output
    sq_ref:    (1, 1, Cout_p)        per-image per-channel sum of squares
    xpad_ref:  (1, H+2, W+2, Cin_p)  VMEM scratch (spatially zero-padded input)
    """
    _, H, W, cin_p = x_ref.shape
    _, Ho, Wo, cout_p = y_ref.shape

    x = x_ref[0].astype(jnp.float32)                        # (H, W, Cin_p)
    if apply_input_bn_relu:
        # Fused BatchNorm + ReLU of the previous stage, applied on input load.
        s = scale_ref[...].reshape(1, 1, cin_p)
        t = shift_ref[...].reshape(1, 1, cin_p)
        x = jnp.maximum(x * s + t, 0.0)

    # Spatial zero-padding (padding=1) entirely in VMEM — no HBM pad pass.
    xpad_ref[...] = jnp.zeros_like(xpad_ref)
    xpad_ref[0, 1:H + 1, 1:W + 1, :] = x
    xp = xpad_ref[0]                                        # (H+2, W+2, Cin_p)

    # im2col: one lane-dense MXU matmul with K = 9 * Cin_p.
    cols = []
    for kh in range(3):
        for kw in range(3):
            patch = xp[kh:kh + (Ho - 1) * stride + 1:stride,
                       kw:kw + (Wo - 1) * stride + 1:stride, :]   # (Ho, Wo, Cin_p)
            cols.append(patch.reshape(Ho * Wo, cin_p))
    patches = jnp.concatenate(cols, axis=1)                 # (Ho*Wo, 9*Cin_p)
    acc = jnp.dot(patches, w_ref[...],
                  preferred_element_type=jnp.float32)       # (Ho*Wo, Cout_p)

    # Single-pass BatchNorm partials (sum and sum-of-squares) for this image.
    sum_ref[0] = jnp.sum(acc, axis=0, keepdims=True)
    sq_ref[0] = jnp.sum(acc * acc, axis=0, keepdims=True)

    y_ref[0] = acc.reshape(Ho, Wo, cout_p).astype(y_ref.dtype)


def _bn_relu_kernel(y_ref, scale_ref, shift_ref, o_ref):
    """Lane-dense BatchNorm (precomputed scale/shift) + ReLU for one image."""
    _, Ho, Wo, cp = y_ref.shape
    s = scale_ref[...].reshape(1, 1, cp)
    t = shift_ref[...].reshape(1, 1, cp)
    o_ref[0] = jnp.maximum(y_ref[0] * s + t, 0.0).astype(o_ref.dtype)


# --------------------------------------------------------------------------
# Pallas wrappers
# --------------------------------------------------------------------------
def _conv3x3_stage(x, w_packed, in_scale, in_shift, *, stride,
                   apply_input_bn_relu, cout_pad):
    """Run one conv stage over the whole (channel-padded, NHWC) batch."""
    B, H, W, cin_pad = x.shape
    Ho = (H + 2 - 3) // stride + 1
    Wo = (W + 2 - 3) // stride + 1

    kernel = functools.partial(_conv3x3_stats_kernel, stride=stride,
                               apply_input_bn_relu=apply_input_bn_relu)
    grid_spec = pltpu.PrefetchScalarGridSpec(
        num_scalar_prefetch=0,
        grid=(B,),
        in_specs=[
            pl.BlockSpec((1, H, W, cin_pad), lambda b: (b, 0, 0, 0)),
            pl.BlockSpec((9 * cin_pad, cout_pad), lambda b: (0, 0)),
            pl.BlockSpec((1, cin_pad), lambda b: (0, 0)),
            pl.BlockSpec((1, cin_pad), lambda b: (0, 0)),
        ],
        out_specs=[
            pl.BlockSpec((1, Ho, Wo, cout_pad), lambda b: (b, 0, 0, 0)),
            pl.BlockSpec((1, 1, cout_pad), lambda b: (b, 0, 0)),
            pl.BlockSpec((1, 1, cout_pad), lambda b: (b, 0, 0)),
        ],
        scratch_shapes=[pltpu.VMEM((1, H + 2, W + 2, cin_pad), jnp.float32)],
    )
    y, s, sq = pl.pallas_call(
        kernel,
        out_shape=(
            jax.ShapeDtypeStruct((B, Ho, Wo, cout_pad), jnp.float32),
            jax.ShapeDtypeStruct((B, 1, cout_pad), jnp.float32),
            jax.ShapeDtypeStruct((B, 1, cout_pad), jnp.float32),
        ),
        grid_spec=grid_spec,
        compiler_params=pltpu.CompilerParams(
            dimension_semantics=("parallel",),   # v7x: shard batch over both TCs
            vmem_limit_bytes=32 * 1024 * 1024,
        ),
    )(x, w_packed, in_scale, in_shift)
    return y, s, sq


def _bn_relu(y, scale, shift):
    B, Ho, Wo, cp = y.shape
    grid_spec = pltpu.PrefetchScalarGridSpec(
        num_scalar_prefetch=0,
        grid=(B,),
        in_specs=[
            pl.BlockSpec((1, Ho, Wo, cp), lambda b: (b, 0, 0, 0)),
            pl.BlockSpec((1, cp), lambda b: (0, 0)),
            pl.BlockSpec((1, cp), lambda b: (0, 0)),
        ],
        out_specs=pl.BlockSpec((1, Ho, Wo, cp), lambda b: (b, 0, 0, 0)),
    )
    return pl.pallas_call(
        _bn_relu_kernel,
        out_shape=jax.ShapeDtypeStruct((B, Ho, Wo, cp), y.dtype),
        grid_spec=grid_spec,
        compiler_params=pltpu.CompilerParams(
            dimension_semantics=("parallel",),
            vmem_limit_bytes=32 * 1024 * 1024,
        ),
    )(y, scale, shift)


# --------------------------------------------------------------------------
# Parameter packing / BN statistics (tiny, done in plain JAX)
# --------------------------------------------------------------------------
def _pad_channels(x, c_pad):
    c = x.shape[-1]
    if c == c_pad:
        return x
    pad = [(0, 0)] * (x.ndim - 1) + [(0, c_pad - c)]
    return jnp.pad(x, pad)


def _pack_conv_weights(w_hwio, cin_pad, cout_pad):
    """(3, 3, Cin, Cout) HWIO -> (9*Cin_pad, Cout_pad), zero-padded channels."""
    kh, kw, cin, cout = w_hwio.shape
    w = jnp.zeros((kh, kw, cin_pad, cout_pad), jnp.float32)
    w = w.at[:, :, :cin, :cout].set(w_hwio.astype(jnp.float32))
    return w.reshape(kh * kw * cin_pad, cout_pad)


def _pad_vec(v, c_pad):
    return _pad_channels(v.astype(jnp.float32).reshape(1, -1), c_pad).reshape(-1)


def _bn_affine_from_stats(sum_b, sq_b, gamma, beta, count, eps=_EPS):
    """Per-image sum / sumsq partials -> per-channel BN scale & shift."""
    s = jnp.sum(sum_b, axis=(0, 1))                      # (Cp,)
    sq = jnp.sum(sq_b, axis=(0, 1))                      # (Cp,)
    mean = s / count
    var = jnp.maximum(sq / count - mean * mean, 0.0)     # biased variance
    inv = lax.rsqrt(var + eps)
    scale = gamma * inv
    shift = beta - mean * scale
    return scale.reshape(1, -1), shift.reshape(1, -1)


# --------------------------------------------------------------------------
# Public forward (matches ResidualBlock.forward: shortcut is never used there)
# --------------------------------------------------------------------------
def residual_block_forward(x_nchw, params, *, stride=1, eps=_EPS):
    x = jnp.transpose(x_nchw, (0, 2, 3, 1)).astype(jnp.float32)   # NCHW -> NHWC
    B, H, W, cin = x.shape
    cout = params["g1"].shape[0]
    cin_p = _round_up(cin, LANE)
    cout_p = _round_up(cout, LANE)

    x_p = _pad_channels(x, cin_p)
    w1 = _pack_conv_weights(params["w1"], cin_p, cout_p)
    w2 = _pack_conv_weights(params["w2"], cout_p, cout_p)
    g1 = _pad_vec(params["g1"], cout_p)
    b1 = _pad_vec(params["b1"], cout_p)
    g2 = _pad_vec(params["g2"], cout_p)
    b2 = _pad_vec(params["b2"], cout_p)

    # Stage 1: conv1 (raw input) + BN1 partial statistics.
    ident_s = jnp.ones((1, cin_p), jnp.float32)
    ident_t = jnp.zeros((1, cin_p), jnp.float32)
    y1, s1, q1 = _conv3x3_stage(x_p, w1, ident_s, ident_t, stride=stride,
                                apply_input_bn_relu=False, cout_pad=cout_p)
    _, Ho, Wo, _ = y1.shape
    count = B * Ho * Wo
    scale1, shift1 = _bn_affine_from_stats(s1, q1, g1, b1, count, eps)

    # Stage 2: conv2 with BN1+ReLU fused into its input load, + BN2 partials.
    y2, s2, q2 = _conv3x3_stage(y1, w2, scale1, shift1, stride=1,
                                apply_input_bn_relu=True, cout_pad=cout_p)
    scale2, shift2 = _bn_affine_from_stats(s2, q2, g2, b2, count, eps)

    # BN2 + forward()'s F.relu (lane-dense elementwise kernel).
    out = _bn_relu(y2, scale2, shift2)                   # (B, Ho, Wo, cout_p)

    out = out[..., :cout]                                # drop channel padding
    return jnp.transpose(out, (0, 3, 1, 2)).astype(x_nchw.dtype)  # -> NCHW


# ----------------------------- pure-JAX reference ---------------------------
def _ref_conv_bn_relu(x_nhwc, w_hwio, gamma, beta, stride, eps=_EPS):
    y = lax.conv_general_dilated(
        x_nhwc.astype(jnp.float32), w_hwio.astype(jnp.float32),
        window_strides=(stride, stride), padding=((1, 1), (1, 1)),
        dimension_numbers=("NHWC", "HWIO", "NHWC"))
    mean = jnp.mean(y, axis=(0, 1, 2), keepdims=True)
    var = jnp.mean((y - mean) ** 2, axis=(0, 1, 2), keepdims=True)
    y = (y - mean) * lax.rsqrt(var + eps) * gamma + beta
    return jnp.maximum(y, 0.0)


def residual_block_ref(x_nchw, params, *, stride=1):
    x = jnp.transpose(x_nchw, (0, 2, 3, 1))
    y = _ref_conv_bn_relu(x, params["w1"], params["g1"], params["b1"], stride)
    y = _ref_conv_bn_relu(y, params["w2"], params["g2"], params["b2"], 1)
    return jnp.transpose(y, (0, 3, 1, 2))


if __name__ == "__main__":
    # Small deterministic problem: ResidualBlock(inchannel=4, outchannel=8, stride=1)
    B, Cin, Cout, H, W = 2, 4, 8, 16, 16
    stride = 1

    key = jax.random.PRNGKey(0)
    kx, kw1, kw2, kg1, kb1, kg2, kb2 = jax.random.split(key, 7)

    x = jax.random.normal(kx, (B, Cin, H, W), dtype=jnp.float32)  # NCHW like PyTorch

    # Conv weights generated in PyTorch OIHW order, converted to HWIO.
    w1_oihw = jax.random.normal(kw1, (Cout, Cin, 3, 3), dtype=jnp.float32) * 0.1
    w2_oihw = jax.random.normal(kw2, (Cout, Cout, 3, 3), dtype=jnp.float32) * 0.1
    params = {
        "w1": jnp.transpose(w1_oihw, (2, 3, 1, 0)),  # HWIO
        "w2": jnp.transpose(w2_oihw, (2, 3, 1, 0)),  # HWIO
        "g1": 1.0 + 0.1 * jax.random.normal(kg1, (Cout,), dtype=jnp.float32),
        "b1": 0.1 * jax.random.normal(kb1, (Cout,), dtype=jnp.float32),
        "g2": 1.0 + 0.1 * jax.random.normal(kg2, (Cout,), dtype=jnp.float32),
        "b2": 0.1 * jax.random.normal(kb2, (Cout,), dtype=jnp.float32),
    }

    out = jax.jit(functools.partial(residual_block_forward, stride=stride))(x, params)
    out = jax.block_until_ready(out)

    ref = jax.block_until_ready(residual_block_ref(x, params, stride=stride))

    assert out.shape == (B, Cout, H // stride, W // stride), out.shape
    np.testing.assert_allclose(np.asarray(out), np.asarray(ref), atol=2e-4, rtol=2e-4)

    print("KERNEL_OK")
</pallas_src>

<mosaic_0001>
module attributes {stable_mosaic.version = 11 : i64} {
  func.func @_conv3x3_stats_kernel(%arg0: i32, %arg1: memref<1x16x16x128xf32, #tpu.memory_space<vmem>>, %arg2: memref<1152x128xf32, #tpu.memory_space<vmem>>, %arg3: memref<1x128xf32, #tpu.memory_space<vmem>>, %arg4: memref<1x128xf32, #tpu.memory_space<vmem>>, %arg5: memref<1x16x16x128xf32, #tpu.memory_space<vmem>>, %arg6: memref<1x1x128xf32, #tpu.memory_space<vmem>>, %arg7: memref<1x1x128xf32, #tpu.memory_space<vmem>>, %arg8: memref<1x18x18x128xf32, #tpu.memory_space<vmem>>) attributes {dimension_semantics = [#tpu.dimension_semantics<parallel>], iteration_bounds = array<i64: 2>, scalar_prefetch = 0 : i64, scratch_operands = 1 : i64, tpu.core_type = #tpu.core_type<tc>, window_params = [{transform_indices = @transform_0, window_bounds = array<i64: 1, 16, 16, 128>}, {pipeline_mode = #tpu.pipeline_mode<synchronous>, transform_indices = @transform_1, window_bounds = array<i64: 1152, 128>}, {pipeline_mode = #tpu.pipeline_mode<synchronous>, transform_indices = @transform_2, window_bounds = array<i64: 1, 128>}, {pipeline_mode = #tpu.pipeline_mode<synchronous>, transform_indices = @transform_3, window_bounds = array<i64: 1, 128>}, {transform_indices = @transform_4, window_bounds = array<i64: 1, 16, 16, 128>}, {transform_indices = @transform_5, window_bounds = array<i64: 1, 1, 128>}, {transform_indices = @transform_6, window_bounds = array<i64: 1, 1, 128>}]} {
    %c0 = arith.constant 0 : index
    %c0_0 = arith.constant 0 : index
    %c0_1 = arith.constant 0 : index
    %c0_2 = arith.constant 0 : index
    %0 = vector.load %arg1[%c0, %c0_0, %c0_1, %c0_2] : memref<1x16x16x128xf32, #tpu.memory_space<vmem>>, vector<1x16x16x128xf32>
    %1 = vector.shape_cast %0 : vector<1x16x16x128xf32> to vector<16x16x128xf32>
    %cst = arith.constant 0.000000e+00 : f32
    %2 = vector.broadcast %cst : f32 to vector<1x18x18x128xf32>
    %c0_3 = arith.constant 0 : index
    %c0_4 = arith.constant 0 : index
    %c0_5 = arith.constant 0 : index
    %c0_6 = arith.constant 0 : index
    %3 = vector.load %arg8[%c0_3, %c0_4, %c0_5, %c0_6] : memref<1x18x18x128xf32, #tpu.memory_space<vmem>>, vector<1x18x18x128xf32>
    tpu.vector_store %arg8[%c0_3, %c0_4, %c0_5, %c0_6], %2 {strides = array<i32>} : memref<1x18x18x128xf32, #tpu.memory_space<vmem>>, vector<1x18x18x128xf32>,
    %c0_7 = arith.constant 0 : index
    %c1 = arith.constant 1 : index
    %c1_8 = arith.constant 1 : index
    %c0_9 = arith.constant 0 : index
    %4 = vector.load %arg8[%c0_7, %c1, %c1_8, %c0_9] : memref<1x18x18x128xf32, #tpu.memory_space<vmem>>, vector<1x16x16x128xf32>
    %5 = vector.shape_cast %4 : vector<1x16x16x128xf32> to vector<16x16x128xf32>
    %6 = vector.shape_cast %1 : vector<16x16x128xf32> to vector<1x16x16x128xf32>
    tpu.vector_store %arg8[%c0_7, %c1, %c1_8, %c0_9], %6 {strides = array<i32>} : memref<1x18x18x128xf32, #tpu.memory_space<vmem>>, vector<1x16x16x128xf32>,
    %c0_10 = arith.constant 0 : index
    %c0_11 = arith.constant 0 : index
    %c0_12 = arith.constant 0 : index
    %c0_13 = arith.constant 0 : index
    %7 = vector.load %arg8[%c0_10, %c0_11, %c0_12, %c0_13] : memref<1x18x18x128xf32, #tpu.memory_space<vmem>>, vector<1x18x18x128xf32>
    %8 = vector.shape_cast %7 : vector<1x18x18x128xf32> to vector<18x18x128xf32>
    %9 = vector.extract_strided_slice %8 {offsets = [0, 0, 0], sizes = [16, 16, 128], strides = [1, 1, 1]} : vector<18x18x128xf32> to vector<16x16x128xf32>
    %10 = vector.shape_cast %9 : vector<16x16x128xf32> to vector<256x128xf32>
    %11 = vector.extract_strided_slice %8 {offsets = [0, 1, 0], sizes = [16, 16, 128], strides = [1, 1, 1]} : vector<18x18x128xf32> to vector<16x16x128xf32>
    %12 = vector.shape_cast %11 : vector<16x16x128xf32> to vector<256x128xf32>
    %13 = vector.extract_strided_slice %8 {offsets = [0, 2, 0], sizes = [16, 16, 128], strides = [1, 1, 1]} : vector<18x18x128xf32> to vector<16x16x128xf32>
    %14 = vector.shape_cast %13 : vector<16x16x128xf32> to vector<256x128xf32>
    %15 = vector.extract_strided_slice %8 {offsets = [1, 0, 0], sizes = [16, 16, 128], strides = [1, 1, 1]} : vector<18x18x128xf32> to vector<16x16x128xf32>
    %16 = vector.shape_cast %15 : vector<16x16x128xf32> to vector<256x128xf32>
    %17 = vector.extract_strided_slice %8 {offsets = [1, 1, 0], sizes = [16, 16, 128], strides = [1, 1, 1]} : vector<18x18x128xf32> to vector<16x16x128xf32>
    %18 = vector.shape_cast %17 : vector<16x16x128xf32> to vector<256x128xf32>
    %19 = vector.extract_strided_slice %8 {offsets = [1, 2, 0], sizes = [16, 16, 128], strides = [1, 1, 1]} : vector<18x18x128xf32> to vector<16x16x128xf32>
    %20 = vector.shape_cast %19 : vector<16x16x128xf32> to vector<256x128xf32>
    %21 = vector.extract_strided_slice %8 {offsets = [2, 0, 0], sizes = [16, 16, 128], strides = [1, 1, 1]} : vector<18x18x128xf32> to vector<16x16x128xf32>
    %22 = vector.shape_cast %21 : vector<16x16x128xf32> to vector<256x128xf32>
    %23 = vector.extract_strided_slice %8 {offsets = [2, 1, 0], sizes = [16, 16, 128], strides = [1, 1, 1]} : vector<18x18x128xf32> to vector<16x16x128xf32>
    %24 = vector.shape_cast %23 : vector<16x16x128xf32> to vector<256x128xf32>
    %25 = vector.extract_strided_slice %8 {offsets = [2, 2, 0], sizes = [16, 16, 128], strides = [1, 1, 1]} : vector<18x18x128xf32> to vector<16x16x128xf32>
    %26 = vector.shape_cast %25 : vector<16x16x128xf32> to vector<256x128xf32>
    %27 = tpu.concatenate %10, %12, %14, %16, %18, %20, %22, %24, %26 in 1 : vector<256x128xf32>, vector<256x128xf32>, vector<256x128xf32>, vector<256x128xf32>, vector<256x128xf32>, vector<256x128xf32>, vector<256x128xf32>, vector<256x128xf32>, vector<256x128xf32> -> vector<256x1152xf32>
    %c0_14 = arith.constant 0 : index
    %c0_15 = arith.constant 0 : index
    %28 = vector.load %arg2[%c0_14, %c0_15] : memref<1152x128xf32, #tpu.memory_space<vmem>>, vector<1152x128xf32>
    %cst_16 = arith.constant dense<0.000000e+00> : vector<256x128xf32>
    %29 = tpu.matmul %27, %28, %cst_16 {dimension_numbers = #tpu.dot_dimension_numbers<[1], [0], [0], [1], [0, 0, 1, 1], [], []>} : vector<256x1152xf32>, vector<1152x128xf32>, vector<256x128xf32> -> vector<256x128xf32>
    %cst_17 = arith.constant dense<0.000000e+00> : vector<128xf32>
    %30 = vector.multi_reduction <add>, %29, %cst_17 [0] : vector<256x128xf32> to vector<128xf32>
    %31 = vector.shape_cast %30 : vector<128xf32> to vector<1x128xf32>
    %c0_18 = arith.constant 0 : index
    %c0_19 = arith.constant 0 : index
    %c0_20 = arith.constant 0 : index
    %32 = vector.load %arg6[%c0_18, %c0_19, %c0_20] : memref<1x1x128xf32, #tpu.memory_space<vmem>>, vector<1x1x128xf32>
    %33 = vector.shape_cast %32 : vector<1x1x128xf32> to vector<1x128xf32>
    %34 = vector.shape_cast %31 : vector<1x128xf32> to vector<1x1x128xf32>
    tpu.vector_store %arg6[%c0_18, %c0_19, %c0_20], %34 {strides = array<i32>} : memref<1x1x128xf32, #tpu.memory_space<vmem>>, vector<1x1x128xf32>,
    %35 = arith.mulf %29, %29 : vector<256x128xf32>
    %cst_21 = arith.constant dense<0.000000e+00> : vector<128xf32>
    %36 = vector.multi_reduction <add>, %35, %cst_21 [0] : vector<256x128xf32> to vector<128xf32>
    %37 = vector.shape_cast %36 : vector<128xf32> to vector<1x128xf32>
    %c0_22 = arith.constant 0 : index
    %c0_23 = arith.constant 0 : index
    %c0_24 = arith.constant 0 : index
    %38 = vector.load %arg7[%c0_22, %c0_23, %c0_24] : memref<1x1x128xf32, #tpu.memory_space<vmem>>, vector<1x1x128xf32>
    %39 = vector.shape_cast %38 : vector<1x1x128xf32> to vector<1x128xf32>
    %40 = vector.shape_cast %37 : vector<1x128xf32> to vector<1x1x128xf32>
    tpu.vector_store %arg7[%c0_22, %c0_23, %c0_24], %40 {strides = array<i32>} : memref<1x1x128xf32, #tpu.memory_space<vmem>>, vector<1x1x128xf32>,
    %41 = vector.shape_cast %29 : vector<256x128xf32> to vector<16x16x128xf32>
    %c0_25 = arith.constant 0 : index
    %c0_26 = arith.constant 0 : index
    %c0_27 = arith.constant 0 : index
    %c0_28 = arith.constant 0 : index
    %42 = vector.load %arg5[%c0_25, %c0_26, %c0_27, %c0_28] : memref<1x16x16x128xf32, #tpu.memory_space<vmem>>, vector<1x16x16x128xf32>
    %43 = vector.shape_cast %42 : vector<1x16x16x128xf32> to vector<16x16x128xf32>
    %44 = vector.shape_cast %41 : vector<16x16x128xf32> to vector<1x16x16x128xf32>
    tpu.vector_store %arg5[%c0_25, %c0_26, %c0_27, %c0_28], %44 {strides = array<i32>} : memref<1x16x16x128xf32, #tpu.memory_space<vmem>>, vector<1x16x16x128xf32>,
    return
  }
  func.func @transform_0(%arg0: i32) -> (i32, i32, i32, i32) {
    %c0_i32 = arith.constant 0 : i32
    %c0_i32_0 = arith.constant 0 : i32
    %c0_i32_1 = arith.constant 0 : i32
    %c0_i32_2 = arith.constant 0 : i32
    return %arg0, %c0_i32, %c0_i32_0, %c0_i32_1 : i32, i32, i32, i32
  }
  func.func @transform_1(%arg0: i32) -> (i32, i32) {
    %c0_i32 = arith.constant 0 : i32
    %c0_i32_0 = arith.constant 0 : i32
    %c0_i32_1 = arith.constant 0 : i32
    return %c0_i32, %c0_i32_0 : i32, i32
  }
  func.func @transform_2(%arg0: i32) -> (i32, i32) {
    %c0_i32 = arith.constant 0 : i32
    %c0_i32_0 = arith.constant 0 : i32
    %c0_i32_1 = arith.constant 0 : i32
    return %c0_i32, %c0_i32_0 : i32, i32
  }
  func.func @transform_3(%arg0: i32) -> (i32, i32) {
    %c0_i32 = arith.constant 0 : i32
    %c0_i32_0 = arith.constant 0 : i32
    %c0_i32_1 = arith.constant 0 : i32
    return %c0_i32, %c0_i32_0 : i32, i32
  }
  func.func @transform_4(%arg0: i32) -> (i32, i32, i32, i32) {
    %c0_i32 = arith.constant 0 : i32
    %c0_i32_0 = arith.constant 0 : i32
    %c0_i32_1 = arith.constant 0 : i32
    %c0_i32_2 = arith.constant 0 : i32
    return %arg0, %c0_i32, %c0_i32_0, %c0_i32_1 : i32, i32, i32, i32
  }
  func.func @transform_5(%arg0: i32) -> (i32, i32, i32) {
    %c0_i32 = arith.constant 0 : i32
    %c0_i32_0 = arith.constant 0 : i32
    %c0_i32_1 = arith.constant 0 : i32
    return %arg0, %c0_i32, %c0_i32_0 : i32, i32, i32
  }
  func.func @transform_6(%arg0: i32) -> (i32, i32, i32) {
    %c0_i32 = arith.constant 0 : i32
    %c0_i32_0 = arith.constant 0 : i32
    %c0_i32_1 = arith.constant 0 : i32
    return %arg0, %c0_i32, %c0_i32_0 : i32, i32, i32
  }
}

module attributes {stable_mosaic.version = 11 : i64} {
  func.func @_bn_relu_kernel(%arg0: i32, %arg1: memref<1x16x16x128xf32, #tpu.memory_space<vmem>>, %arg2: memref<1x128xf32, #tpu.memory_space<vmem>>, %arg3: memref<1x128xf32, #tpu.memory_space<vmem>>, %arg4: memref<1x16x16x128xf32, #tpu.memory_space<vmem>>) attributes {dimension_semantics = [#tpu.dimension_semantics<parallel>], iteration_bounds = array<i64: 2>, scalar_prefetch = 0 : i64, scratch_operands = 0 : i64, tpu.core_type = #tpu.core_type<tc>, window_params = [{transform_indices = @transform_0, window_bounds = array<i64: 1, 16, 16, 128>}, {pipeline_mode = #tpu.pipeline_mode<synchronous>, transform_indices = @transform_1, window_bounds = array<i64: 1, 128>}, {pipeline_mode = #tpu.pipeline_mode<synchronous>, transform_indices = @transform_2, window_bounds = array<i64: 1, 128>}, {transform_indices = @transform_3, window_bounds = array<i64: 1, 16, 16, 128>}]} {
    %c0 = arith.constant 0 : index
    %c0_0 = arith.constant 0 : index
    %0 = vector.load %arg2[%c0, %c0_0] : memref<1x128xf32, #tpu.memory_space<vmem>>, vector<1x128xf32>
    %1 = vector.shape_cast %0 : vector<1x128xf32> to vector<1x1x128xf32>
    %c0_1 = arith.constant 0 : index
    %c0_2 = arith.constant 0 : index
    %2 = vector.load %arg3[%c0_1, %c0_2] : memref<1x128xf32, #tpu.memory_space<vmem>>, vector<1x128xf32>
    %3 = vector.shape_cast %2 : vector<1x128xf32> to vector<1x1x128xf32>
    %c0_3 = arith.constant 0 : index
    %c0_4 = arith.constant 0 : index
    %c0_5 = arith.constant 0 : index
    %c0_6 = arith.constant 0 : index
    %4 = vector.load %arg1[%c0_3, %c0_4, %c0_5, %c0_6] : memref<1x16x16x128xf32, #tpu.memory_space<vmem>>, vector<1x16x16x128xf32>
    %5 = vector.shape_cast %4 : vector<1x16x16x128xf32> to vector<16x16x128xf32>
    %6 = vector.broadcast %1 : vector<1x1x128xf32> to vector<16x16x128xf32>
    %7 = arith.mulf %5, %6 : vector<16x16x128xf32>
    %8 = vector.broadcast %3 : vector<1x1x128xf32> to vector<16x16x128xf32>
    %9 = arith.addf %7, %8 : vector<16x16x128xf32>
    %cst = arith.constant 0.000000e+00 : f32
    %10 = vector.broadcast %cst : f32 to vector<16x16x128xf32>
    %11 = arith.maximumf %9, %10 : vector<16x16x128xf32>
    %c0_7 = arith.constant 0 : index
    %c0_8 = arith.constant 0 : index
    %c0_9 = arith.constant 0 : index
    %c0_10 = arith.constant 0 : index
    %12 = vector.load %arg4[%c0_7, %c0_8, %c0_9, %c0_10] : memref<1x16x16x128xf32, #tpu.memory_space<vmem>>, vector<1x16x16x128xf32>
    %13 = vector.shape_cast %12 : vector<1x16x16x128xf32> to vector<16x16x128xf32>
    %14 = vector.shape_cast %11 : vector<16x16x128xf32> to vector<1x16x16x128xf32>
    tpu.vector_store %arg4[%c0_7, %c0_8, %c0_9, %c0_10], %14 {strides = array<i32>} : memref<1x16x16x128xf32, #tpu.memory_space<vmem>>, vector<1x16x16x128xf32>,
    return
  }
  func.func @transform_0(%arg0: i32) -> (i32, i32, i32, i32) {
    %c0_i32 = arith.constant 0 : i32
    %c0_i32_0 = arith.constant 0 : i32
    %c0_i32_1 = arith.constant 0 : i32
    %c0_i32_2 = arith.constant 0 : i32
    return %arg0, %c0_i32, %c0_i32_0, %c0_i32_1 : i32, i32, i32, i32
  }
  func.func @transform_1(%arg0: i32) -> (i32, i32) {
    %c0_i32 = arith.constant 0 : i32
    %c0_i32_0 = arith.constant 0 : i32
    %c0_i32_1 = arith.constant 0 : i32
    return %c0_i32, %c0_i32_0 : i32, i32
  }
  func.func @transform_2(%arg0: i32) -> (i32, i32) {
    %c0_i32 = arith.constant 0 : i32
    %c0_i32_0 = arith.constant 0 : i32
    %c0_i32_1 = arith.constant 0 : i32
    return %c0_i32, %c0_i32_0 : i32, i32
  }
  func.func @transform_3(%arg0: i32) -> (i32, i32, i32, i32) {
    %c0_i32 = arith.constant 0 : i32
    %c0_i32_0 = arith.constant 0 : i32
    %c0_i32_1 = arith.constant 0 : i32
    %c0_i32_2 = arith.constant 0 : i32
    return %arg0, %c0_i32, %c0_i32_0, %c0_i32_1 : i32, i32, i32, i32
  }
}

module attributes {stable_mosaic.version = 11 : i64} {
  func.func @_conv3x3_stats_kernel(%arg0: i32, %arg1: memref<1x16x16x128xf32, #tpu.memory_space<vmem>>, %arg2: memref<1152x128xf32, #tpu.memory_space<vmem>>, %arg3: memref<1x128xf32, #tpu.memory_space<vmem>>, %arg4: memref<1x128xf32, #tpu.memory_space<vmem>>, %arg5: memref<1x16x16x128xf32, #tpu.memory_space<vmem>>, %arg6: memref<1x1x128xf32, #tpu.memory_space<vmem>>, %arg7: memref<1x1x128xf32, #tpu.memory_space<vmem>>, %arg8: memref<1x18x18x128xf32, #tpu.memory_space<vmem>>) attributes {dimension_semantics = [#tpu.dimension_semantics<parallel>], iteration_bounds = array<i64: 2>, scalar_prefetch = 0 : i64, scratch_operands = 1 : i64, tpu.core_type = #tpu.core_type<tc>, window_params = [{transform_indices = @transform_0, window_bounds = array<i64: 1, 16, 16, 128>}, {pipeline_mode = #tpu.pipeline_mode<synchronous>, transform_indices = @transform_1, window_bounds = array<i64: 1152, 128>}, {pipeline_mode = #tpu.pipeline_mode<synchronous>, transform_indices = @transform_2, window_bounds = array<i64: 1, 128>}, {pipeline_mode = #tpu.pipeline_mode<synchronous>, transform_indices = @transform_3, window_bounds = array<i64: 1, 128>}, {transform_indices = @transform_4, window_bounds = array<i64: 1, 16, 16, 128>}, {transform_indices = @transform_5, window_bounds = array<i64: 1, 1, 128>}, {transform_indices = @transform_6, window_bounds = array<i64: 1, 1, 128>}]} {
    %c0 = arith.constant 0 : index
    %c0_0 = arith.constant 0 : index
    %c0_1 = arith.constant 0 : index
    %c0_2 = arith.constant 0 : index
    %0 = vector.load %arg1[%c0, %c0_0, %c0_1, %c0_2] : memref<1x16x16x128xf32, #tpu.memory_space<vmem>>, vector<1x16x16x128xf32>
    %1 = vector.shape_cast %0 : vector<1x16x16x128xf32> to vector<16x16x128xf32>
    %c0_3 = arith.constant 0 : index
    %c0_4 = arith.constant 0 : index
    %2 = vector.load %arg3[%c0_3, %c0_4] : memref<1x128xf32, #tpu.memory_space<vmem>>, vector<1x128xf32>
    %3 = vector.shape_cast %2 : vector<1x128xf32> to vector<1x1x128xf32>
    %c0_5 = arith.constant 0 : index
    %c0_6 = arith.constant 0 : index
    %4 = vector.load %arg4[%c0_5, %c0_6] : memref<1x128xf32, #tpu.memory_space<vmem>>, vector<1x128xf32>
    %5 = vector.shape_cast %4 : vector<1x128xf32> to vector<1x1x128xf32>
    %6 = vector.broadcast %3 : vector<1x1x128xf32> to vector<16x16x128xf32>
    %7 = arith.mulf %1, %6 : vector<16x16x128xf32>
    %8 = vector.broadcast %5 : vector<1x1x128xf32> to vector<16x16x128xf32>
    %9 = arith.addf %7, %8 : vector<16x16x128xf32>
    %cst = arith.constant 0.000000e+00 : f32
    %10 = vector.broadcast %cst : f32 to vector<16x16x128xf32>
    %11 = arith.maximumf %9, %10 : vector<16x16x128xf32>
    %cst_7 = arith.constant 0.000000e+00 : f32
    %12 = vector.broadcast %cst_7 : f32 to vector<1x18x18x128xf32>
    %c0_8 = arith.constant 0 : index
    %c0_9 = arith.constant 0 : index
    %c0_10 = arith.constant 0 : index
    %c0_11 = arith.constant 0 : index
    %13 = vector.load %arg8[%c0_8, %c0_9, %c0_10, %c0_11] : memref<1x18x18x128xf32, #tpu.memory_space<vmem>>, vector<1x18x18x128xf32>
    tpu.vector_store %arg8[%c0_8, %c0_9, %c0_10, %c0_11], %12 {strides = array<i32>} : memref<1x18x18x128xf32, #tpu.memory_space<vmem>>, vector<1x18x18x128xf32>,
    %c0_12 = arith.constant 0 : index
    %c1 = arith.constant 1 : index
    %c1_13 = arith.constant 1 : index
    %c0_14 = arith.constant 0 : index
    %14 = vector.load %arg8[%c0_12, %c1, %c1_13, %c0_14] : memref<1x18x18x128xf32, #tpu.memory_space<vmem>>, vector<1x16x16x128xf32>
    %15 = vector.shape_cast %14 : vector<1x16x16x128xf32> to vector<16x16x128xf32>
    %16 = vector.shape_cast %11 : vector<16x16x128xf32> to vector<1x16x16x128xf32>
    tpu.vector_store %arg8[%c0_12, %c1, %c1_13, %c0_14], %16 {strides = array<i32>} : memref<1x18x18x128xf32, #tpu.memory_space<vmem>>, vector<1x16x16x128xf32>,
    %c0_15 = arith.constant 0 : index
    %c0_16 = arith.constant 0 : index
    %c0_17 = arith.constant 0 : index
    %c0_18 = arith.constant 0 : index
    %17 = vector.load %arg8[%c0_15, %c0_16, %c0_17, %c0_18] : memref<1x18x18x128xf32, #tpu.memory_space<vmem>>, vector<1x18x18x128xf32>
    %18 = vector.shape_cast %17 : vector<1x18x18x128xf32> to vector<18x18x128xf32>
    %19 = vector.extract_strided_slice %18 {offsets = [0, 0, 0], sizes = [16, 16, 128], strides = [1, 1, 1]} : vector<18x18x128xf32> to vector<16x16x128xf32>
    %20 = vector.shape_cast %19 : vector<16x16x128xf32> to vector<256x128xf32>
    %21 = vector.extract_strided_slice %18 {offsets = [0, 1, 0], sizes = [16, 16, 128], strides = [1, 1, 1]} : vector<18x18x128xf32> to vector<16x16x128xf32>
    %22 = vector.shape_cast %21 : vector<16x16x128xf32> to vector<256x128xf32>
    %23 = vector.extract_strided_slice %18 {offsets = [0, 2, 0], sizes = [16, 16, 128], strides = [1, 1, 1]} : vector<18x18x128xf32> to vector<16x16x128xf32>
    %24 = vector.shape_cast %23 : vector<16x16x128xf32> to vector<256x128xf32>
    %25 = vector.extract_strided_slice %18 {offsets = [1, 0, 0], sizes = [16, 16, 128], strides = [1, 1, 1]} : vector<18x18x128xf32> to vector<16x16x128xf32>
    %26 = vector.shape_cast %25 : vector<16x16x128xf32> to vector<256x128xf32>
    %27 = vector.extract_strided_slice %18 {offsets = [1, 1, 0], sizes = [16, 16, 128], strides = [1, 1, 1]} : vector<18x18x128xf32> to vector<16x16x128xf32>
    %28 = vector.shape_cast %27 : vector<16x16x128xf32> to vector<256x128xf32>
    %29 = vector.extract_strided_slice %18 {offsets = [1, 2, 0], sizes = [16, 16, 128], strides = [1, 1, 1]} : vector<18x18x128xf32> to vector<16x16x128xf32>
    %30 = vector.shape_cast %29 : vector<16x16x128xf32> to vector<256x128xf32>
    %31 = vector.extract_strided_slice %18 {offsets = [2, 0, 0], sizes = [16, 16, 128], strides = [1, 1, 1]} : vector<18x18x128xf32> to vector<16x16x128xf32>
    %32 = vector.shape_cast %31 : vector<16x16x128xf32> to vector<256x128xf32>
    %33 = vector.extract_strided_slice %18 {offsets = [2, 1, 0], sizes = [16, 16, 128], strides = [1, 1, 1]} : vector<18x18x128xf32> to vector<16x16x128xf32>
    %34 = vector.shape_cast %33 : vector<16x16x128xf32> to vector<256x128xf32>
    %35 = vector.extract_strided_slice %18 {offsets = [2, 2, 0], sizes = [16, 16, 128], strides = [1, 1, 1]} : vector<18x18x128xf32> to vector<16x16x128xf32>
    %36 = vector.shape_cast %35 : vector<16x16x128xf32> to vector<256x128xf32>
    %37 = tpu.concatenate %20, %22, %24, %26, %28, %30, %32, %34, %36 in 1 : vector<256x128xf32>, vector<256x128xf32>, vector<256x128xf32>, vector<256x128xf32>, vector<256x128xf32>, vector<256x128xf32>, vector<256x128xf32>, vector<256x128xf32>, vector<256x128xf32> -> vector<256x1152xf32>
    %c0_19 = arith.constant 0 : index
    %c0_20 = arith.constant 0 : index
    %38 = vector.load %arg2[%c0_19, %c0_20] : memref<1152x128xf32, #tpu.memory_space<vmem>>, vector<1152x128xf32>
    %cst_21 = arith.constant dense<0.000000e+00> : vector<256x128xf32>
    %39 = tpu.matmul %37, %38, %cst_21 {dimension_numbers = #tpu.dot_dimension_numbers<[1], [0], [0], [1], [0, 0, 1, 1], [], []>} : vector<256x1152xf32>, vector<1152x128xf32>, vector<256x128xf32> -> vector<256x128xf32>
    %cst_22 = arith.constant dense<0.000000e+00> : vector<128xf32>
    %40 = vector.multi_reduction <add>, %39, %cst_22 [0] : vector<256x128xf32> to vector<128xf32>
    %41 = vector.shape_cast %40 : vector<128xf32> to vector<1x128xf32>
    %c0_23 = arith.constant 0 : index
    %c0_24 = arith.constant 0 : index
    %c0_25 = arith.constant 0 : index
    %42 = vector.load %arg6[%c0_23, %c0_24, %c0_25] : memref<1x1x128xf32, #tpu.memory_space<vmem>>, vector<1x1x128xf32>
    %43 = vector.shape_cast %42 : vector<1x1x128xf32> to vector<1x128xf32>
    %44 = vector.shape_cast %41 : vector<1x128xf32> to vector<1x1x128xf32>
    tpu.vector_store %arg6[%c0_23, %c0_24, %c0_25], %44 {strides = array<i32>} : memref<1x1x128xf32, #tpu.memory_space<vmem>>, vector<1x1x128xf32>,
    %45 = arith.mulf %39, %39 : vector<256x128xf32>
    %cst_26 = arith.constant dense<0.000000e+00> : vector<128xf32>
    %46 = vector.multi_reduction <add>, %45, %cst_26 [0] : vector<256x128xf32> to vector<128xf32>
    %47 = vector.shape_cast %46 : vector<128xf32> to vector<1x128xf32>
    %c0_27 = arith.constant 0 : index
    %c0_28 = arith.constant 0 : index
    %c0_29 = arith.constant 0 : index
    %48 = vector.load %arg7[%c0_27, %c0_28, %c0_29] : memref<1x1x128xf32, #tpu.memory_space<vmem>>, vector<1x1x128xf32>
    %49 = vector.shape_cast %48 : vector<1x1x128xf32> to vector<1x128xf32>
    %50 = vector.shape_cast %47 : vector<1x128xf32> to vector<1x1x128xf32>
    tpu.vector_store %arg7[%c0_27, %c0_28, %c0_29], %50 {strides = array<i32>} : memref<1x1x128xf32, #tpu.memory_space<vmem>>, vector<1x1x128xf32>,
    %51 = vector.shape_cast %39 : vector<256x128xf32> to vector<16x16x128xf32>
    %c0_30 = arith.constant 0 : index
    %c0_31 = arith.constant 0 : index
    %c0_32 = arith.constant 0 : index
    %c0_33 = arith.constant 0 : index
    %52 = vector.load %arg5[%c0_30, %c0_31, %c0_32, %c0_33] : memref<1x16x16x128xf32, #tpu.memory_space<vmem>>, vector<1x16x16x128xf32>
    %53 = vector.shape_cast %52 : vector<1x16x16x128xf32> to vector<16x16x128xf32>
    %54 = vector.shape_cast %51 : vector<16x16x128xf32> to vector<1x16x16x128xf32>
    tpu.vector_store %arg5[%c0_30, %c0_31, %c0_32, %c0_33], %54 {strides = array<i32>} : memref<1x16x16x128xf32, #tpu.memory_space<vmem>>, vector<1x16x16x128xf32>,
    return
  }
  func.func @transform_0(%arg0: i32) -> (i32, i32, i32, i32) {
    %c0_i32 = arith.constant 0 : i32
    %c0_i32_0 = arith.constant 0 : i32
    %c0_i32_1 = arith.constant 0 : i32
    %c0_i32_2 = arith.constant 0 : i32
    return %arg0, %c0_i32, %c0_i32_0, %c0_i32_1 : i32, i32, i32, i32
  }
  func.func @transform_1(%arg0: i32) -> (i32, i32) {
    %c0_i32 = arith.constant 0 : i32
    %c0_i32_0 = arith.constant 0 : i32
    %c0_i32_1 = arith.constant 0 : i32
    return %c0_i32, %c0_i32_0 : i32, i32
  }
  func.func @transform_2(%arg0: i32) -> (i32, i32) {
    %c0_i32 = arith.constant 0 : i32
    %c0_i32_0 = arith.constant 0 : i32
    %c0_i32_1 = arith.constant 0 : i32
    return %c0_i32, %c0_i32_0 : i32, i32
  }
  func.func @transform_3(%arg0: i32) -> (i32, i32) {
    %c0_i32 = arith.constant 0 : i32
    %c0_i32_0 = arith.constant 0 : i32
    %c0_i32_1 = arith.constant 0 : i32
    return %c0_i32, %c0_i32_0 : i32, i32
  }
  func.func @transform_4(%arg0: i32) -> (i32, i32, i32, i32) {
    %c0_i32 = arith.constant 0 : i32
    %c0_i32_0 = arith.constant 0 : i32
    %c0_i32_1 = arith.constant 0 : i32
    %c0_i32_2 = arith.constant 0 : i32
    return %arg0, %c0_i32, %c0_i32_0, %c0_i32_1 : i32, i32, i32, i32
  }
  func.func @transform_5(%arg0: i32) -> (i32, i32, i32) {
    %c0_i32 = arith.constant 0 : i32
    %c0_i32_0 = arith.constant 0 : i32
    %c0_i32_1 = arith.constant 0 : i32
    return %arg0, %c0_i32, %c0_i32_0 : i32, i32, i32
  }
  func.func @transform_6(%arg0: i32) -> (i32, i32, i32) {
    %c0_i32 = arith.constant 0 : i32
    %c0_i32_0 = arith.constant 0 : i32
    %c0_i32_1 = arith.constant 0 : i32
    return %arg0, %c0_i32, %c0_i32_0 : i32, i32, i32
  }
}

</mosaic_0001>

<bundles_post_ra>
// kernel: residual_block_forward.5
= control target key start
LH: loop header
LB: loop body
LE: loop exit
PB: predicated region body
PF: predicated region fallthrough
CT: control target
= control target key end

     0   :  { %s451_s12 = smov 0   ;;  %s610_s0 = inlined_call_operand.vmem [shape: f32[2,16,16,128], index: 0, kind: input, shape index: {}]   ;;  %s611_s1 = inlined_call_operand.vmem [shape: f32[1,128], index: 1, kind: input, shape index: {}]   ;;  %s612_s2 = inlined_call_operand.vmem [shape: f32[1,128], index: 2, kind: input, shape index: {}]   ;;  %s613_s3 = inlined_call_operand.vmem [shape: f32[2,16,16,128], index: 3, kind: output, shape index: {}]  }
   0x1 LB: > { %s400_s13 = sadd.s32 4294967295, %s429_s12   ;;  %p404_p0 = scmp.ge.s32.totalorder %s429_s12, 1  ;;  %s429_s12 = sphi %s451_s12, %s13_s12  }
   0x2   : > { %p137_p1 = scmp.lt.s32.totalorder %s429_s12, 3 }
   0x4   : > { %p138_p2 = pnand %p404_p0, %p137_p1 }
   0x5   : > { %p161_p3 = scmp.lt.s32.totalorder (!%p138_p2), %s400_s13, 1  ;;  %v462_v0 = vld [vmem:[%s611_s1] ss:$0 sm:$0xff] (!%p138_p2) }
   0x6   : > { %141 = sbr.rel (%p138_p2) target bundleno = 46 (0x2e), region = 32  ;;  %v472_v1 = vld [vmem:[%s612_s2] ss:$0 sm:$0xff] (!%p138_p2) }
   0xd   : > { %s615_s13 = smov (!%p161_p3, %s400_s13), 1 }
   0xe   : > { %s413_s14 = sshll.u32 %s615_s13, 8 }
   0xf   : > { %s467_s19 = scalar_lea.vmem %s610_s0, %s413_s14  ;;  %s495_s24 = scalar_lea.vmem %s613_s3, %s413_s14 }
  0x10   : > { %v173_v2 = vld [vmem:[%s467_s19] sm:$0xff]  ;;  %v174_v3 = vld [vmem:[%s467_s19 + $0x8] sm:$0xff]  ;;  %v175_v4 = vld [vmem:[%s467_s19 + $0x10] sm:$0xff] }
  0x11   : > { %v211_v5 = vmul.f32 %v462_v0, %v173_v2  ;;  %v212_v6 = vmul.f32 %v462_v0, %v174_v3  ;;  %v213_v7 = vmul.f32 %v462_v0, %v175_v4  ;;  %v176_v8 = vld [vmem:[%s467_s19 + $0x18] sm:$0xff]  ;;  %v177_v9 = vld [vmem:[%s467_s19 + $0x20] sm:$0xff]  ;;  %v178_v10 = vld [vmem:[%s467_s19 + $0x28] sm:$0xff] }
  0x12   : > { %v214_v11 = vmul.f32 %v462_v0, %v176_v8  ;;  %v215_v12 = vmul.f32 %v462_v0, %v177_v9  ;;  %v216_v13 = vmul.f32 %v462_v0, %v178_v10  ;;  %v179_v14 = vld [vmem:[%s467_s19 + $0x30] sm:$0xff]  ;;  %v180_v15 = vld [vmem:[%s467_s19 + $0x38] sm:$0xff]  ;;  %v181_v24 = vld [vmem:[%s467_s19 + $0x40] sm:$0xff] }
  0x13   : > { %v249_v16 = vadd.f32 %v472_v1, %v211_v5  ;;  %v250_v17 = vadd.f32 %v472_v1, %v212_v6  ;;  %v251_v18 = vadd.f32 %v472_v1, %v213_v7  ;;  %v217_v19 = vmul.f32 %v462_v0, %v179_v14  ;;  %v182_v25 = vld [vmem:[%s467_s19 + $0x48] sm:$0xff]  ;;  %v183_v26 = vld [vmem:[%s467_s19 + $0x50] sm:$0xff]  ;;  %v184_v31 = vld [vmem:[%s467_s19 + $0x58] sm:$0xff] }
  0x14   : > { %v252_v20 = vadd.f32 %v472_v1, %v214_v11  ;;  %v253_v21 = vadd.f32 %v472_v1, %v215_v12  ;;  %v254_v22 = vadd.f32 %v472_v1, %v216_v13  ;;  %v218_v23 = vmul.f32 %v462_v0, %v180_v15  ;;  %v185_v32 = vld [vmem:[%s467_s19 + $0x60] sm:$0xff]  ;;  %v186_v33 = vld [vmem:[%s467_s19 + $0x68] sm:$0xff]  ;;  %v187_v38 = vld [vmem:[%s467_s19 + $0x70] sm:$0xff] }
  0x15   : > { %v281_v27 = vmax.f32 %v249_v16, 0.0  ;;  %v282_v28 = vmax.f32 %v250_v17, 0.0  ;;  %v283_v29 = vmax.f32 %v251_v18, 0.0  ;;  %v255_v30 = vadd.f32 %v472_v1, %v217_v19  ;;  %v188_v43 = vld [vmem:[%s467_s19 + $0x78] sm:$0xff]  ;;  %v189_v56 = vld [vmem:[%s467_s19 + $0x80] sm:$0xff]  ;;  %v190_v57 = vld [vmem:[%s467_s19 + $0x88] sm:$0xff] }
  0x16   : > { %v284_v34 = vmax.f32 %v252_v20, 0.0  ;;  %v285_v35 = vmax.f32 %v253_v21, 0.0  ;;  %v286_v36 = vmax.f32 %v254_v22, 0.0  ;;  %v256_v37 = vadd.f32 %v472_v1, %v218_v23  ;;  %v191_v58 = vld [vmem:[%s467_s19 + $0x90] sm:$0xff]  ;;  %v192_v63 = vld [vmem:[%s467_s19 + $0x98] sm:$0xff]  ;;  %v193_v2 = vld [vmem:[%s467_s19 + $0xa0] sm:$0xff] }
  0x17   : > { %313 = vst [vmem:[%s495_s24] sm:$0xff] %v281_v27  ;;  %314 = vst [vmem:[%s495_s24 + $0x8] sm:$0xff] %v282_v28  ;;  %v287_v39 = vmax.f32 %v255_v30, 0.0  ;;  %v219_v40 = vmul.f32 %v462_v0, %v181_v24  ;;  %v220_v41 = vmul.f32 %v462_v0, %v182_v25  ;;  %v221_v42 = vmul.f32 %v462_v0, %v183_v26  ;;  %v194_v3 = vld [vmem:[%s467_s19 + $0xa8] sm:$0xff]  ;;  %v195_v8 = vld [vmem:[%s467_s19 + $0xb0] sm:$0xff] }
  0x18   : > { %315 = vst [vmem:[%s495_s24 + $0x10] sm:$0xff] %v283_v29  ;;  %316 = vst [vmem:[%s495_s24 + $0x18] sm:$0xff] %v284_v34  ;;  %v288_v44 = vmax.f32 %v256_v37, 0.0  ;;  %v222_v45 = vmul.f32 %v462_v0, %v184_v31  ;;  %v223_v46 = vmul.f32 %v462_v0, %v185_v32  ;;  %v224_v47 = vmul.f32 %v462_v0, %v186_v33  ;;  %v196_v13 = vld [vmem:[%s467_s19 + $0xb8] sm:$0xff]  ;;  %v197_v26 = vld [vmem:[%s467_s19 + $0xc0] sm:$0xff] }
  0x19   : > { %317 = vst [vmem:[%s495_s24 + $0x20] sm:$0xff] %v285_v35  ;;  %318 = vst [vmem:[%s495_s24 + $0x28] sm:$0xff] %v286_v36  ;;  %v257_v48 = vadd.f32 %v472_v1, %v219_v40  ;;  %v258_v49 = vadd.f32 %v472_v1, %v220_v41  ;;  %v259_v50 = vadd.f32 %v472_v1, %v221_v42  ;;  %v198_v27 = vld [vmem:[%s467_s19 + $0xc8] sm:$0xff]  ;;  %v199_v28 = vld [vmem:[%s467_s19 + $0xd0] sm:$0xff] }
  0x1a   : > { %319 = vst [vmem:[%s495_s24 + $0x30] sm:$0xff] %v287_v39  ;;  %v225_v51 = vmul.f32 %v462_v0, %v187_v38  ;;  %320 = vst [vmem:[%s495_s24 + $0x38] sm:$0xff] %v288_v44  ;;  %v260_v52 = vadd.f32 %v472_v1, %v222_v45  ;;  %v261_v53 = vadd.f32 %v472_v1, %v223_v46  ;;  %v200_v33 = vld [vmem:[%s467_s19 + $0xd8] sm:$0xff]  ;;  %v201_v34 = vld [vmem:[%s467_s19 + $0xe0] sm:$0xff] }
  0x1b   : > { %v262_v54 = vadd.f32 %v472_v1, %v224_v47  ;;  %v226_v55 = vmul.f32 %v462_v0, %v188_v43  ;;  %v289_v59 = vmax.f32 %v257_v48, 0.0  ;;  %v290_v60 = vmax.f32 %v258_v49, 0.0  ;;  %v202_v35 = vld [vmem:[%s467_s19 + $0xe8] sm:$0xff]  ;;  %v203_v40 = vld [vmem:[%s467_s19 + $0xf0] sm:$0xff]  ;;  %v204_v45 = vld [vmem:[%s467_s19 + $0xf8] sm:$0xff] }
  0x1c   : > { %v291_v61 = vmax.f32 %v259_v50, 0.0  ;;  %v263_v62 = vadd.f32 %v472_v1, %v225_v51  ;;  %v292_v4 = vmax.f32 %v260_v52, 0.0  ;;  %v293_v5 = vmax.f32 %v261_v53, 0.0 }
  0x1d   : > { %v294_v6 = vmax.f32 %v262_v54, 0.0  ;;  %v264_v7 = vadd.f32 %v472_v1, %v226_v55  ;;  %321 = vst [vmem:[%s495_s24 + $0x40] sm:$0xff] %v289_v59  ;;  %322 = vst [vmem:[%s495_s24 + $0x48] sm:$0xff] %v290_v60  ;;  %v227_v10 = vmul.f32 %v462_v0, %v189_v56  ;;  %v228_v11 = vmul.f32 %v462_v0, %v190_v57 }
  0x1e   : > { %323 = vst [vmem:[%s495_s24 + $0x50] sm:$0xff] %v291_v61  ;;  %v295_v9 = vmax.f32 %v263_v62, 0.0  ;;  %v229_v12 = vmul.f32 %v462_v0, %v191_v58  ;;  %324 = vst [vmem:[%s495_s24 + $0x58] sm:$0xff] %v292_v4  ;;  %v230_v15 = vmul.f32 %v462_v0, %v192_v63  ;;  %v231_v16 = vmul.f32 %v462_v0, %v193_v2 }
  0x1f   : > { %325 = vst [vmem:[%s495_s24 + $0x60] sm:$0xff] %v293_v5  ;;  %326 = vst [vmem:[%s495_s24 + $0x68] sm:$0xff] %v294_v6  ;;  %v296_v14 = vmax.f32 %v264_v7, 0.0  ;;  %v232_v17 = vmul.f32 %v462_v0, %v194_v3  ;;  %v265_v18 = vadd.f32 %v472_v1, %v227_v10  ;;  %v266_v19 = vadd.f32 %v472_v1, %v228_v11 }
  0x20   : > { %327 = vst [vmem:[%s495_s24 + $0x70] sm:$0xff] %v295_v9  ;;  %v267_v20 = vadd.f32 %v472_v1, %v229_v12  ;;  %v233_v21 = vmul.f32 %v462_v0, %v195_v8  ;;  %v268_v22 = vadd.f32 %v472_v1, %v230_v15  ;;  %v269_v23 = vadd.f32 %v472_v1, %v231_v16 }
  0x21   : > { %328 = vst [vmem:[%s495_s24 + $0x78] sm:$0xff] %v296_v14  ;;  %v270_v24 = vadd.f32 %v472_v1, %v232_v17  ;;  %v234_v25 = vmul.f32 %v462_v0, %v196_v13  ;;  %v297_v29 = vmax.f32 %v265_v18, 0.0  ;;  %v298_v30 = vmax.f32 %v266_v19, 0.0 }
  0x22   : > { %v299_v31 = vmax.f32 %v267_v20, 0.0  ;;  %v271_v32 = vadd.f32 %v472_v1, %v233_v21  ;;  %v300_v36 = vmax.f32 %v268_v22, 0.0  ;;  %v301_v37 = vmax.f32 %v269_v23, 0.0 }
  0x23   : > { %v302_v38 = vmax.f32 %v270_v24, 0.0  ;;  %v272_v39 = vadd.f32 %v472_v1, %v234_v25  ;;  %329 = vst [vmem:[%s495_s24 + $0x80] sm:$0xff] %v297_v29  ;;  %330 = vst [vmem:[%s495_s24 + $0x88] sm:$0xff] %v298_v30  ;;  %v235_v42 = vmul.f32 %v462_v0, %v197_v26  ;;  %v236_v43 = vmul.f32 %v462_v0, %v198_v27 }
  0x24   : > { %331 = vst [vmem:[%s495_s24 + $0x90] sm:$0xff] %v299_v31  ;;  %v303_v41 = vmax.f32 %v271_v32, 0.0  ;;  %v237_v44 = vmul.f32 %v462_v0, %v199_v28  ;;  %332 = vst [vmem:[%s495_s24 + $0x98] sm:$0xff] %v300_v36  ;;  %v238_v47 = vmul.f32 %v462_v0, %v200_v33  ;;  %v239_v48 = vmul.f32 %v462_v0, %v201_v34 }
  0x25   : > { %333 = vst [vmem:[%s495_s24 + $0xa0] sm:$0xff] %v301_v37  ;;  %334 = vst [vmem:[%s495_s24 + $0xa8] sm:$0xff] %v302_v38  ;;  %v304_v46 = vmax.f32 %v272_v39, 0.0  ;;  %v240_v49 = vmul.f32 %v462_v0, %v202_v35  ;;  %v273_v50 = vadd.f32 %v472_v1, %v235_v42  ;;  %v274_v51 = vadd.f32 %v472_v1, %v236_v43 }
  0x26   : > { %335 = vst [vmem:[%s495_s24 + $0xb0] sm:$0xff] %v303_v41  ;;  %v275_v52 = vadd.f32 %v472_v1, %v237_v44  ;;  %v241_v53 = vmul.f32 %v462_v0, %v203_v40  ;;  %v276_v54 = vadd.f32 %v472_v1, %v238_v47  ;;  %v277_v55 = vadd.f32 %v472_v1, %v239_v48 }
  0x27   : > { %336 = vst [vmem:[%s495_s24 + $0xb8] sm:$0xff] %v304_v46  ;;  %v278_v56 = vadd.f32 %v472_v1, %v240_v49  ;;  %v242_v57 = vmul.f32 %v462_v0, %v204_v45  ;;  %v305_v58 = vmax.f32 %v273_v50, 0.0  ;;  %v306_v59 = vmax.f32 %v274_v51, 0.0 }
  0x28   : > { %v307_v60 = vmax.f32 %v275_v52, 0.0  ;;  %v279_v61 = vadd.f32 %v472_v1, %v241_v53  ;;  %v308_v62 = vmax.f32 %v276_v54, 0.0  ;;  %v309_v63 = vmax.f32 %v277_v55, 0.0 }
  0x29   : > { %v310_v2 = vmax.f32 %v278_v56, 0.0  ;;  %v280_v3 = vadd.f32 %v472_v1, %v242_v57  ;;  %337 = vst [vmem:[%s495_s24 + $0xc0] sm:$0xff] %v305_v58  ;;  %338 = vst [vmem:[%s495_s24 + $0xc8] sm:$0xff] %v306_v59 }
  0x2a   : > { %339 = vst [vmem:[%s495_s24 + $0xd0] sm:$0xff] %v307_v60  ;;  %v311_v4 = vmax.f32 %v279_v61, 0.0  ;;  %340 = vst [vmem:[%s495_s24 + $0xd8] sm:$0xff] %v308_v62 }
  0x2b   : > { %341 = vst [vmem:[%s495_s24 + $0xe0] sm:$0xff] %v309_v63  ;;  %342 = vst [vmem:[%s495_s24 + $0xe8] sm:$0xff] %v310_v2  ;;  %v312_v0 = vmax.f32 %v280_v3, 0.0 }
  0x2c   : > { %343 = vst [vmem:[%s495_s24 + $0xf0] sm:$0xff] %v311_v4 }
  0x2d   : > { %344 = vst [vmem:[%s495_s24 + $0xf8] sm:$0xff] %v312_v0 }
  0x2e PF: > { %s13_s12 = sadd.s32 1, %s429_s12  }
  0x2f   : > { %p10_p4 = scmp.ge.s32.totalorder %s13_s12, 4  }
  0x31   :  { %12 = sbr.rel (!%p10_p4) target bundleno = 1 (0x1), region = 62 }

// kernel: residual_block_forward.3
= control target key start
LH: loop header
LB: loop body
LE: loop exit
PB: predicated region body
PF: predicated region fallthrough
CT: control target
= control target key end

     0   :  { %s2861_s21 = smov 0   ;;  %s4562_s0 = inlined_call_operand.vmem [shape: f32[2,16,16,128], index: 0, kind: input, shape index: {}]   ;;  %s4563_s1 = inlined_call_operand.vmem [shape: f32[1152,128], index: 1, kind: input, shape index: {}]   ;;  %s4564_s2 = inlined_call_operand.vmem [shape: f32[1,128], index: 2, kind: input, shape index: {}]   ;;  %s4565_s3 = inlined_call_operand.vmem [shape: f32[1,128], index: 3, kind: input, shape index: {}]   ;;  %s4566_s4 = inlined_call_operand.vmem [shape: f32[2,16,16,128], index: 4, kind: output, shape index: {0}]   ;;  %s4567_s5 = inlined_call_operand.vmem [shape: f32[2,1,128], index: 5, kind: output, shape index: {1}]   ;;  %s4568_s6 = inlined_call_operand.vmem [shape: f32[2,1,128], index: 6, kind: output, shape index: {2}]  }
   0x1 LB: > { %s2264_s2 = sadd.s32 4294967295, %s2822_s21   ;;  %p2268_p0 = scmp.ge.s32.totalorder %s2822_s21, 1  ;;  %s2822_s21 = sphi %s2861_s21, %s17_s21  }
   0x2   : > { %p217_p1 = scmp.lt.s32.totalorder %s2822_s21, 3 }
   0x4   : > { %p218_p2 = pnand %p2268_p0, %p217_p1 }
   0x6   : > { %221 = sbr.rel (%p218_p2) target bundleno = 645 (0x285), region = 36 }
   0xd   : > { %v2872_v0 = vld [vmem:[%s4563_s1] sm:$0xff]  ;;  %v2877_v1 = vld [vmem:[%s4563_s1 + $0x8] sm:$0xff]  ;;  %vm490_vm0 = vcmask 1046528   ;;  %v4569_v3 = vmov 0.0|0.0   ;;  %v2894_v6 = vld [vmem:[%s4563_s1 + $0x10] sm:$0xff]  ;;  %v2825_v8 = vmov 0.0  }
   0xe   : > { %v2882_v2 = vld [vmem:[%s4563_s1 + $0x100] sm:$0xff]  ;;  %2405 = vmatprep.subr.bf16.mxu1 %v4569_v3  ;;  %2453 = vmatprep.subr.bf16.mxu0 %v4569_v3  ;;  %v2406_v4 = vpack.c.bf16 %v2877_v1, %v2872_v0  ;;  %v783_v5 = vld [vmem:[%s4563_s1 + $0x108] sm:$0xff]  ;;  %v2899_v7 = vld [vmem:[%s4563_s1 + $0x18] sm:$0xff]  ;;  %301 = vst [vmem:[#allocation2] sm:$0xff] %v2825_v8  ;;  %v2903_v9 = vrot.slane %v2825_v8, 1  ;;  %p253_p3 = scmp.lt.s32.totalorder %s2264_s2, 1 }
   0xf   : > { %303 = vst [vmem:[#allocation2 + $0x10] sm:$0x3] %v2825_v8  ;;  %304 = vst [vmem:[#allocation2 + $0x18] sm:$0xff] %v2825_v8  ;;  %v2454_v10 = vpack.c.bf16 %v783_v5, %v2882_v2  ;;  %v784_v11 = vld [vmem:[%s4563_s1 + $0x110] sm:$0xff]  ;;  %v785_v12 = vld [vmem:[%s4563_s1 + $0x118] sm:$0xff]  ;;  %v2409_v13 = vpack.c.bf16 %v2899_v7, %v2894_v6  ;;  %vm603_vm1 = vcmask 1045504  }
  0x10   : > { %305 = vst [vmem:[#allocation2 + $0x20] sm:$0xff] %v2825_v8  ;;  %306 = vst [vmem:[#allocation2 + $0x28] sm:$0x3] %v2825_v8  ;;  %2407 = vmatpush1.bf16.msra.mxu1 %v2406_v4  ;;  %v2457_v14 = vpack.c.bf16 %v785_v12, %v784_v11  ;;  %v754_v15 = vld [vmem:[%s4563_s1 + $0x20] sm:$0xff]  ;;  %v755_v16 = vld [vmem:[%s4563_s1 + $0x28] sm:$0xff]  ;;  %958 = vmatprep.mubr.f32.mxu1 %v2903_v9  ;;  %s4727_s2 = smov (!%p253_p3, %s2264_s2), 1 }
  0x11   : > { %307 = vst [vmem:[#allocation2 + $0x30] sm:$0xff] %v2825_v8  ;;  %308 = vst [vmem:[#allocation2 + $0x38] sm:$0xff] %v2825_v8  ;;  %2455 = vmatpush1.bf16.msra.mxu0 %v2454_v10  ;;  %2408 = vmatprep.subr.bf16.mxu1 %v4569_v3  ;;  %v786_v17 = vld [vmem:[%s4563_s1 + $0x120] sm:$0xff]  ;;  %v787_v18 = vld [vmem:[%s4563_s1 + $0x128] sm:$0xff]  ;;  %v2412_v19 = vpack.c.bf16 %v755_v16, %v754_v15  ;;  %s2275_s13 = sshll.u32 %s4727_s2, 8  ;;  %s265_s19 = scalar_lea.vmem %s4567_s5, %s4727_s2 }
  0x12   : > { %309 = vst [vmem:[#allocation2 + $0x40] sm:$0x3] %v2825_v8  ;;  %310 = vst [vmem:[#allocation2 + $0x48] sm:$0xff] %v2825_v8  ;;  %2456 = vmatprep.subr.bf16.mxu0 %v4569_v3  ;;  %v2460_v20 = vpack.c.bf16 %v787_v18, %v786_v17  ;;  %v756_v21 = vld [vmem:[%s4563_s1 + $0x30] sm:$0xff]  ;;  %v757_v22 = vld [vmem:[%s4563_s1 + $0x38] sm:$0xff]  ;;  %s3033_s24 = scalar_lea.vmem %s4562_s0, %s2275_s13  ;;  %s268_s22 = scalar_lea.vmem %s4568_s6, %s4727_s2 }
  0x13   : > { %311 = vst [vmem:[#allocation2 + $0x50] sm:$0xff] %v2825_v8  ;;  %312 = vst [vmem:[#allocation2 + $0x58] sm:$0x3] %v2825_v8  ;;  %v788_v23 = vld [vmem:[%s4563_s1 + $0x130] sm:$0xff]  ;;  %v789_v24 = vld [vmem:[%s4563_s1 + $0x138] sm:$0xff]  ;;  %v2415_v25 = vpack.c.bf16 %v757_v22, %v756_v21 }
  0x14   : > { %313 = vst [vmem:[#allocation2 + $0x60] sm:$0xff] %v2825_v8  ;;  %314 = vst [vmem:[#allocation2 + $0x68] sm:$0xff] %v2825_v8  ;;  %2410 = vmatpush1.bf16.msra.mxu1 %v2409_v13  ;;  %v2463_v26 = vpack.c.bf16 %v789_v24, %v788_v23  ;;  %v758_v27 = vld [vmem:[%s4563_s1 + $0x40] sm:$0xff]  ;;  %v759_v28 = vld [vmem:[%s4563_s1 + $0x48] sm:$0xff] }
  0x15   : > { %315 = vst [vmem:[#allocation2 + $0x70] sm:$0x3] %v2825_v8  ;;  %316 = vst [vmem:[#allocation2 + $0x78] sm:$0xff] %v2825_v8  ;;  %2458 = vmatpush1.bf16.msra.mxu0 %v2457_v14  ;;  %2411 = vmatprep.subr.bf16.mxu1 %v4569_v3  ;;  %v790_v29 = vld [vmem:[%s4563_s1 + $0x140] sm:$0xff]  ;;  %v791_v30 = vld [vmem:[%s4563_s1 + $0x148] sm:$0xff]  ;;  %v2418_v31 = vpack.c.bf16 %v759_v28, %v758_v27 }
  0x16   : > { %317 = vst [vmem:[#allocation2 + $0x80] sm:$0xff] %v2825_v8  ;;  %318 = vst [vmem:[#allocation2 + $0x88] sm:$0x3] %v2825_v8  ;;  %2459 = vmatprep.subr.bf16.mxu0 %v4569_v3  ;;  %v2466_v32 = vpack.c.bf16 %v791_v30, %v790_v29  ;;  %v760_v33 = vld [vmem:[%s4563_s1 + $0x50] sm:$0xff]  ;;  %v761_v34 = vld [vmem:[%s4563_s1 + $0x58] sm:$0xff] }
  0x17   : > { %319 = vst [vmem:[#allocation2 + $0x90] sm:$0xff] %v2825_v8  ;;  %320 = vst [vmem:[#allocation2 + $0x98] sm:$0xff] %v2825_v8  ;;  %v792_v35 = vld [vmem:[%s4563_s1 + $0x150] sm:$0xff]  ;;  %v793_v36 = vld [vmem:[%s4563_s1 + $0x158] sm:$0xff]  ;;  %v2421_v37 = vpack.c.bf16 %v761_v34, %v760_v33 }
  0x18   : > { %321 = vst [vmem:[#allocation2 + $0xa0] sm:$0x3] %v2825_v8  ;;  %322 = vst [vmem:[#allocation2 + $0xa8] sm:$0xff] %v2825_v8  ;;  %2413 = vmatpush1.bf16.msra.mxu1 %v2412_v19  ;;  %v2469_v38 = vpack.c.bf16 %v793_v36, %v792_v35  ;;  %v762_v39 = vld [vmem:[%s4563_s1 + $0x60] sm:$0xff]  ;;  %v763_v40 = vld [vmem:[%s4563_s1 + $0x68] sm:$0xff] }
  0x19   : > { %323 = vst [vmem:[#allocation2 + $0xb0] sm:$0xff] %v2825_v8  ;;  %324 = vst [vmem:[#allocation2 + $0xb8] sm:$0x3] %v2825_v8  ;;  %2461 = vmatpush1.bf16.msra.mxu0 %v2460_v20  ;;  %2414 = vmatprep.subr.bf16.mxu1 %v4569_v3  ;;  %v794_v41 = vld [vmem:[%s4563_s1 + $0x160] sm:$0xff]  ;;  %v795_v42 = vld [vmem:[%s4563_s1 + $0x168] sm:$0xff]  ;;  %v2424_v45 = vpack.c.bf16 %v763_v40, %v762_v39 }
  0x1a   : > { %325 = vst [vmem:[#allocation2 + $0xc0] sm:$0xff] %v2825_v8  ;;  %326 = vst [vmem:[#allocation2 + $0xc8] sm:$0xff] %v2825_v8  ;;  %2462 = vmatprep.subr.bf16.mxu0 %v4569_v3  ;;  %v269_v43 = vld [vmem:[%s3033_s24] sm:$0xff]  ;;  %v270_v44 = vld [vmem:[%s3033_s24 + $0x8] sm:$0xff]  ;;  %v2472_v49 = vpack.c.bf16 %v795_v42, %v794_v41 }
  0x1b   : > { %327 = vst [vmem:[#allocation2 + $0xd0] sm:$0x3] %v2825_v8  ;;  %328 = vst [vmem:[#allocation2 + $0xd8] sm:$0xff] %v2825_v8  ;;  %v764_v46 = vld [vmem:[%s4563_s1 + $0x70] sm:$0xff]  ;;  %v765_v47 = vld [vmem:[%s4563_s1 + $0x78] sm:$0xff] }
  0x1c   : > { %329 = vst [vmem:[#allocation2 + $0xe0] sm:$0xff] %v2825_v8  ;;  %330 = vst [vmem:[#allocation2 + $0xe8] sm:$0x3] %v2825_v8  ;;  %2416 = vmatpush1.bf16.msra.mxu1 %v2415_v25  ;;  %v271_v48 = vld [vmem:[%s3033_s24 + $0x10] sm:$0xff]  ;;  %v272_v51 = vld [vmem:[%s3033_s24 + $0x18] sm:$0xff]  ;;  %v2427_v57 = vpack.c.bf16 %v765_v47, %v764_v46 }
  0x1d   : > { %331 = vst [vmem:[#allocation2 + $0xf0] sm:$0xff] %v2825_v8  ;;  %332 = vst [vmem:[#allocation2 + $0xf8] sm:$0xff] %v2825_v8  ;;  %2464 = vmatpush1.bf16.msra.mxu0 %v2463_v26  ;;  %2417 = vmatprep.subr.bf16.mxu1 %v4569_v3  ;;  %v796_v50 = vld [vmem:[%s4563_s1 + $0x170] sm:$0xff]  ;;  %v273_v52 = vld [vmem:[%s3033_s24 + $0x20] sm:$0xff] }
  0x1e   : > { %333 = vst [vmem:[#allocation2 + $0x100] sm:$0x3] %v2825_v8  ;;  %334 = vst [vmem:[#allocation2 + $0x108] sm:$0xff] %v2825_v8  ;;  %2465 = vmatprep.subr.bf16.mxu0 %v4569_v3  ;;  %v797_v53 = vld [vmem:[%s4563_s1 + $0x178] sm:$0xff]  ;;  %v274_v54 = vld [vmem:[%s3033_s24 + $0x28] sm:$0xff] }
  0x1f   : > { %335 = vst [vmem:[#allocation2 + $0x110] sm:$0xff] %v2825_v8  ;;  %336 = vst [vmem:[#allocation2 + $0x118] sm:$0x3] %v2825_v8  ;;  %v275_v55 = vld [vmem:[%s3033_s24 + $0x30] sm:$0xff]  ;;  %v276_v56 = vld [vmem:[%s3033_s24 + $0x38] sm:$0xff]  ;;  %v2475_v61 = vpack.c.bf16 %v797_v53, %v796_v50 }
  0x20   : > { %337 = vst [vmem:[#allocation2 + $0x120] sm:$0xff] %v2825_v8  ;;  %338 = vst [vmem:[#allocation2 + $0x128] sm:$0xff] %v2825_v8  ;;  %2419 = vmatpush1.bf16.msra.mxu1 %v2418_v31  ;;  %v766_v58 = vld [vmem:[%s4563_s1 + $0x80] sm:$0xff]  ;;  %v767_v59 = vld [vmem:[%s4563_s1 + $0x88] sm:$0xff] }
  0x21   : > { %339 = vst [vmem:[#allocation2 + $0x130] sm:$0x3] %v2825_v8  ;;  %340 = vst [vmem:[#allocation2 + $0x138] sm:$0xff] %v2825_v8  ;;  %2467 = vmatpush1.bf16.msra.mxu0 %v2466_v32  ;;  %2420 = vmatprep.subr.bf16.mxu1 %v4569_v3  ;;  %v277_v60 = vld [vmem:[%s3033_s24 + $0x40] sm:$0xff]  ;;  %v278_v63 = vld [vmem:[%s3033_s24 + $0x48] sm:$0xff]  ;;  %v2430_v6 = vpack.c.bf16 %v767_v59, %v766_v58 }
  0x22   : > { %341 = vst [vmem:[#allocation2 + $0x140] sm:$0xff] %v2825_v8  ;;  %342 = vst [vmem:[#allocation2 + $0x148] sm:$0x3] %v2825_v8  ;;  %2468 = vmatprep.subr.bf16.mxu0 %v4569_v3  ;;  %v798_v62 = vld [vmem:[%s4563_s1 + $0x180] sm:$0xff]  ;;  %v279_v0 = vld [vmem:[%s3033_s24 + $0x50] sm:$0xff] }
  0x23   : > { %343 = vst [vmem:[#allocation2 + $0x150] sm:$0xff] %v2825_v8  ;;  %344 = vst [vmem:[#allocation2 + $0x158] sm:$0xff] %v2825_v8  ;;  %v799_v1 = vld [vmem:[%s4563_s1 + $0x188] sm:$0xff]  ;;  %v280_v4 = vld [vmem:[%s3033_s24 + $0x58] sm:$0xff] }
  0x24   : > { %345 = vst [vmem:[#allocation2 + $0x160] sm:$0x3] %v2825_v8  ;;  %346 = vst [vmem:[#allocation2 + $0x168] sm:$0xff] %v2825_v8  ;;  %2422 = vmatpush1.bf16.msra.mxu1 %v2421_v37  ;;  %v281_v5 = vld [vmem:[%s3033_s24 + $0x60] sm:$0xff]  ;;  %v2478_v7 = vpack.c.bf16 %v799_v1, %v798_v62  ;;  %v768_v10 = vld [vmem:[%s4563_s1 + $0x90] sm:$0xff] }
  0x25   : > { %347 = vst [vmem:[#allocation2 + $0x170] sm:$0xff] %v2825_v8  ;;  %348 = vst [vmem:[#allocation2 + $0x178] sm:$0x3] %v2825_v8  ;;  %2470 = vmatpush1.bf16.msra.mxu0 %v2469_v38  ;;  %2423 = vmatprep.subr.bf16.mxu1 %v4569_v3  ;;  %v769_v11 = vld [vmem:[%s4563_s1 + $0x98] sm:$0xff]  ;;  %v800_v12 = vld [vmem:[%s4563_s1 + $0x190] sm:$0xff] }
  0x26   : > { %349 = vst [vmem:[#allocation2 + $0x180] sm:$0xff] %v2825_v8  ;;  %350 = vst [vmem:[#allocation2 + $0x188] sm:$0xff] %v2825_v8  ;;  %2471 = vmatprep.subr.bf16.mxu0 %v4569_v3  ;;  %v801_v13 = vld [vmem:[%s4563_s1 + $0x198] sm:$0xff]  ;;  %v2433_v14 = vpack.c.bf16 %v769_v11, %v768_v10  ;;  %v770_v16 = vld [vmem:[%s4563_s1 + $0xa0] sm:$0xff] }
  0x27   : > { %351 = vst [vmem:[#allocation2 + $0x190] sm:$0x3] %v2825_v8  ;;  %354 = vst [vmem:[#allocation2 + $0x1a8] sm:$0x3] %v2825_v8  ;;  %v2481_v15 = vpack.c.bf16 %v801_v13, %v800_v12  ;;  %v771_v17 = vld [vmem:[%s4563_s1 + $0xa8] sm:$0xff]  ;;  %v802_v18 = vld [vmem:[%s4563_s1 + $0x1a0] sm:$0xff] }
  0x28   : > { %356 = vst [vmem:[#allocation2 + $0x19] sm:$0xff] %v269_v43  ;;  %357 = vst [vmem:[#allocation2 + $0x21] sm:$0xff] %v270_v44  ;;  %2425 = vmatpush1.bf16.msra.mxu1 %v2424_v45  ;;  %v803_v19 = vld [vmem:[%s4563_s1 + $0x1a8] sm:$0xff]  ;;  %v2436_v20 = vpack.c.bf16 %v771_v17, %v770_v16  ;;  %v283_v22 = vld [vmem:[%s3033_s24 + $0x70] sm:$0xff] }
  0x29   : > { %358 = vst [vmem:[#allocation2 + $0x31] sm:$0xff] %v271_v48  ;;  %359 = vst [vmem:[#allocation2 + $0x39] sm:$0xff] %v272_v51  ;;  %2473 = vmatpush1.bf16.msra.mxu0 %v2472_v49  ;;  %2426 = vmatprep.subr.bf16.mxu1 %v4569_v3  ;;  %v282_v21 = vld [vmem:[%s3033_s24 + $0x68] sm:$0xff]  ;;  %v2484_v23 = vpack.c.bf16 %v803_v19, %v802_v18  ;;  %v772_v24 = vld [vmem:[%s4563_s1 + $0xb0] sm:$0xff] }
  0x2a   : > { %360 = vst [vmem:[#allocation2 + $0x49] sm:$0xff] %v273_v52  ;;  %361 = vst [vmem:[#allocation2 + $0x51] sm:$0xff] %v274_v54  ;;  %2474 = vmatprep.subr.bf16.mxu0 %v4569_v3  ;;  %v773_v25 = vld [vmem:[%s4563_s1 + $0xb8] sm:$0xff]  ;;  %v804_v26 = vld [vmem:[%s4563_s1 + $0x1b0] sm:$0xff] }
  0x2b   : > { %362 = vst [vmem:[#allocation2 + $0x61] sm:$0xff] %v275_v55  ;;  %363 = vst [vmem:[#allocation2 + $0x69] sm:$0xff] %v276_v56  ;;  %v805_v27 = vld [vmem:[%s4563_s1 + $0x1b8] sm:$0xff]  ;;  %v285_v29 = vld [vmem:[%s3033_s24 + $0x80] sm:$0xff]  ;;  %v2439_v30 = vpack.c.bf16 %v773_v25, %v772_v24 }
  0x2c   : > { %364 = vst [vmem:[#allocation2 + $0x79] sm:$0xff] %v277_v60  ;;  %365 = vst [vmem:[#allocation2 + $0x81] sm:$0xff] %v278_v63  ;;  %2428 = vmatpush1.bf16.msra.mxu1 %v2427_v57  ;;  %v284_v28 = vld [vmem:[%s3033_s24 + $0x78] sm:$0xff]  ;;  %v286_v31 = vld [vmem:[%s3033_s24 + $0x88] sm:$0xff]  ;;  %v2487_v33 = vpack.c.bf16 %v805_v27, %v804_v26 }
  0x2d   : > { %366 = vst [vmem:[#allocation2 + $0x91] sm:$0xff] %v279_v0  ;;  %367 = vst [vmem:[#allocation2 + $0x99] sm:$0xff] %v280_v4  ;;  %2476 = vmatpush1.bf16.msra.mxu0 %v2475_v61  ;;  %2429 = vmatprep.subr.bf16.mxu1 %v4569_v3  ;;  %v287_v32 = vld [vmem:[%s3033_s24 + $0x90] sm:$0xff]  ;;  %v774_v34 = vld [vmem:[%s4563_s1 + $0xc0] sm:$0xff]  ;;  %v604_v0 = vrot.slane %v2825_v8, 2 }
  0x2e   : > { %368 = vst [vmem:[#allocation2 + $0xa9] sm:$0xff] %v281_v5  ;;  %2477 = vmatprep.subr.bf16.mxu0 %v4569_v3  ;;  %369 = vst [vmem:[#allocation2 + $0xb1] sm:$0xff] %v282_v21  ;;  %v775_v35 = vld [vmem:[%s4563_s1 + $0xc8] sm:$0xff]  ;;  %v806_v36 = vld [vmem:[%s4563_s1 + $0x1c0] sm:$0xff] }
  0x2f   : > { %v3088_v2 = vld [vmem:[#allocation2 + $0x18] sm:$0xff]  ;;  %370 = vst [vmem:[#allocation2 + $0xc1] sm:$0xff] %v283_v22  ;;  %371 = vst [vmem:[#allocation2 + $0xc9] sm:$0xff] %v284_v28  ;;  %v807_v37 = vld [vmem:[%s4563_s1 + $0x1c8] sm:$0xff]  ;;  %v2442_v40 = vpack.c.bf16 %v775_v35, %v774_v34 }
  0x30   : > { %1183 = vmatprep.mubr.f32.mxu0 %v3088_v2  ;;  %2431 = vmatpush1.bf16.msra.mxu1 %v2430_v6  ;;  %372 = vst [vmem:[#allocation2 + $0xd9] sm:$0xff] %v285_v29  ;;  %373 = vst [vmem:[#allocation2 + $0xe1] sm:$0xff] %v286_v31  ;;  %v288_v38 = vld [vmem:[%s3033_s24 + $0x98] sm:$0xff]  ;;  %v289_v39 = vld [vmem:[%s3033_s24 + $0xa0] sm:$0xff]  ;;  %v2490_v41 = vpack.c.bf16 %v807_v37, %v806_v36  ;;  %v496_v19 = vrot.slane %v3088_v2, 1  ;;  %v609_v31 = vrot.slane %v3088_v2, 2 }
  0x31   : > { %2479 = vmatpush1.bf16.msra.mxu0 %v2478_v7  ;;  %2432 = vmatprep.subr.bf16.mxu1 %v4569_v3  ;;  %374 = vst [vmem:[#allocation2 + $0xf1] sm:$0xff] %v287_v32  ;;  %375 = vst [vmem:[#allocation2 + $0xf9] sm:$0xff] %v288_v38  ;;  %v776_v42 = vld [vmem:[%s4563_s1 + $0xd0] sm:$0xff]  ;;  %v777_v43 = vld [vmem:[%s4563_s1 + $0xd8] sm:$0xff] }
  0x32   : > { %2480 = vmatprep.subr.bf16.mxu0 %v4569_v3  ;;  %376 = vst [vmem:[#allocation2 + $0x109] sm:$0xff] %v289_v39  ;;  %v290_v44 = vld [vmem:[%s3033_s24 + $0xa8] sm:$0xff]  ;;  %v808_v45 = vld [vmem:[%s4563_s1 + $0x1d0] sm:$0xff]  ;;  %v809_v46 = vld [vmem:[%s4563_s1 + $0x1d8] sm:$0xff]  ;;  %v2445_v48 = vpack.c.bf16 %v777_v43, %v776_v42 }
  0x33   : > { %377 = vst [vmem:[#allocation2 + $0x111] sm:$0xff] %v290_v44  ;;  %v291_v47 = vld [vmem:[%s3033_s24 + $0xb0] sm:$0xff]  ;;  %v2493_v49 = vpack.c.bf16 %v809_v46, %v808_v45  ;;  %v778_v50 = vld [vmem:[%s4563_s1 + $0xe0] sm:$0xff]  ;;  %v779_v51 = vld [vmem:[%s4563_s1 + $0xe8] sm:$0xff] }
  0x34   : > { %2434 = vmatpush1.bf16.msra.mxu1 %v2433_v14  ;;  %378 = vst [vmem:[#allocation2 + $0x121] sm:$0xff] %v291_v47  ;;  %v810_v52 = vld [vmem:[%s4563_s1 + $0x1e0] sm:$0xff]  ;;  %v811_v53 = vld [vmem:[%s4563_s1 + $0x1e8] sm:$0xff]  ;;  %v2448_v54 = vpack.c.bf16 %v779_v51, %v778_v50  ;;  %v292_v55 = vld [vmem:[%s3033_s24 + $0xb8] sm:$0xff] }
  0x35   : > { %2482 = vmatpush1.bf16.msra.mxu0 %v2481_v15  ;;  %2435 = vmatprep.subr.bf16.mxu1 %v4569_v3  ;;  %v2496_v56 = vpack.c.bf16 %v811_v53, %v810_v52  ;;  %v780_v57 = vld [vmem:[%s4563_s1 + $0xf0] sm:$0xff]  ;;  %v781_v58 = vld [vmem:[%s4563_s1 + $0xf8] sm:$0xff]  ;;  %379 = vst [vmem:[#allocation2 + $0x129] sm:$0xff] %v292_v55  ;;  %v293_v62 = vld [vmem:[%s3033_s24 + $0xc0] sm:$0xff] }
  0x36   : > { %2483 = vmatprep.subr.bf16.mxu0 %v4569_v3  ;;  %v812_v59 = vld [vmem:[%s4563_s1 + $0x1f0] sm:$0xff]  ;;  %v813_v60 = vld [vmem:[%s4563_s1 + $0x1f8] sm:$0xff]  ;;  %380 = vst [vmem:[#allocation2 + $0x139] sm:$0xff] %v293_v62  ;;  %v2451_v63 = vpack.c.bf16 %v781_v58, %v780_v57  ;;  %v294_v1 = vld [vmem:[%s3033_s24 + $0xc8] sm:$0xff] }
  0x37   : > { %v390_v61 = vld [vmem:[#allocation2 + $0x10] sm:$0x3]  ;;  %v2499_v4 = vpack.c.bf16 %v813_v60, %v812_v59  ;;  %v814_v5 = vld [vmem:[%s4563_s1 + $0x200] sm:$0xff]  ;;  %381 = vst [vmem:[#allocation2 + $0x141] sm:$0xff] %v294_v1  ;;  %v815_v10 = vld [vmem:[%s4563_s1 + $0x208] sm:$0xff] }
  0x38   : > { %2437 = vmatpush1.bf16.msra.mxu1 %v2436_v20  ;;  %v494_v6 = vrot.slane %v390_v61, 1  ;;  %v295_v7 = vld [vmem:[%s3033_s24 + $0xd0] sm:$0xff]  ;;  %v3214_v11 = vld [vmem:[#allocation2 + $0x20] sm:$0xff]  ;;  %v296_v12 = vld [vmem:[%s3033_s24 + $0xd8] sm:$0xff]  ;;  %v607_v16 = vrot.slane %v390_v61, 2  ;;  %v2502_v17 = vpack.c.bf16 %v815_v10, %v814_v5 }
  0x39   : > { %2485 = vmatpush1.bf16.msra.mxu0 %v2484_v23  ;;  %2438 = vmatprep.subr.bf16.mxu1 %v4569_v3  ;;  %382 = vst [vmem:[#allocation2 + $0x151] sm:$0xff] %v295_v7  ;;  %v846_v13 = vld [vmem:[%s4563_s1 + $0x300] sm:$0xff]  ;;  %v847_v14 = vld [vmem:[%s4563_s1 + $0x308] sm:$0xff]  ;;  %383 = vst [vmem:[#allocation2 + $0x159] sm:$0xff] %v296_v12  ;;  %v497_v20 = vrot.slane %v3214_v11, 1  ;;  %v610_v32 = vrot.slane %v3214_v11, 2 }
  0x3a   : > { %2486 = vmatprep.subr.bf16.mxu0 %v4569_v3  ;;  %v297_v15 = vld [vmem:[%s3033_s24 + $0xe0] sm:$0xff]  ;;  %v495_v18 = vsel %vm490_vm0, %v2903_v9, %v494_v6  ;;  %v816_v21 = vld [vmem:[%s4563_s1 + $0x210] sm:$0xff]  ;;  %v817_v22 = vld [vmem:[%s4563_s1 + $0x218] sm:$0xff]  ;;  %v3236_v24 = vpack.c.bf16 %v847_v14, %v846_v13  ;;  %v608_v28 = vsel %vm603_vm1, %v604_v0, %v607_v16 }
  0x3b   : > { %384 = vst [vmem:[#allocation2 + $0x169] sm:$0xff] %v297_v15  ;;  %v393_v23 = vld [vmem:[#allocation2 + $0x28] sm:$0x3]  ;;  %v848_v25 = vld [vmem:[%s4563_s1 + $0x310] sm:$0xff]  ;;  %v849_v26 = vld [vmem:[%s4563_s1 + $0x318] sm:$0xff]  ;;  %v2505_v29 = vpack.c.bf16 %v817_v22, %v816_v21 }
  0x3c   : > { %2440 = vmatpush1.bf16.msra.mxu1 %v2439_v30  ;;  %v298_v9 = vld [vmem:[%s3033_s24 + $0xe8] sm:$0xff]  ;;  %v299_v27 = vld [vmem:[%s3033_s24 + $0xf0] sm:$0xff]  ;;  %v3250_v30 = vsel %vm490_vm0, %v496_v19, %v497_v20  ;;  %v818_v34 = vld [vmem:[%s4563_s1 + $0x220] sm:$0xff]  ;;  %v3266_v38 = vpack.c.bf16 %v849_v26, %v848_v25  ;;  %v612_v42 = vrot.slane %v393_v23, 2 }
  0x3d   : > { %2488 = vmatpush1.bf16.msra.mxu0 %v2487_v33  ;;  %2441 = vmatprep.subr.bf16.mxu1 %v4569_v3  ;;  %385 = vst [vmem:[#allocation2 + $0x171] sm:$0xff] %v298_v9  ;;  %386 = vst [vmem:[#allocation2 + $0x181] sm:$0xff] %v299_v27  ;;  %v499_v33 = vrot.slane %v393_v23, 1  ;;  %v819_v35 = vld [vmem:[%s4563_s1 + $0x228] sm:$0xff]  ;;  %v3260_v36 = vld [vmem:[#allocation2 + $0x30] sm:$0xff] }
  0x3e   : > { %2489 = vmatprep.subr.bf16.mxu0 %v4569_v3  ;;  %v3263_v37 = vld [vmem:[#allocation2 + $0x38] sm:$0xff]  ;;  %v850_v39 = vld [vmem:[%s4563_s1 + $0x320] sm:$0xff]  ;;  %v2508_v43 = vpack.c.bf16 %v819_v35, %v818_v34  ;;  %v501_v45 = vrot.slane %v3260_v36, 1  ;;  %v820_v47 = vld [vmem:[%s4563_s1 + $0x230] sm:$0xff]  ;;  %v614_v53 = vrot.slane %v3260_v36, 2 }
  0x3f   : > { %v3283_v44 = vsel %vm490_vm0, %v497_v20, %v499_v33  ;;  %v502_v46 = vrot.slane %v3263_v37, 1  ;;  %v852_v51 = vld [vmem:[%s4563_s1 + $0x330] sm:$0xff]  ;;  %v853_v52 = vld [vmem:[%s4563_s1 + $0x338] sm:$0xff]  ;;  %v822_v58 = vld [vmem:[%s4563_s1 + $0x240] sm:$0xff] }
  0x40   : > { %2443 = vmatpush1.bf16.msra.mxu1 %v2442_v40  ;;  %v851_v40 = vld [vmem:[%s4563_s1 + $0x328] sm:$0xff]  ;;  %v3324_v61 = vld [vmem:[#allocation2 + $0x50] sm:$0xff]  ;;  %v3328_v62 = vpack.c.bf16 %v853_v52, %v852_v51  ;;  %v825_v13 = vld [vmem:[%s4563_s1 + $0x258] sm:$0xff] }
  0x41   : > { %2491 = vmatpush1.bf16.msra.mxu0 %v2490_v41  ;;  %2444 = vmatprep.subr.bf16.mxu1 %v4569_v3  ;;  %v300_v41 = vld [vmem:[%s3033_s24 + $0xf8] sm:$0xff]  ;;  %v3295_v50 = vpack.c.bf16 %v851_v40, %v850_v39  ;;  %v3313_v55 = vsel %vm490_vm0, %v501_v45, %v502_v46  ;;  %v823_v59 = vld [vmem:[%s4563_s1 + $0x248] sm:$0xff]  ;;  %v507_v10 = vrot.slane %v3324_v61, 1  ;;  %v824_v12 = vld [vmem:[%s4563_s1 + $0x250] sm:$0xff]  ;;  %s4316_s24 = scalar_lea.vmem %s4566_s4, %s2275_s13 }
  0x42   : > { %2492 = vmatprep.subr.bf16.mxu0 %v4569_v3  ;;  %387 = vst [vmem:[#allocation2 + $0x189] sm:$0xff] %v300_v41  ;;  %v3322_v60 = vld [vmem:[#allocation2 + $0x48] sm:$0xff]  ;;  %v856_v15 = vld [vmem:[%s4563_s1 + $0x350] sm:$0xff]  ;;  %v857_v16 = vld [vmem:[%s4563_s1 + $0x358] sm:$0xff]  ;;  %v2517_v23 = vpack.c.bf16 %v825_v13, %v824_v12 }
  0x43   : > { %v506_v7 = vrot.slane %v3322_v60, 1  ;;  %v3378_v21 = vld [vmem:[#allocation2 + $0x60] sm:$0xff]  ;;  %v3380_v9 = vld [vmem:[#allocation2 + $0x68] sm:$0xff]  ;;  %v3390_v27 = vpack.c.bf16 %v857_v16, %v856_v15  ;;  %v828_v39 = vld [vmem:[%s4563_s1 + $0x270] sm:$0xff] }
  0x44   : > { %2446 = vmatpush1.bf16.msra.mxu1 %v2445_v48  ;;  %v821_v48 = vld [vmem:[%s4563_s1 + $0x238] sm:$0xff]  ;;  %v826_v25 = vld [vmem:[%s4563_s1 + $0x260] sm:$0xff]  ;;  %v827_v26 = vld [vmem:[%s4563_s1 + $0x268] sm:$0xff]  ;;  %v511_v34 = vrot.slane %v3378_v21, 1  ;;  %v512_v35 = vrot.slane %v3380_v9, 1 }
  0x45   : > { %2494 = vmatpush1.bf16.msra.mxu0 %v2493_v49  ;;  %2447 = vmatprep.subr.bf16.mxu1 %v4569_v3  ;;  %v396_v49 = vld [vmem:[#allocation2 + $0x40] sm:$0x3]  ;;  %v3376_v20 = vsel %vm490_vm0, %v506_v7, %v507_v10  ;;  %v829_v40 = vld [vmem:[%s4563_s1 + $0x278] sm:$0xff]  ;;  %v405_v7 = vld [vmem:[#allocation2 + $0x88] sm:$0x3] }
  0x46   : > { %2495 = vmatprep.subr.bf16.mxu0 %v4569_v3  ;;  %v504_v57 = vrot.slane %v396_v49, 1  ;;  %v617_v1 = vrot.slane %v396_v49, 2  ;;  %v625_v49 = vrot.slane %v3380_v9, 2  ;;  %v2523_v52 = vpack.c.bf16 %v829_v40, %v828_v39  ;;  %v864_v13 = vld [vmem:[%s4563_s1 + $0x390] sm:$0xff]  ;;  %v865_v15 = vld [vmem:[%s4563_s1 + $0x398] sm:$0xff] }
  0x48   : > { %2449 = vmatpush1.bf16.msra.mxu1 %v2448_v54  ;;  %v2511_v54 = vpack.c.bf16 %v821_v48, %v820_v47  ;;  %v3345_v6 = vsel %vm490_vm0, %v502_v46, %v504_v57  ;;  %v624_v46 = vrot.slane %v3378_v21, 2  ;;  %v3437_v47 = vsel %vm490_vm0, %v511_v34, %v512_v35  ;;  %v3439_v48 = vld [vmem:[#allocation2 + $0x78] sm:$0xff]  ;;  %v866_v34 = vld [vmem:[%s4563_s1 + $0x3a0] sm:$0xff] }
  0x49   : > { %2497 = vmatpush1.bf16.msra.mxu0 %v2496_v56  ;;  %2450 = vmatprep.subr.bf16.mxu1 %v4569_v3  ;;  %v615_v56 = vrot.slane %v3263_v37, 2 }
  0x4a   : > { %2498 = vmatprep.subr.bf16.mxu0 %v4569_v3 }
  0x4b   : > { %v3342_v5 = vsel %vm603_vm1, %v614_v53, %v615_v56  ;;  %v3373_v19 = vsel %vm603_vm1, %v615_v56, %v617_v1  ;;  %v3442_v53 = vld [vmem:[#allocation2 + $0x80] sm:$0xff]  ;;  %v831_v56 = vld [vmem:[%s4563_s1 + $0x288] sm:$0xff] }
  0x4c   : > { %2452 = vmatpush1.bf16.msra.mxu1 %v2451_v63  ;;  %v854_v63 = vld [vmem:[%s4563_s1 + $0x340] sm:$0xff]  ;;  %v517_v1 = vrot.slane %v3442_v53, 1 }
  0x4d   : > { %2500 = vmatpush1.bf16.msra.mxu0 %v2499_v4  ;;  %2629 = vmatprep.subr.bf16.mxu1 %v4569_v3  ;;  %v2514_v4 = vpack.c.bf16 %v823_v59, %v822_v58  ;;  %v862_v58 = vld [vmem:[%s4563_s1 + $0x380] sm:$0xff]  ;;  %v863_v59 = vld [vmem:[%s4563_s1 + $0x388] sm:$0xff] }
  0x4e   : > { %2501 = vmatprep.subr.bf16.mxu0 %v4569_v3  ;;  %v3481_v12 = vpack.c.bf16 %v863_v59, %v862_v58 }
  0x4f   : > { %959 = vmatmul.mubr.f32.vlgmr.msra.gmra.mrb[0].mxu1 %v2825_v8 }
  0x50   : > { %1184 = vmatmul.mubr.f32.vlgmr.msra.gmra.mrb[0].mxu0 %v604_v0  ;;  %963 = vmatprep.mubr.f32.mxu1 %v495_v18  ;;  %v855_v0 = vld [vmem:[%s4563_s1 + $0x348] sm:$0xff]  ;;  %v620_v18 = vrot.slane %v3324_v61, 2  ;;  %4641 = vst [vmem:[#allocation3_spill] sm:$0xff] %v3481_v12 }
  0x51   : > { %2503 = vmatpush1.bf16.msra.mxu0 %v2502_v17  ;;  %1188 = vmatprep.mubr.f32.mxu0 %v3214_v11  ;;  %v3357_v14 = vpack.c.bf16 %v855_v0, %v854_v63  ;;  %v619_v17 = vrot.slane %v3322_v60, 2  ;;  %v516_v63 = vrot.slane %v3439_v48, 1 }
  0x52   : > { %2504 = vmatprep.subr.bf16.mxu0 %v4569_v3  ;;  %2645 = vmatpush1.bf16.msra.mxu1 %v3236_v24 }
  0x53   : > { %964 = vmatmul.mubr.f32.gmra.mrb[2].mxu1 %v2825_v8  ;;  %2630 = vmatprep.subr.bf16.mxu1 %v4569_v3  ;;  %v3280_v8 = vsel %vm603_vm1, %v609_v31, %v610_v32  ;;  %v3403_v31 = vsel %vm603_vm1, %v619_v17, %v620_v18  ;;  %v629_v17 = vrot.slane %v3439_v48, 2 }
  0x54   : > { %1189 = vmatmul.mubr.f32.gmra.mrb[2].mxu0 %v608_v28  ;;  %968 = vmatprep.mubr.f32.mxu1 %v3250_v30  ;;  %v858_v28 = vld [vmem:[%s4563_s1 + $0x360] sm:$0xff] }
  0x55   : > { %1193 = vmatprep.mubr.f32.mxu0 %v3260_v36  ;;  %2506 = vmatpush1.bf16.msra.mxu0 %v2505_v29  ;;  %v859_v29 = vld [vmem:[%s4563_s1 + $0x368] sm:$0xff] }
  0x56   : > { %2507 = vmatprep.subr.bf16.mxu0 %v4569_v3  ;;  %2646 = vmatpush1.bf16.msra.mxu1 %v3266_v38  ;;  %v3419_v41 = vpack.c.bf16 %v859_v29, %v858_v28  ;;  %v834_v28 = vld [vmem:[%s4563_s1 + $0x2a0] sm:$0xff]  ;;  %v835_v29 = vld [vmem:[%s4563_s1 + $0x2a8] sm:$0xff] }
  0x57   : > { %969 = vmatmul.mubr.f32.gmra.mrb[4].mxu1 %v3088_v2  ;;  %2631 = vmatprep.subr.bf16.mxu1 %v4569_v3  ;;  %v3310_v2 = vsel %vm603_vm1, %v610_v32, %v612_v42  ;;  %v860_v42 = vld [vmem:[%s4563_s1 + $0x370] sm:$0xff] }
  0x58   : > { %1194 = vmatmul.mubr.f32.gmra.mrb[4].mxu0 %v3280_v8  ;;  %973 = vmatprep.mubr.f32.mxu1 %v3283_v44 }
  0x59   : > { %1198 = vmatprep.mubr.f32.mxu0 %v3263_v37  ;;  %2509 = vmatpush1.bf16.msra.mxu0 %v2508_v43  ;;  %v861_v43 = vld [vmem:[%s4563_s1 + $0x378] sm:$0xff] }
  0x5a   : > { %2510 = vmatprep.subr.bf16.mxu0 %v4569_v3  ;;  %2647 = vmatpush1.bf16.msra.mxu1 %v3295_v50  ;;  %v3452_v57 = vpack.c.bf16 %v861_v43, %v860_v42  ;;  %v2532_v42 = vpack.c.bf16 %v835_v29, %v834_v28  ;;  %v408_v43 = vld [vmem:[#allocation2 + $0xa0] sm:$0x3]  ;;  %v411_v29 = vld [vmem:[#allocation2 + $0xb8] sm:$0x3] }
  0x5b   : > { %974 = vmatmul.mubr.f32.gmra.mrb[6].mxu1 %v3214_v11  ;;  %2632 = vmatprep.subr.bf16.mxu1 %v4569_v3  ;;  %v399_v11 = vld [vmem:[#allocation2 + $0x58] sm:$0x3] }
  0x5c   : > { %1199 = vmatmul.mubr.f32.gmra.mrb[6].mxu0 %v3310_v2  ;;  %978 = vmatprep.mubr.f32.mxu1 %v3313_v55  ;;  %v509_v22 = vrot.slane %v399_v11, 1  ;;  %v622_v32 = vrot.slane %v399_v11, 2  ;;  %v833_v11 = vld [vmem:[%s4563_s1 + $0x298] sm:$0xff] }
  0x5d   : > { %1203 = vmatprep.mubr.f32.mxu0 %v3322_v60  ;;  %2512 = vmatpush1.bf16.msra.mxu0 %v2511_v54  ;;  %v830_v54 = vld [vmem:[%s4563_s1 + $0x280] sm:$0xff] }
  0x5e   : > { %2513 = vmatprep.subr.bf16.mxu0 %v4569_v3  ;;  %2648 = vmatpush1.bf16.msra.mxu1 %v3328_v62  ;;  %v3407_v33 = vsel %vm490_vm0, %v507_v10, %v509_v22  ;;  %v3432_v45 = vsel %vm603_vm1, %v620_v18, %v622_v32  ;;  %v832_v10 = vld [vmem:[%s4563_s1 + $0x290] sm:$0xff]  ;;  %v3499_v18 = vsel %vm490_vm0, %v516_v63, %v517_v1  ;;  %v630_v22 = vrot.slane %v3442_v53, 2 }
  0x5f   : > { %979 = vmatmul.mubr.f32.gmra.mrb[8].mxu1 %v3260_v36  ;;  %2633 = vmatprep.subr.bf16.mxu1 %v4569_v3  ;;  %v2520_v36 = vpack.c.bf16 %v827_v26, %v826_v25  ;;  %v2529_v25 = vpack.c.bf16 %v833_v11, %v832_v10  ;;  %v3504_v26 = vld [vmem:[#allocation2 + $0x98] sm:$0xff]  ;;  %v3514_v32 = vpack.c.bf16 %v865_v15, %v864_v13  ;;  %v524_v63 = vrot.slane %v408_v43, 1  ;;  %v839_v10 = vld [vmem:[%s4563_s1 + $0x2c8] sm:$0xff]  ;;  %v870_v13 = vld [vmem:[%s4563_s1 + $0x3c0] sm:$0xff] }
  0x60   : > { %1204 = vmatmul.mubr.f32.gmra.mrb[8].mxu0 %v3342_v5  ;;  %983 = vmatprep.mubr.f32.mxu1 %v3345_v6  ;;  %v522_v40 = vrot.slane %v3504_v26, 1  ;;  %v635_v58 = vrot.slane %v3504_v26, 2  ;;  %v871_v15 = vld [vmem:[%s4563_s1 + $0x3c8] sm:$0xff] }
  0x61   : > { %1208 = vmatprep.mubr.f32.mxu0 %v3324_v61  ;;  %2515 = vmatpush1.bf16.msra.mxu0 %v2514_v4  ;;  %v2526_v4 = vpack.c.bf16 %v831_v56, %v830_v54  ;;  %4642 = vst [vmem:[#allocation4_spill] sm:$0xff] %v3514_v32  ;;  %v869_v54 = vld [vmem:[%s4563_s1 + $0x3b8] sm:$0xff] }
  0x62   : > { %2516 = vmatprep.subr.bf16.mxu0 %v4569_v3  ;;  %2649 = vmatpush1.bf16.msra.mxu1 %v3357_v14 }
  0x63   : > { %984 = vmatmul.mubr.f32.gmra.mrb[10].mxu1 %v3263_v37  ;;  %2634 = vmatprep.subr.bf16.mxu1 %v4569_v3  ;;  %v402_v37 = vld [vmem:[#allocation2 + $0x70] sm:$0x3] }
  0x64   : > { %1209 = vmatmul.mubr.f32.gmra.mrb[10].mxu0 %v3373_v19  ;;  %988 = vmatprep.mubr.f32.mxu1 %v3376_v20  ;;  %v514_v51 = vrot.slane %v402_v37, 1 }
  0x65   : > { %1213 = vmatprep.mubr.f32.mxu0 %v3378_v21  ;;  %2518 = vmatpush1.bf16.msra.mxu0 %v2517_v23  ;;  %v519_v23 = vrot.slane %v405_v7, 1 }
  0x66   : > { %2519 = vmatprep.subr.bf16.mxu0 %v4569_v3  ;;  %2650 = vmatpush1.bf16.msra.mxu1 %v3390_v27  ;;  %v3470_v0 = vsel %vm490_vm0, %v512_v35, %v514_v51  ;;  %v867_v35 = vld [vmem:[%s4563_s1 + $0x3a8] sm:$0xff] }
  0x67   : > { %989 = vmatmul.mubr.f32.gmra.mrb[12].mxu1 %v3322_v60  ;;  %2635 = vmatprep.subr.bf16.mxu1 %v4569_v3  ;;  %v627_v60 = vrot.slane %v402_v37, 2  ;;  %v3532_v39 = vsel %vm490_vm0, %v517_v1, %v519_v23  ;;  %v3543_v51 = vpack.c.bf16 %v867_v35, %v866_v34  ;;  %v840_v34 = vld [vmem:[%s4563_s1 + $0x2d0] sm:$0xff]  ;;  %v841_v35 = vld [vmem:[%s4563_s1 + $0x2d8] sm:$0xff] }
  0x68   : > { %1214 = vmatmul.mubr.f32.gmra.mrb[12].mxu0 %v3403_v31  ;;  %993 = vmatprep.mubr.f32.mxu1 %v3407_v33  ;;  %4643 = vst [vmem:[#allocation5_spill] sm:$0xff] %v3532_v39 }
  0x69   : > { %1218 = vmatprep.mubr.f32.mxu0 %v3380_v9  ;;  %2521 = vmatpush1.bf16.msra.mxu0 %v2520_v36  ;;  %v3494_v16 = vsel %vm603_vm1, %v625_v49, %v627_v60  ;;  %v632_v36 = vrot.slane %v405_v7, 2  ;;  %4644 = vst [vmem:[#allocation6_spill] sm:$0xff] %v3543_v51  ;;  %v3564_v60 = vld [vmem:[#allocation2 + $0xa8] sm:$0xff]  ;;  %v838_v7 = vld [vmem:[%s4563_s1 + $0x2c0] sm:$0xff] }
  0x6a   : > { %2522 = vmatprep.subr.bf16.mxu0 %v4569_v3  ;;  %2651 = vmatpush1.bf16.msra.mxu1 %v3419_v41  ;;  %v526_v23 = vrot.slane %v3564_v60, 1  ;;  %v2538_v28 = vpack.c.bf16 %v839_v10, %v838_v7  ;;  %v874_v10 = vld [vmem:[%s4563_s1 + $0x3e0] sm:$0xff] }
  0x6b   : > { %994 = vmatmul.mubr.f32.gmra.mrb[14].mxu1 %v3324_v61  ;;  %2636 = vmatprep.subr.bf16.mxu1 %v4569_v3  ;;  %v3467_v61 = vsel %vm603_vm1, %v624_v46, %v625_v49  ;;  %v836_v46 = vld [vmem:[%s4563_s1 + $0x2b0] sm:$0xff]  ;;  %v837_v49 = vld [vmem:[%s4563_s1 + $0x2b8] sm:$0xff] }
  0x6c   : > { %1219 = vmatmul.mubr.f32.gmra.mrb[14].mxu0 %v3432_v45  ;;  %998 = vmatprep.mubr.f32.mxu1 %v3437_v47  ;;  %v2535_v1 = vpack.c.bf16 %v837_v49, %v836_v46  ;;  %v3625_v49 = vld [vmem:[#allocation2 + $0xc0] sm:$0xff] }
  0x6d   : > { %1223 = vmatprep.mubr.f32.mxu0 %v3439_v48  ;;  %2524 = vmatpush1.bf16.msra.mxu0 %v2523_v52  ;;  %v868_v52 = vld [vmem:[%s4563_s1 + $0x3b0] sm:$0xff] }
  0x6e   : > { %2525 = vmatprep.subr.bf16.mxu0 %v4569_v3  ;;  %2652 = vmatpush1.bf16.msra.mxu1 %v3452_v57  ;;  %v3576_v11 = vpack.c.bf16 %v869_v54, %v868_v52  ;;  %v529_v54 = vrot.slane %v411_v29, 1 }
  0x6f   : > { %999 = vmatmul.mubr.f32.gmra.mrb[16].mxu1 %v3378_v21  ;;  %2637 = vmatprep.subr.bf16.mxu1 %v4569_v3  ;;  %v3501_v21 = vld [vmem:[#allocation2 + $0x90] sm:$0xff] }
  0x70   : > { %1224 = vmatmul.mubr.f32.gmra.mrb[16].mxu0 %v3467_v61  ;;  %1003 = vmatprep.mubr.f32.mxu1 %v3470_v0  ;;  %v521_v37 = vrot.slane %v3501_v21, 1  ;;  %v634_v56 = vrot.slane %v3501_v21, 2  ;;  %4646 = vst [vmem:[#allocation8_spill] sm:$0xff] %v3576_v11 }
  0x71   : > { %1228 = vmatprep.mubr.f32.mxu0 %v3442_v53  ;;  %2527 = vmatpush1.bf16.msra.mxu0 %v2526_v4  ;;  %v3566_v4 = vld [vmem:[#allocation2 + $0xb0] sm:$0xff] }
  0x72   : > { %2528 = vmatprep.subr.bf16.mxu0 %v4569_v3  ;;  %2653 = vmatpush1.bf16.msra.mxu1 %v3481_v12  ;;  %v3562_v59 = vsel %vm490_vm0, %v521_v37, %v522_v40  ;;  %v872_v37 = vld [vmem:[%s4563_s1 + $0x3d0] sm:$0xff]  ;;  %v640_v52 = vrot.slane %v3566_v4, 2  ;;  %v3790_v12 = vld [vmem:[#allocation2 + $0x128] sm:$0xff] }
  0x73   : > { %1004 = vmatmul.mubr.f32.gmra.mrb[18].mxu1 %v3380_v9  ;;  %2638 = vmatprep.subr.bf16.mxu1 %v4569_v3  ;;  %v3529_v9 = vsel %vm603_vm1, %v629_v17, %v630_v22  ;;  %v3589_v17 = vsel %vm603_vm1, %v634_v56, %v635_v58  ;;  %v2541_v56 = vpack.c.bf16 %v841_v35, %v840_v34 }
  0x74   : > { %1229 = vmatmul.mubr.f32.gmra.mrb[18].mxu0 %v3494_v16  ;;  %1008 = vmatprep.mubr.f32.mxu1 %v3499_v18  ;;  %4647 = vst [vmem:[#allocation9_spill] sm:$0xff] %v3589_v17  ;;  %4668 = vst [vmem:[#allocation29_spill] sm:$0xff] %v3790_v12 }
  0x75   : > { %1233 = vmatprep.mubr.f32.mxu0 %v3501_v21  ;;  %2530 = vmatpush1.bf16.msra.mxu0 %v2529_v25  ;;  %v527_v25 = vrot.slane %v3566_v4, 1 }
  0x76   : > { %2531 = vmatprep.subr.bf16.mxu0 %v4569_v3  ;;  %2654 = vmatpush1.bf16.msra.mxu1 %v3514_v32 }
  0x77   : > { %1009 = vmatmul.mubr.f32.gmra.mrb[20].mxu1 %v3439_v48  ;;  %2639 = vmatprep.subr.bf16.mxu1 %v4569_v3  ;;  %v3559_v48 = vsel %vm603_vm1, %v630_v22, %v632_v36  ;;  %v637_v22 = vrot.slane %v408_v43, 2  ;;  %v3605_v36 = vpack.c.bf16 %v871_v15, %v870_v13  ;;  %v639_v43 = vrot.slane %v3564_v60, 2  ;;  %v875_v13 = vld [vmem:[%s4563_s1 + $0x3e8] sm:$0xff] }
  0x78   : > { %1234 = vmatmul.mubr.f32.gmra.mrb[20].mxu0 %v3529_v9  ;;  %1013 = vmatprep.mubr.f32.mxu1 %v3532_v39  ;;  %4645 = vst [vmem:[#allocation7_spill] sm:$0xff] %v3559_v48  ;;  %v3623_v46 = vsel %vm490_vm0, %v526_v23, %v527_v25  ;;  %v642_v15 = vrot.slane %v411_v29, 2  ;;  %v844_v29 = vld [vmem:[%s4563_s1 + $0x2f0] sm:$0xff]  ;;  %v3788_v39 = vld [vmem:[#allocation2 + $0x120] sm:$0xff] }
  0x79   : > { %1238 = vmatprep.mubr.f32.mxu0 %v3504_v26  ;;  %2533 = vmatpush1.bf16.msra.mxu0 %v2532_v42  ;;  %4648 = vst [vmem:[#allocation10_spill] sm:$0xff] %v3605_v36  ;;  %v3618_v42 = vsel %vm603_vm1, %v635_v58, %v637_v22  ;;  %v842_v58 = vld [vmem:[%s4563_s1 + $0x2e0] sm:$0xff]  ;;  %v531_v22 = vrot.slane %v3625_v49, 1  ;;  %v3653_v23 = vsel %vm603_vm1, %v639_v43, %v640_v52  ;;  %4667 = vst [vmem:[#allocation28_spill] sm:$0xff] %v3788_v39 }
  0x7a   : > { %2534 = vmatprep.subr.bf16.mxu0 %v4569_v3  ;;  %2655 = vmatpush1.bf16.msra.mxu1 %v3543_v51  ;;  %4649 = vst [vmem:[#allocation11_spill] sm:$0xff] %v3618_v42  ;;  %4651 = vst [vmem:[#allocation13_spill] sm:$0xff] %v3653_v23  ;;  %v3667_v43 = vpack.c.bf16 %v875_v13, %v874_v10  ;;  %v879_v10 = vld [vmem:[%s4563_s1 + $0x408] sm:$0xff] }
  0x7b   : > { %1014 = vmatmul.mubr.f32.gmra.mrb[22].mxu1 %v3442_v53  ;;  %2640 = vmatprep.subr.bf16.mxu1 %v4569_v3  ;;  %v3593_v53 = vsel %vm490_vm0, %v522_v40, %v524_v63  ;;  %v873_v40 = vld [vmem:[%s4563_s1 + $0x3d8] sm:$0xff]  ;;  %v3628_v63 = vld [vmem:[#allocation2 + $0xc8] sm:$0xff] }
  0x7c   : > { %1239 = vmatmul.mubr.f32.gmra.mrb[22].mxu0 %v3559_v48  ;;  %1018 = vmatprep.mubr.f32.mxu1 %v3562_v59  ;;  %v3638_v7 = vpack.c.bf16 %v873_v40, %v872_v37  ;;  %v532_v34 = vrot.slane %v3628_v63, 1  ;;  %v414_v37 = vld [vmem:[#allocation2 + $0xd0] sm:$0x3]  ;;  %v845_v40 = vld [vmem:[%s4563_s1 + $0x2f8] sm:$0xff]  ;;  %4652 = vst [vmem:[#allocation14_spill] sm:$0xff] %v3667_v43  ;;  %v3760_v51 = vld [vmem:[#allocation2 + $0x108] sm:$0xff] }
  0x7d   : > { %1243 = vmatprep.mubr.f32.mxu0 %v3564_v60  ;;  %2536 = vmatpush1.bf16.msra.mxu0 %v2535_v1  ;;  %v843_v1 = vld [vmem:[%s4563_s1 + $0x2e8] sm:$0xff]  ;;  %4661 = vst [vmem:[#allocation22_spill] sm:$0xff] %v3760_v51  ;;  %v552_v48 = vrot.slane %v3790_v12, 1 }
  0x7e   : > { %2537 = vmatprep.subr.bf16.mxu0 %v4569_v3  ;;  %2656 = vmatpush1.bf16.msra.mxu1 %v3576_v11  ;;  %4650 = vst [vmem:[#allocation12_spill] sm:$0xff] %v3638_v7  ;;  %v2544_v35 = vpack.c.bf16 %v843_v1, %v842_v58  ;;  %v644_v58 = vrot.slane %v3625_v49, 2  ;;  %v878_v1 = vld [vmem:[%s4563_s1 + $0x400] sm:$0xff]  ;;  %v3691_v13 = vsel %vm490_vm0, %v531_v22, %v532_v34  ;;  %v4654_v11 = vmov 0.0|0.0  }
  0x7f   : > { %1019 = vmatmul.mubr.f32.gmra.mrb[24].mxu1 %v3501_v21  ;;  %2641 = vmatprep.subr.bf16.mxu1 %v4569_v3  ;;  %v3704_v22 = vpack.c.bf16 %v879_v10, %v878_v1  ;;  %v417_v1 = vld [vmem:[#allocation2 + $0xe8] sm:$0x3] }
  0x80   : > { %1244 = vmatmul.mubr.f32.gmra.mrb[24].mxu0 %v3589_v17  ;;  %1023 = vmatprep.mubr.f32.mxu1 %v3593_v53  ;;  %v539_v10 = vrot.slane %v417_v1, 1  ;;  %v423_v17 = vld [vmem:[#allocation2 + $0x118] sm:$0x3] }
  0x81   : > { %1248 = vmatprep.mubr.f32.mxu0 %v3566_v4  ;;  %2539 = vmatpush1.bf16.msra.mxu0 %v2538_v28  ;;  %v3656_v28 = vsel %vm490_vm0, %v527_v25, %v529_v54  ;;  %v876_v25 = vld [vmem:[%s4563_s1 + $0x3f0] sm:$0xff]  ;;  %v877_v54 = vld [vmem:[%s4563_s1 + $0x3f8] sm:$0xff] }
  0x82   : > { %2540 = vmatprep.subr.bf16.mxu0 %v4569_v3  ;;  %2657 = vmatpush1.bf16.msra.mxu1 %v3605_v36  ;;  %v3696_v36 = vld [vmem:[#allocation2 + $0xe0] sm:$0xff] }
  0x83   : > { %1024 = vmatmul.mubr.f32.gmra.mrb[26].mxu1 %v3504_v26  ;;  %2642 = vmatprep.subr.bf16.mxu1 %v4569_v3 }
  0x84   : > { %1249 = vmatmul.mubr.f32.gmra.mrb[26].mxu0 %v3618_v42  ;;  %1028 = vmatprep.mubr.f32.mxu1 %v3623_v46  ;;  %v3762_v42 = vld [vmem:[#allocation2 + $0x110] sm:$0xff] }
  0x85   : > { %1253 = vmatprep.mubr.f32.mxu0 %v3625_v49  ;;  %2542 = vmatpush1.bf16.msra.mxu0 %v2541_v56  ;;  %v3680_v56 = vsel %vm603_vm1, %v640_v52, %v642_v15  ;;  %v2547_v52 = vpack.c.bf16 %v845_v40, %v844_v29  ;;  %v3694_v15 = vld [vmem:[#allocation2 + $0xd8] sm:$0xff]  ;;  %4662 = vst [vmem:[#allocation23_spill] sm:$0xff] %v3762_v42  ;;  %v547_v32 = vrot.slane %v3762_v42, 1 }
  0x86   : > { %2543 = vmatprep.subr.bf16.mxu0 %v4569_v3  ;;  %2658 = vmatpush1.bf16.msra.mxu1 %v3638_v7  ;;  %4653 = vst [vmem:[#allocation15_spill] sm:$0xff] %v3680_v56  ;;  %v534_v7 = vrot.slane %v414_v37, 1 }
  0x87   : > { %1029 = vmatmul.mubr.f32.gmra.mrb[28].mxu1 %v3564_v60  ;;  %2643 = vmatprep.subr.bf16.mxu1 %v4569_v3  ;;  %v645_v3 = vrot.slane %v3628_v63, 2 }
  0x88   : > { %1254 = vmatmul.mubr.f32.gmra.mrb[28].mxu0 %v3653_v23  ;;  %1033 = vmatprep.mubr.f32.mxu1 %v3656_v28  ;;  %v3700_v23 = vpack.c.bf16 %v877_v54, %v876_v25  ;;  %v3713_v40 = vsel %vm490_vm0, %v532_v34, %v534_v7  ;;  %v536_v25 = vrot.slane %v3694_v15, 1  ;;  %v537_v54 = vrot.slane %v3696_v36, 1 }
  0x89   : > { %1258 = vmatprep.mubr.f32.mxu0 %v3628_v63  ;;  %2545 = vmatpush1.bf16.msra.mxu0 %v2544_v35  ;;  %v647_v35 = vrot.slane %v414_v37, 2  ;;  %v3710_v29 = vsel %vm603_vm1, %v644_v58, %v645_v3  ;;  %v649_v7 = vrot.slane %v3694_v15, 2  ;;  %v650_v34 = vrot.slane %v3696_v36, 2 }
  0x8a   : > { %2546 = vmatprep.subr.bf16.mxu0 %v4654_v11  ;;  %2659 = vmatpush1.bf16.msra.mxu1 %v3667_v43  ;;  %4655 = vst [vmem:[#allocation16_spill] sm:$0xff] %v3700_v23  ;;  %4656 = vst [vmem:[#allocation17_spill] sm:$0xff] %v3710_v29  ;;  %v3730_v58 = vsel %vm490_vm0, %v536_v25, %v537_v54 }
  0x8b   : > { %1034 = vmatmul.mubr.f32.gmra.mrb[30].mxu1 %v3566_v4  ;;  %2644 = vmatprep.subr.bf16.mxu1 %v4654_v11  ;;  %v3727_v37 = vsel %vm603_vm1, %v645_v3, %v647_v35  ;;  %v3740_v43 = vsel %vm603_vm1, %v649_v7, %v650_v34  ;;  %v3744_v3 = vsel %vm490_vm0, %v537_v54, %v539_v10  ;;  %v652_v35 = vrot.slane %v417_v1, 2 }
  0x8c   : > { %1259 = vmatmul.mubr.f32.gmra.mrb[30].mxu0 %v3680_v56  ;;  %1038 = vmatprep.mubr.f32.mxu1 %v3691_v13  ;;  %4657 = vst [vmem:[#allocation18_spill] sm:$0xff] %v3727_v37  ;;  %4659 = vst [vmem:[#allocation20_spill] sm:$0xff] %v3740_v43  ;;  %v420_v56 = vld [vmem:[#allocation2 + $0x100] sm:$0x3] }
  0x8d   : > { %1263 = vmatprep.mubr.f32.mxu0 %v3694_v15  ;;  %2548 = vmatpush1.bf16.msra.mxu0 %v2547_v52  ;;  %v3732_v52 = vld [vmem:[#allocation2 + $0xf0] sm:$0xff]  ;;  %v544_v10 = vrot.slane %v420_v56, 1 }
  0x8e   : > { %2660 = vmatpush1.bf16.msra.mxu1 %v3700_v23  ;;  %2549 = vmatprep.subr.bf16.mxu0 %v4654_v11  ;;  %v3734_v23 = vld [vmem:[#allocation2 + $0xf8] sm:$0xff]  ;;  %v541_v25 = vrot.slane %v3732_v52, 1  ;;  %v654_v7 = vrot.slane %v3732_v52, 2 }
  0x8f   : > { %1039 = vmatmul.mubr.f32.gmra.mrb[32].mxu1 %v3625_v49  ;;  %2598 = vmatprep.subr.bf16.mxu1 %v3704_v22  ;;  %4658 = vst [vmem:[#allocation19_spill] sm:$0xff] %v3734_v23  ;;  %v655_v1 = vrot.slane %v3734_v23, 2 }
  0x90   : > { %1264 = vmatmul.mubr.f32.gmra.mrb[32].mxu0 %v3710_v29  ;;  %1043 = vmatprep.mubr.f32.mxu1 %v3713_v40  ;;  %v542_v29 = vrot.slane %v3734_v23, 1 }
  0x91   : > { %1268 = vmatprep.mubr.f32.mxu0 %v3696_v36 }
  0x92   : > { %v3757_v54 = vsel %vm490_vm0, %v541_v25, %v542_v29  ;;  %v546_v25 = vrot.slane %v3760_v51, 1 }
  0x93   : > { %1044 = vmatmul.mubr.f32.gmra.mrb[34].mxu1 %v3628_v63 }
  0x94   : > { %1269 = vmatmul.mubr.f32.gmra.mrb[34].mxu0 %v3727_v37  ;;  %1048 = vmatprep.mubr.f32.mxu1 %v3730_v58  ;;  %v3754_v37 = vsel %vm603_vm1, %v650_v34, %v652_v35  ;;  %v3769_v34 = vsel %vm603_vm1, %v654_v7, %v655_v1  ;;  %v3772_v35 = vsel %vm490_vm0, %v542_v29, %v544_v10  ;;  %v659_v29 = vrot.slane %v3760_v51, 2 }
  0x95   : > { %1273 = vmatprep.mubr.f32.mxu0 %v3732_v52  ;;  %4660 = vst [vmem:[#allocation21_spill] sm:$0xff] %v3754_v37  ;;  %4663 = vst [vmem:[#allocation24_spill] sm:$0xff] %v3769_v34  ;;  %v3784_v7 = vsel %vm490_vm0, %v546_v25, %v547_v32  ;;  %v660_v10 = vrot.slane %v3762_v42, 2 }
  0x96   : > { %4664 = vst [vmem:[#allocation25_spill] sm:$0xff] %v3772_v35  ;;  %4666 = vst [vmem:[#allocation27_spill] sm:$0xff] %v3784_v7 }
  0x97   : > { %1049 = vmatmul.mubr.f32.gmra.mrb[36].mxu1 %v3694_v15 }
  0x98   : > { %1274 = vmatmul.mubr.f32.gmra.mrb[36].mxu0 %v3740_v43  ;;  %1053 = vmatprep.mubr.f32.mxu1 %v3744_v3  ;;  %v657_v43 = vrot.slane %v420_v56, 2 }
  0x99   : > { %1278 = vmatprep.mubr.f32.mxu0 %v3734_v23 }
  0x9a   : > { %v3780_v56 = vsel %vm603_vm1, %v655_v1, %v657_v43  ;;  %v662_v43 = vrot.slane %v423_v17, 2  ;;  %v3797_v1 = vsel %vm603_vm1, %v659_v29, %v660_v10 }
  0x9b   : > { %1054 = vmatmul.mubr.f32.gmra.mrb[38].mxu1 %v3696_v36  ;;  %4665 = vst [vmem:[#allocation26_spill] sm:$0xff] %v3780_v56  ;;  %4669 = vst [vmem:[#allocation30_spill] sm:$0xff] %v3797_v1 }
  0x9c   : > { %1279 = vmatmul.mubr.f32.gmra.mrb[38].mxu0 %v3754_v37  ;;  %1058 = vmatprep.mubr.f32.mxu1 %v3757_v54  ;;  %v549_v37 = vrot.slane %v423_v17, 1  ;;  %v664_v17 = vrot.slane %v3788_v39, 2  ;;  %v3810_v29 = vsel %vm603_vm1, %v660_v10, %v662_v43 }
  0x9d   : > { %1283 = vmatprep.mubr.f32.mxu0 %v3760_v51  ;;  %4671 = vst [vmem:[#allocation32_spill] sm:$0xff] %v3810_v29 }
  0x9e   : > { %v3800_v25 = vsel %vm490_vm0, %v547_v32, %v549_v37  ;;  %v665_v37 = vrot.slane %v3790_v12, 2 }
  0x9f   : > { %1059 = vmatmul.mubr.f32.gmra.mrb[40].mxu1 %v3732_v52  ;;  %4670 = vst [vmem:[#allocation31_spill] sm:$0xff] %v3800_v25 }
  0xa0   : > { %1284 = vmatmul.mubr.f32.gmra.mrb[40].mxu0 %v3769_v34  ;;  %1063 = vmatprep.mubr.f32.mxu1 %v3772_v35  ;;  %v551_v34 = vrot.slane %v3788_v39, 1  ;;  %v426_v35 = vld [vmem:[#allocation2 + $0x130] sm:$0x3]  ;;  %v3825_v10 = vsel %vm603_vm1, %v664_v17, %v665_v37 }
  0xa1   : > { %1288 = vmatprep.mubr.f32.mxu0 %v3762_v42  ;;  %4674 = vst [vmem:[#allocation35_spill] sm:$0xff] %v3825_v10 }
  0xa2   : > { %v3813_v32 = vsel %vm490_vm0, %v551_v34, %v552_v48 }
  0xa3   : > { %1064 = vmatmul.mubr.f32.gmra.mrb[42].mxu1 %v3734_v23  ;;  %4672 = vst [vmem:[#allocation33_spill] sm:$0xff] %v3813_v32  ;;  %v429_v23 = vld [vmem:[#allocation2 + $0x148] sm:$0x3] }
  0xa4   : > { %1289 = vmatmul.mubr.f32.gmra.mrb[42].mxu0 %v3780_v56  ;;  %1068 = vmatprep.mubr.f32.mxu1 %v3784_v7  ;;  %v554_v56 = vrot.slane %v426_v35, 1  ;;  %v3816_v7 = vld [vmem:[#allocation2 + $0x138] sm:$0xff] }
  0xa5   : > { %1293 = vmatprep.mubr.f32.mxu0 %v3788_v39  ;;  %4673 = vst [vmem:[#allocation34_spill] sm:$0xff] %v3816_v7  ;;  %v556_v43 = vrot.slane %v3816_v7, 1 }
  0xa6   : > { %v3828_v34 = vsel %vm490_vm0, %v552_v48, %v554_v56  ;;  %v669_v48 = vrot.slane %v3816_v7, 2 }
  0xa7   : > { %1069 = vmatmul.mubr.f32.gmra.mrb[44].mxu1 %v3760_v51  ;;  %v3818_v51 = vld [vmem:[#allocation2 + $0x140] sm:$0xff]  ;;  %4675 = vst [vmem:[#allocation36_spill] sm:$0xff] %v3828_v34 }
  0xa8   : > { %1294 = vmatmul.mubr.f32.gmra.mrb[44].mxu0 %v3797_v1  ;;  %1073 = vmatprep.mubr.f32.mxu1 %v3800_v25  ;;  %v667_v1 = vrot.slane %v426_v35, 2  ;;  %v557_v25 = vrot.slane %v3818_v51, 1  ;;  %v670_v56 = vrot.slane %v3818_v51, 2 }
  0xa9   : > { %1298 = vmatprep.mubr.f32.mxu0 %v3790_v12 }
  0xaa   : > { %v3836_v35 = vsel %vm603_vm1, %v665_v37, %v667_v1  ;;  %v3840_v17 = vsel %vm490_vm0, %v556_v43, %v557_v25  ;;  %v672_v1 = vrot.slane %v429_v23, 2  ;;  %v3853_v37 = vsel %vm603_vm1, %v669_v48, %v670_v56 }
  0xab   : > { %1074 = vmatmul.mubr.f32.gmra.mrb[46].mxu1 %v3762_v42  ;;  %4676 = vst [vmem:[#allocation37_spill] sm:$0xff] %v3836_v35  ;;  %4677 = vst [vmem:[#allocation38_spill] sm:$0xff] %v3840_v17  ;;  %v432_v42 = vld [vmem:[#allocation2 + $0x160] sm:$0x3] }
  0xac   : > { %1299 = vmatmul.mubr.f32.gmra.mrb[46].mxu0 %v3810_v29  ;;  %1078 = vmatprep.mubr.f32.mxu1 %v3813_v32  ;;  %v559_v29 = vrot.slane %v429_v23, 1  ;;  %v3844_v32 = vld [vmem:[#allocation2 + $0x150] sm:$0xff]  ;;  %4678 = vst [vmem:[#allocation39_spill] sm:$0xff] %v3853_v37  ;;  %v3866_v48 = vsel %vm603_vm1, %v670_v56, %v672_v1 }
  0xad   : > { %1303 = vmatprep.mubr.f32.mxu0 %v3816_v7  ;;  %v674_v23 = vrot.slane %v3844_v32, 2  ;;  %4680 = vst [vmem:[#allocation41_spill] sm:$0xff] %v3866_v48 }
  0xae   : > { %v3856_v43 = vsel %vm490_vm0, %v557_v25, %v559_v29 }
  0xaf   : > { %1079 = vmatmul.mubr.f32.gmra.mrb[48].mxu1 %v3788_v39  ;;  %v3846_v39 = vld [vmem:[#allocation2 + $0x158] sm:$0xff]  ;;  %4679 = vst [vmem:[#allocation40_spill] sm:$0xff] %v3856_v43 }
  0xb0   : > { %1304 = vmatmul.mubr.f32.gmra.mrb[48].mxu0 %v3825_v10  ;;  %1083 = vmatprep.mubr.f32.mxu1 %v3828_v34  ;;  %v561_v10 = vrot.slane %v3844_v32, 1  ;;  %v562_v34 = vrot.slane %v3846_v39, 1  ;;  %v675_v29 = vrot.slane %v3846_v39, 2 }
  0xb1   : > { %1308 = vmatprep.mubr.f32.mxu0 %v3818_v51 }
  0xb2   : > { %v3869_v25 = vsel %vm490_vm0, %v561_v10, %v562_v34  ;;  %v3881_v56 = vsel %vm603_vm1, %v674_v23, %v675_v29 }
  0xb3   : > { %1084 = vmatmul.mubr.f32.gmra.mrb[50].mxu1 %v3790_v12  ;;  %4681 = vst [vmem:[#allocation42_spill] sm:$0xff] %v3869_v25  ;;  %4682 = vst [vmem:[#allocation43_spill] sm:$0xff] %v3881_v56  ;;  %v435_v12 = vld [vmem:[#allocation2 + $0x178] sm:$0x3] }
  0xb4   : > { %1309 = vmatmul.mubr.f32.gmra.mrb[50].mxu0 %v3836_v35  ;;  %1088 = vmatprep.mubr.f32.mxu1 %v3840_v17  ;;  %v564_v35 = vrot.slane %v432_v42, 1  ;;  %v3872_v17 = vld [vmem:[#allocation2 + $0x168] sm:$0xff] }
  0xb5   : > { %1313 = vmatprep.mubr.f32.mxu0 %v3844_v32  ;;  %v566_v1 = vrot.slane %v3872_v17, 1 }
  0xb6   : > { %v3884_v10 = vsel %vm490_vm0, %v562_v34, %v564_v35 }
  0xb7   : > { %1089 = vmatmul.mubr.f32.gmra.mrb[52].mxu1 %v3816_v7  ;;  %v3874_v7 = vld [vmem:[#allocation2 + $0x170] sm:$0xff] }
  0xb8   : > { %1314 = vmatmul.mubr.f32.gmra.mrb[52].mxu0 %v3853_v37  ;;  %1093 = vmatprep.mubr.f32.mxu1 %v3856_v43  ;;  %v677_v37 = vrot.slane %v432_v42, 2  ;;  %v567_v43 = vrot.slane %v3874_v7, 1  ;;  %v679_v42 = vrot.slane %v3872_v17, 2  ;;  %v680_v35 = vrot.slane %v3874_v7, 2 }
  0xb9   : > { %1318 = vmatprep.mubr.f32.mxu0 %v3846_v39 }
  0xba   : > { %v3894_v23 = vsel %vm603_vm1, %v675_v29, %v677_v37  ;;  %v3897_v34 = vsel %vm490_vm0, %v566_v1, %v567_v43  ;;  %v682_v29 = vrot.slane %v435_v12, 2  ;;  %v3912_v1 = vld [vmem:[#allocation2 + $0x188] sm:$0xff] }
  0xbb   : > { %1094 = vmatmul.mubr.f32.gmra.mrb[54].mxu1 %v3818_v51  ;;  %4683 = vst [vmem:[#allocation44_spill] sm:$0xff] %v3894_v23 }
  0xbc   : > { %1319 = vmatmul.mubr.f32.gmra.mrb[54].mxu0 %v3866_v48  ;;  %1098 = vmatprep.mubr.f32.mxu1 %v3869_v25  ;;  %v569_v48 = vrot.slane %v435_v12, 1  ;;  %v3900_v25 = vld [vmem:[#allocation2 + $0x180] sm:$0xff]  ;;  %v880_v12 = vld [vmem:[%s4563_s1 + $0x410] sm:$0xff] }
  0xbd   : > { %1323 = vmatprep.mubr.f32.mxu0 %v3872_v17 }
  0xbe   : > { %v3910_v37 = vsel %vm490_vm0, %v567_v43, %v569_v48  ;;  %v881_v43 = vld [vmem:[%s4563_s1 + $0x418] sm:$0xff] }
  0xbf   : > { %1099 = vmatmul.mubr.f32.gmra.mrb[56].mxu1 %v3844_v32  ;;  %v2601_v48 = vpack.c.bf16 %v881_v43, %v880_v12  ;;  %v4690_v12 = vld [vmem:[#allocation9_spill] sm:$0xff]  ;;  %v4691_v43 = vld [vmem:[#allocation4_spill] sm:$0xff] }
  0xc0   : > { %1324 = vmatmul.mubr.f32.gmra.mrb[56].mxu0 %v3881_v56  ;;  %1103 = vmatprep.mubr.f32.mxu1 %v3884_v10  ;;  %v3907_v56 = vsel %vm603_vm1, %v679_v42, %v680_v35  ;;  %v882_v42 = vld [vmem:[%s4563_s1 + $0x420] sm:$0xff] }
  0xc1   : > { %1328 = vmatprep.mubr.f32.mxu0 %v3874_v7 }
  0xc3   : > { %1104 = vmatmul.mubr.f32.gmra.mrb[58].mxu1 %v3846_v39 }
  0xc4   : > { %1329 = vmatmul.mubr.f32.gmra.mrb[58].mxu0 %v3894_v23  ;;  %1108 = vmatprep.mubr.f32.mxu1 %v3897_v34  ;;  %v3919_v23 = vsel %vm603_vm1, %v680_v35, %v682_v29  ;;  %v883_v35 = vld [vmem:[%s4563_s1 + $0x428] sm:$0xff]  ;;  %v893_v29 = vld [vmem:[%s4563_s1 + $0x478] sm:$0xff] }
  0xc5   : > { %1333 = vmatprep.mubr.f32.mxu0 %v3900_v25 }
  0xc7   : > { %1109 = vmatmul.mubr.f32.gmra.mrb[60].mxu1 %v3872_v17 }
  0xc8   : > { %1334 = vmatmul.mubr.f32.gmra.mrb[60].mxu0 %v3907_v56  ;;  %1113 = vmatprep.mubr.f32.mxu1 %v3910_v37 }
  0xc9   : > { %1338 = vmatprep.mubr.f32.mxu0 %v3912_v1 }
  0xcb   : > { %1114 = vmatmul.mubr.f32.gmra.mrb[62].mxu1 %v3874_v7 }
  0xcc   : > { %1339 = vmatmul.mubr.f32.gmra.mrb[62].mxu0 %v3919_v23  ;;  %1673 = vmatprep.mubr.f32.mxu1 %v3562_v59 }
  0xcd   : > { %1408 = vmatprep.mubr.f32.mxu0 %v3280_v8  ;;  %v884_v8 = vld [vmem:[%s4563_s1 + $0x430] sm:$0xff] }
  0xcf   : > { %1674 = vmatmul.mubr.f32.vlgmr.msra.gmra.mrb[64].mxu1 %v3501_v21  ;;  %v887_v21 = vld [vmem:[%s4563_s1 + $0x448] sm:$0xff] }
  0xd0   : > { %1409 = vmatmul.mubr.f32.vlgmr.msra.gmra.mrb[0].mxu0 %v3250_v30  ;;  %1678 = vmatprep.mubr.f32.mxu1 %v3593_v53  ;;  %v2605_v30 = vpack.c.bf16 %v883_v35, %v882_v42  ;;  %v4694_v42 = vld [vmem:[#allocation11_spill] sm:$0xff]  ;;  %v4695_v35 = vld [vmem:[#allocation6_spill] sm:$0xff] }
  0xd1   : > { %2551 = vmatpush1.bf16.msra.mxu0 %v3236_v24  ;;  %1413 = vmatprep.mubr.f32.mxu0 %v3310_v2  ;;  %v885_v24 = vld [vmem:[%s4563_s1 + $0x438] sm:$0xff]  ;;  %v886_v2 = vld [vmem:[%s4563_s1 + $0x440] sm:$0xff] }
  0xd2   : > { %2552 = vmatprep.subr.bf16.mxu0 %v4654_v11  ;;  %2600 = vmatpush3.bf16.msra.mxu1 %v3704_v22  ;;  %v891_v22 = vld [vmem:[%s4563_s1 + $0x468] sm:$0xff] }
  0xd3   : > { %1679 = vmatmul.mubr.f32.gmra.mrb[66].mxu1 %v3504_v26  ;;  %2602 = vmatprep.subr.bf16.mxu1 %v2601_v48  ;;  %v888_v26 = vld [vmem:[%s4563_s1 + $0x450] sm:$0xff] }
  0xd4   : > { %1414 = vmatmul.mubr.f32.gmra.mrb[2].mxu0 %v3283_v44  ;;  %1683 = vmatprep.mubr.f32.mxu1 %v3623_v46  ;;  %v2609_v44 = vpack.c.bf16 %v885_v24, %v884_v8  ;;  %v4697_v8 = vld [vmem:[#allocation33_spill] sm:$0xff] }
  0xd5   : > { %1418 = vmatprep.mubr.f32.mxu0 %v3342_v5  ;;  %2554 = vmatpush1.bf16.msra.mxu0 %v3266_v38  ;;  %v2613_v38 = vpack.c.bf16 %v887_v21, %v886_v2  ;;  %v4698_v24 = vld [vmem:[#allocation13_spill] sm:$0xff]  ;;  %v4701_v2 = vld [vmem:[#allocation36_spill] sm:$0xff]  ;;  %v4702_v21 = vld [vmem:[#allocation15_spill] sm:$0xff] }
  0xd6   : > { %2555 = vmatprep.subr.bf16.mxu0 %v4654_v11  ;;  %2604 = vmatpush3.bf16.msra.mxu1 %v2601_v48  ;;  %v4693_v48 = vld [vmem:[#allocation31_spill] sm:$0xff] }
  0xd7   : > { %1684 = vmatmul.mubr.f32.gmra.mrb[68].mxu1 %v3564_v60  ;;  %2606 = vmatprep.subr.bf16.mxu1 %v2605_v30  ;;  %v889_v60 = vld [vmem:[%s4563_s1 + $0x458] sm:$0xff] }
  0xd8   : > { %1419 = vmatmul.mubr.f32.gmra.mrb[4].mxu0 %v3313_v55  ;;  %1688 = vmatprep.mubr.f32.mxu1 %v3656_v28 }
  0xd9   : > { %1423 = vmatprep.mubr.f32.mxu0 %v3373_v19  ;;  %2557 = vmatpush1.bf16.msra.mxu0 %v3295_v50  ;;  %v2617_v50 = vpack.c.bf16 %v889_v60, %v888_v26  ;;  %v4705_v26 = vld [vmem:[#allocation38_spill] sm:$0xff]  ;;  %v4706_v60 = vld [vmem:[#allocation17_spill] sm:$0xff] }
  0xda   : > { %2558 = vmatprep.subr.bf16.mxu0 %v4654_v11  ;;  %2608 = vmatpush3.bf16.msra.mxu1 %v2605_v30  ;;  %v4696_v30 = vld [vmem:[#allocation23_spill] sm:$0xff] }
  0xdb   : > { %1689 = vmatmul.mubr.f32.gmra.mrb[70].mxu1 %v3566_v4  ;;  %2610 = vmatprep.subr.bf16.mxu1 %v2609_v44  ;;  %v890_v4 = vld [vmem:[%s4563_s1 + $0x460] sm:$0xff] }
  0xdc   : > { %1424 = vmatmul.mubr.f32.gmra.mrb[6].mxu0 %v3345_v6  ;;  %1693 = vmatprep.mubr.f32.mxu1 %v3691_v13 }
  0xdd   : > { %1428 = vmatprep.mubr.f32.mxu0 %v3403_v31  ;;  %2560 = vmatpush1.bf16.msra.mxu0 %v3328_v62  ;;  %v2621_v62 = vpack.c.bf16 %v891_v22, %v890_v4  ;;  %v4709_v4 = vld [vmem:[#allocation40_spill] sm:$0xff]  ;;  %v4710_v22 = vld [vmem:[#allocation18_spill] sm:$0xff] }
  0xde   : > { %2561 = vmatprep.subr.bf16.mxu0 %v4654_v11  ;;  %2612 = vmatpush3.bf16.msra.mxu1 %v2609_v44  ;;  %v4699_v44 = vld [vmem:[#allocation8_spill] sm:$0xff] }
  0xdf   : > { %1694 = vmatmul.mubr.f32.gmra.mrb[72].mxu1 %v3625_v49  ;;  %2614 = vmatprep.subr.bf16.mxu1 %v2613_v38  ;;  %v892_v49 = vld [vmem:[%s4563_s1 + $0x470] sm:$0xff] }
  0xe0   : > { %1429 = vmatmul.mubr.f32.gmra.mrb[8].mxu0 %v3376_v20  ;;  %1698 = vmatprep.mubr.f32.mxu1 %v3713_v40 }
  0xe1   : > { %1433 = vmatprep.mubr.f32.mxu0 %v3432_v45  ;;  %2563 = vmatpush1.bf16.msra.mxu0 %v3357_v14  ;;  %v2625_v14 = vpack.c.bf16 %v893_v29, %v892_v49  ;;  %v4713_v49 = vld [vmem:[#allocation20_spill] sm:$0xff] }
  0xe2   : > { %2564 = vmatprep.subr.bf16.mxu0 %v4654_v11  ;;  %2616 = vmatpush3.bf16.msra.mxu1 %v2613_v38  ;;  %v4703_v38 = vld [vmem:[#allocation10_spill] sm:$0xff]  ;;  %v4714_v29 = vld [vmem:[#allocation16_spill] sm:$0xff] }
  0xe3   : > { %1699 = vmatmul.mubr.f32.gmra.mrb[74].mxu1 %v3628_v63  ;;  %2618 = vmatprep.subr.bf16.mxu1 %v2617_v50  ;;  %v4687_v63 = vld [vmem:[#allocation19_spill] sm:$0xff] }
  0xe4   : > { %1434 = vmatmul.mubr.f32.gmra.mrb[10].mxu0 %v3407_v33  ;;  %1703 = vmatprep.mubr.f32.mxu1 %v3730_v58 }
  0xe5   : > { %1438 = vmatprep.mubr.f32.mxu0 %v3467_v61  ;;  %2566 = vmatpush1.bf16.msra.mxu0 %v3390_v27  ;;  %v4684_v27 = vld [vmem:[#allocation25_spill] sm:$0xff] }
  0xe6   : > { %2567 = vmatprep.subr.bf16.mxu0 %v4654_v11  ;;  %2620 = vmatpush3.bf16.msra.mxu1 %v2617_v50  ;;  %v4707_v50 = vld [vmem:[#allocation12_spill] sm:$0xff] }
  0xe7   : > { %1704 = vmatmul.mubr.f32.gmra.mrb[76].mxu1 %v3694_v15  ;;  %2622 = vmatprep.subr.bf16.mxu1 %v2621_v62  ;;  %v4688_v15 = vld [vmem:[#allocation5_spill] sm:$0xff] }
  0xe8   : > { %1439 = vmatmul.mubr.f32.gmra.mrb[12].mxu0 %v3437_v47  ;;  %1708 = vmatprep.mubr.f32.mxu1 %v3744_v3 }
  0xe9   : > { %1443 = vmatprep.mubr.f32.mxu0 %v3494_v16  ;;  %2569 = vmatpush1.bf16.msra.mxu0 %v3419_v41  ;;  %v4685_v41 = vld [vmem:[#allocation7_spill] sm:$0xff] }
  0xea   : > { %2570 = vmatprep.subr.bf16.mxu0 %v4654_v11  ;;  %2624 = vmatpush3.bf16.msra.mxu1 %v2621_v62  ;;  %v4711_v62 = vld [vmem:[#allocation14_spill] sm:$0xff] }
  0xeb   : > { %1709 = vmatmul.mubr.f32.gmra.mrb[78].mxu1 %v3696_v36  ;;  %2626 = vmatprep.subr.bf16.mxu1 %v2625_v14  ;;  %v4686_v36 = vld [vmem:[#allocation3_spill] sm:$0xff] }
  0xec   : > { %1444 = vmatmul.mubr.f32.gmra.mrb[14].mxu0 %v3470_v0  ;;  %1713 = vmatprep.mubr.f32.mxu1 %v3757_v54 }
  0xed   : > { %1448 = vmatprep.mubr.f32.mxu0 %v3529_v9  ;;  %2572 = vmatpush1.bf16.msra.mxu0 %v3452_v57  ;;  %v4689_v57 = vld [vmem:[#allocation27_spill] sm:$0xff] }
  0xee   : > { %2573 = vmatprep.subr.bf16.mxu0 %v4654_v11  ;;  %2628 = vmatpush3.bf16.msra.mxu1 %v2625_v14  ;;  %v4073_v14 = vld [vmem:[#allocation2 + $0x190] sm:$0x3] }
  0xef   : > { %1714 = vmatmul.mubr.f32.gmra.mrb[80].mxu1 %v3732_v52  ;;  %v4692_v52 = vld [vmem:[#allocation22_spill] sm:$0xff] }
  0xf0   : > { %1449 = vmatmul.mubr.f32.gmra.mrb[16].mxu0 %v3499_v18  ;;  %1718 = vmatprep.mubr.f32.mxu1 %v4684_v27 }
  0xf1   : > { %1453 = vmatprep.mubr.f32.mxu0 %v4685_v41  ;;  %2575 = vmatpush1.bf16.msra.mxu0 %v4686_v36 }
  0xf2   : > { %2576 = vmatprep.subr.bf16.mxu0 %v4654_v11 }
  0xf3   : > { %1719 = vmatmul.mubr.f32.gmra.mrb[82].mxu1 %v4687_v63  ;;  %v4093_v63 = vld [vmem:[#allocation2 + $0x1a8] sm:$0x3] }
  0xf4   : > { %1454 = vmatmul.mubr.f32.gmra.mrb[18].mxu0 %v4688_v15  ;;  %1723 = vmatprep.mubr.f32.mxu1 %v4689_v57 }
  0xf5   : > { %1458 = vmatprep.mubr.f32.mxu0 %v4690_v12  ;;  %2578 = vmatpush1.bf16.msra.mxu0 %v4691_v43 }
  0xf6   : > { %2579 = vmatprep.subr.bf16.mxu0 %v4654_v11 }
  0xf7   : > { %1724 = vmatmul.mubr.f32.gmra.mrb[84].mxu1 %v4692_v52 }
  0xf8   : > { %1459 = vmatmul.mubr.f32.gmra.mrb[20].mxu0 %v3562_v59  ;;  %1728 = vmatprep.mubr.f32.mxu1 %v4693_v48  ;;  %v4700_v59 = vld [vmem:[#allocation28_spill] sm:$0xff] }
  0xf9   : > { %1463 = vmatprep.mubr.f32.mxu0 %v4694_v42  ;;  %2581 = vmatpush1.bf16.msra.mxu0 %v4695_v35  ;;  %v4720_v35 = vld [vmem:[#allocation35_spill] sm:$0xff] }
  0xfa   : > { %2582 = vmatprep.subr.bf16.mxu0 %v4654_v11 }
  0xfb   : > { %1729 = vmatmul.mubr.f32.gmra.mrb[86].mxu1 %v4696_v30 }
  0xfc   : > { %1464 = vmatmul.mubr.f32.gmra.mrb[22].mxu0 %v3593_v53  ;;  %1733 = vmatprep.mubr.f32.mxu1 %v4697_v8  ;;  %v4704_v53 = vld [vmem:[#allocation29_spill] sm:$0xff] }
  0xfd   : > { %1468 = vmatprep.mubr.f32.mxu0 %v4698_v24  ;;  %2584 = vmatpush1.bf16.msra.mxu0 %v4699_v44 }
  0xfe   : > { %2585 = vmatprep.subr.bf16.mxu0 %v4654_v11 }
  0xff   : > { %1734 = vmatmul.mubr.f32.gmra.mrb[88].mxu1 %v4700_v59  ;;  %v4721_v59 = vld [vmem:[#allocation37_spill] sm:$0xff] }
 0x100   : > { %1469 = vmatmul.mubr.f32.gmra.mrb[24].mxu0 %v3623_v46  ;;  %1738 = vmatprep.mubr.f32.mxu1 %v4701_v2  ;;  %v4708_v46 = vld [vmem:[#allocation34_spill] sm:$0xff] }
 0x101   : > { %1473 = vmatprep.mubr.f32.mxu0 %v4702_v21  ;;  %2587 = vmatpush1.bf16.msra.mxu0 %v4703_v38 }
 0x102   : > { %2588 = vmatprep.subr.bf16.mxu0 %v4654_v11 }
 0x103   : > { %1739 = vmatmul.mubr.f32.gmra.mrb[90].mxu1 %v4704_v53  ;;  %v4722_v53 = vld [vmem:[#allocation39_spill] sm:$0xff] }
 0x104   : > { %1474 = vmatmul.mubr.f32.gmra.mrb[26].mxu0 %v3656_v28  ;;  %1743 = vmatprep.mubr.f32.mxu1 %v4705_v26  ;;  %v4712_v28 = vld [vmem:[#allocation42_spill] sm:$0xff] }
 0x105   : > { %1478 = vmatprep.mubr.f32.mxu0 %v4706_v60  ;;  %2590 = vmatpush1.bf16.msra.mxu0 %v4707_v50 }
 0x106   : > { %2591 = vmatprep.subr.bf16.mxu0 %v4654_v11 }
 0x107   : > { %1744 = vmatmul.mubr.f32.gmra.mrb[92].mxu1 %v4708_v46 }
 0x108   : > { %1479 = vmatmul.mubr.f32.gmra.mrb[28].mxu0 %v3691_v13  ;;  %1748 = vmatprep.mubr.f32.mxu1 %v4709_v4  ;;  %v4715_v13 = vld [vmem:[#allocation21_spill] sm:$0xff] }
 0x109   : > { %1483 = vmatprep.mubr.f32.mxu0 %v4710_v22  ;;  %2593 = vmatpush1.bf16.msra.mxu0 %v4711_v62 }
 0x10a   : > { %2594 = vmatprep.subr.bf16.mxu0 %v4654_v11  ;;  %v719_v11 = vrot.slane %v3900_v25, 1 }
 0x10b   : > { %1749 = vmatmul.mubr.f32.gmra.mrb[94].mxu1 %v3818_v51  ;;  %v4716_v51 = vld [vmem:[#allocation24_spill] sm:$0xff] }
 0x10c   : > { %1484 = vmatmul.mubr.f32.gmra.mrb[30].mxu0 %v3713_v40  ;;  %1753 = vmatprep.mubr.f32.mxu1 %v4712_v28  ;;  %v720_v40 = vrot.slane %v3912_v1, 1 }
 0x10d   : > { %1488 = vmatprep.mubr.f32.mxu0 %v4713_v49  ;;  %2596 = vmatpush1.bf16.msra.mxu0 %v4714_v29 }
 0x10f   : > { %1754 = vmatmul.mubr.f32.gmra.mrb[96].mxu1 %v3844_v32  ;;  %v4718_v32 = vld [vmem:[#allocation30_spill] sm:$0xff] }
 0x110   : > { %1489 = vmatmul.mubr.f32.gmra.mrb[32].mxu0 %v3730_v58  ;;  %1758 = vmatprep.mubr.f32.mxu1 %v3884_v10  ;;  %v4717_v58 = vld [vmem:[#allocation26_spill] sm:$0xff] }
 0x111   : > { %1493 = vmatprep.mubr.f32.mxu0 %v4715_v13 }
 0x113   : > { %1759 = vmatmul.mubr.f32.gmra.mrb[98].mxu1 %v3846_v39  ;;  %v4080_v39 = vsel %vm490_vm0, %v719_v11, %v720_v40  ;;  %v2810_v11 = vld [vmem:[#allocation2 + $0x48] sm:$0xff] }
 0x114   : > { %1494 = vmatmul.mubr.f32.gmra.mrb[34].mxu0 %v3744_v3  ;;  %1763 = vmatprep.mubr.f32.mxu1 %v3897_v34  ;;  %v722_v3 = vrot.slane %v4073_v14, 1 }
 0x115   : > { %1498 = vmatprep.mubr.f32.mxu0 %v4716_v51 }
 0x117   : > { %1764 = vmatmul.mubr.f32.gmra.mrb[100].mxu1 %v3872_v17  ;;  %v4088_v17 = vsel %vm490_vm0, %v720_v40, %v722_v3 }
 0x118   : > { %1499 = vmatmul.mubr.f32.gmra.mrb[36].mxu0 %v3757_v54  ;;  %1768 = vmatprep.mubr.f32.mxu1 %v3910_v37  ;;  %v4090_v54 = vld [vmem:[#allocation2] sm:$0xff] }
 0x119   : > { %1503 = vmatprep.mubr.f32.mxu0 %v4717_v58  ;;  %v736_v36 = vrot.slane %v4090_v54, 1 }
 0x11b   : > { %1769 = vmatmul.mubr.f32.gmra.mrb[102].mxu1 %v3874_v7  ;;  %v4719_v7 = vld [vmem:[#allocation32_spill] sm:$0xff] }
 0x11c   : > { %1504 = vmatmul.mubr.f32.gmra.mrb[38].mxu0 %v4684_v27  ;;  %1773 = vmatprep.mubr.f32.mxu1 %v4080_v39  ;;  %v739_v27 = vrot.slane %v4093_v63, 1 }
 0x11d   : > { %1508 = vmatprep.mubr.f32.mxu0 %v4718_v32 }
 0x11e   : > { %v740_v30 = vsel %vm490_vm0, %v736_v36, %v739_v27  ;;  %v2815_v27 = vld [vmem:[#allocation2 + $0x80] sm:$0xff] }
 0x11f   : > { %1774 = vmatmul.mubr.f32.gmra.mrb[104].mxu1 %v3900_v25 }
 0x120   : > { %1509 = vmatmul.mubr.f32.gmra.mrb[40].mxu0 %v4689_v57  ;;  %1778 = vmatprep.mubr.f32.mxu1 %v4088_v17 }
 0x121   : > { %1513 = vmatprep.mubr.f32.mxu0 %v4719_v7 }
 0x122   : > { %v4100_v43 = vpop.f32.mrb[0].mxu1 }
 0x123   : > { %1779 = vmatmul.mubr.f32.gmra.mrb[106].mxu1 %v3912_v1  ;;  %v962_v52 = vpop.f32.mrb[1].mxu1 }
 0x124   : > { %1514 = vmatmul.mubr.f32.gmra.mrb[42].mxu0 %v4693_v48  ;;  %1783 = vmatprep.mubr.f32.mxu1 %v736_v36 }
 0x125   : > { %1518 = vmatprep.mubr.f32.mxu0 %v4720_v35 }
 0x126   : > { %v4106_v44 = vpop.f32.mrb[2].mxu1 }
 0x127   : > { %1784 = vmatmul.mubr.f32.gmra.mrb[108].mxu1 %v4090_v54  ;;  %v967_v57 = vpop.f32.mrb[3].mxu1 }
 0x128   : > { %1519 = vmatmul.mubr.f32.gmra.mrb[44].mxu0 %v4697_v8  ;;  %1788 = vmatprep.mubr.f32.mxu1 %v740_v30  ;;  %v4723_v8 = vld [vmem:[#allocation41_spill] sm:$0xff] }
 0x129   : > { %1523 = vmatprep.mubr.f32.mxu0 %v4721_v59 }
 0x12a   : > { %v4111_v38 = vpop.f32.mrb[4].mxu1 }
 0x12b   : > { %1789 = vmatmul.mubr.f32.gmra.mrb[110].mxu1 %v4090_v54  ;;  %v972_v48 = vpop.f32.mrb[5].mxu1 }
 0x12c   : > { %1524 = vmatmul.mubr.f32.gmra.mrb[46].mxu0 %v4701_v2  ;;  %2357 = vmatprep.mubr.f32.mxu1 %v3342_v5  ;;  %v4724_v5 = vld [vmem:[#allocation43_spill] sm:$0xff] }
 0x12d   : > { %1528 = vmatprep.mubr.f32.mxu0 %v4722_v53 }
 0x12e   : > { %v4117_v50 = vpop.f32.mrb[6].mxu1 }
 0x12f   : > { %2358 = vmatmul.mubr.f32.vlgmr.msra.gmra.mrb[112].mxu1 %v3373_v19  ;;  %v977_v46 = vpop.f32.mrb[7].mxu1 }
 0x130   : > { %1529 = vmatmul.mubr.f32.gmra.mrb[48].mxu0 %v4705_v26  ;;  %2360 = vmatprep.mubr.f32.mxu1 %v3403_v31  ;;  %v4725_v31 = vld [vmem:[#allocation44_spill] sm:$0xff] }
 0x131   : > { %1533 = vmatprep.mubr.f32.mxu0 %v4723_v8 }
 0x132   : > { %v4123_v62 = vpop.f32.mrb[8].mxu1 }
 0x133   : > { %2361 = vmatmul.mubr.f32.gmra.mrb[114].mxu1 %v3432_v45  ;;  %v982_v2 = vpop.f32.mrb[9].mxu1 }
 0x134   : > { %1534 = vmatmul.mubr.f32.gmra.mrb[50].mxu0 %v4709_v4  ;;  %2363 = vmatprep.mubr.f32.mxu1 %v3467_v61  ;;  %v726_v61 = vrot.slane %v3900_v25, 2 }
 0x135   : > { %1538 = vmatprep.mubr.f32.mxu0 %v4724_v5 }
 0x136   : > { %v4129_v29 = vpop.f32.mrb[10].mxu1 }
 0x137   : > { %2364 = vmatmul.mubr.f32.gmra.mrb[116].mxu1 %v3494_v16  ;;  %v987_v19 = vpop.f32.mrb[11].mxu1  ;;  %v727_v16 = vrot.slane %v3912_v1, 2 }
 0x138   : > { %1539 = vmatmul.mubr.f32.gmra.mrb[52].mxu0 %v4712_v28  ;;  %2366 = vmatprep.mubr.f32.mxu1 %v3529_v9 }
 0x139   : > { %1543 = vmatprep.mubr.f32.mxu0 %v4725_v31 }
 0x13a   : > { %v4135_v26 = vpop.f32.mrb[12].mxu1 }
 0x13b   : > { %2367 = vmatmul.mubr.f32.gmra.mrb[118].mxu1 %v4685_v41  ;;  %v992_v45 = vpop.f32.mrb[13].mxu1  ;;  %v729_v41 = vrot.slane %v4073_v14, 2  ;;  %v2811_v14 = vld [vmem:[#allocation2 + $0x50] sm:$0xff] }
 0x13c   : > { %1544 = vmatmul.mubr.f32.gmra.mrb[54].mxu0 %v3884_v10  ;;  %2369 = vmatprep.mubr.f32.mxu1 %v4690_v12  ;;  %v728_v10 = vsel %vm603_vm1, %v726_v61, %v727_v16 }
 0x13d   : > { %1548 = vmatprep.mubr.f32.mxu0 %v3907_v56 }
 0x13e   : > { %v4143_v4 = vpop.f32.mrb[14].mxu1 }
 0x13f   : > { %2370 = vmatmul.mubr.f32.gmra.mrb[120].mxu1 %v4694_v42  ;;  %v997_v9 = vpop.f32.mrb[15].mxu1 }
 0x140   : > { %1549 = vmatmul.mubr.f32.gmra.mrb[56].mxu0 %v3897_v34  ;;  %2372 = vmatprep.mubr.f32.mxu1 %v4698_v24  ;;  %v730_v34 = vsel %vm603_vm1, %v727_v16, %v729_v41 }
 0x141   : > { %1553 = vmatprep.mubr.f32.mxu0 %v3919_v23 }
 0x142   : > { %v4151_v12 = vpop.f32.mrb[16].mxu1 }
 0x143   : > { %2373 = vmatmul.mubr.f32.gmra.mrb[122].mxu1 %v4702_v21  ;;  %v1002_v25 = vpop.f32.mrb[17].mxu1 }
 0x144   : > { %1554 = vmatmul.mubr.f32.gmra.mrb[58].mxu0 %v3910_v37  ;;  %2375 = vmatprep.mubr.f32.mxu1 %v4706_v60 }
 0x145   : > { %1558 = vmatprep.mubr.f32.mxu0 %v728_v10 }
 0x146   : > { %v4157_v1 = vpop.f32.mrb[18].mxu1 }
 0x147   : > { %2376 = vmatmul.mubr.f32.gmra.mrb[124].mxu1 %v4710_v22  ;;  %v1007_v42 = vpop.f32.mrb[19].mxu1  ;;  %v2808_v22 = vld [vmem:[#allocation2 + $0x30] sm:$0xff] }
 0x148   : > { %1559 = vmatmul.mubr.f32.gmra.mrb[60].mxu0 %v4080_v39  ;;  %2378 = vmatprep.mubr.f32.mxu1 %v4713_v49  ;;  %v2812_v39 = vld [vmem:[#allocation2 + $0x60] sm:$0xff] }
 0x149   : > { %1563 = vmatprep.mubr.f32.mxu0 %v730_v34 }
 0x14a   : > { %v4162_v24 = vpop.f32.mrb[20].mxu1 }
 0x14b   : > { %2379 = vmatmul.mubr.f32.gmra.mrb[126].mxu1 %v4715_v13  ;;  %v1012_v37 = vpop.f32.mrb[21].mxu1  ;;  %v2809_v13 = vld [vmem:[#allocation2 + $0x38] sm:$0xff] }
 0x14c   : > { %1564 = vmatmul.mubr.f32.gmra.mrb[62].mxu0 %v4088_v17  ;;  %2381 = vmatprep.mubr.f32.mxu1 %v4716_v51  ;;  %v2813_v17 = vld [vmem:[#allocation2 + $0x68] sm:$0xff] }
 0x14d   : > { %1633 = vmatprep.mubr.f32.mxu0 %v3313_v55 }
 0x14e   : > { %v4168_v21 = vpop.f32.mrb[22].mxu1 }
 0x14f   : > { %2382 = vmatmul.mubr.f32.gmra.mrb[128].mxu1 %v4717_v58  ;;  %v1017_v60 = vpop.f32.mrb[23].mxu1 }
 0x150   : > { %1634 = vmatmul.mubr.f32.vlgmr.msra.gmra.mrb[0].mxu0 %v2808_v22  ;;  %2384 = vmatprep.mubr.f32.mxu1 %v4718_v32 }
 0x151   : > { %1638 = vmatprep.mubr.f32.mxu0 %v3345_v6 }
 0x152   : > { %v4173_v28 = vpop.f32.mrb[24].mxu1 }
 0x153   : > { %2385 = vmatmul.mubr.f32.gmra.mrb[130].mxu1 %v4719_v7  ;;  %v1022_v49 = vpop.f32.mrb[25].mxu1  ;;  %v2814_v7 = vld [vmem:[#allocation2 + $0x78] sm:$0xff] }
 0x154   : > { %1639 = vmatmul.mubr.f32.gmra.mrb[2].mxu0 %v2809_v13  ;;  %2387 = vmatprep.mubr.f32.mxu1 %v4720_v35 }
 0x155   : > { %1643 = vmatprep.mubr.f32.mxu0 %v3376_v20 }
 0x156   : > { %v4178_v55 = vpop.f32.mrb[26].mxu1 }
 0x157   : > { %2388 = vmatmul.mubr.f32.gmra.mrb[132].mxu1 %v4721_v59  ;;  %v1027_v51 = vpop.f32.mrb[27].mxu1 }
 0x158   : > { %1644 = vmatmul.mubr.f32.gmra.mrb[4].mxu0 %v2810_v11  ;;  %2390 = vmatprep.mubr.f32.mxu1 %v4722_v53 }
 0x159   : > { %1648 = vmatprep.mubr.f32.mxu0 %v3407_v33  ;;  %v743_v33 = vrot.slane %v4090_v54, 2 }
 0x15a   : > { %v4183_v6 = vpop.f32.mrb[28].mxu1 }
 0x15b   : > { %2391 = vmatmul.mubr.f32.gmra.mrb[134].mxu1 %v4723_v8  ;;  %v1032_v40 = vpop.f32.mrb[29].mxu1 }
 0x15c   : > { %1649 = vmatmul.mubr.f32.gmra.mrb[6].mxu0 %v2811_v14  ;;  %2393 = vmatprep.mubr.f32.mxu1 %v4724_v5 }
 0x15d   : > { %1653 = vmatprep.mubr.f32.mxu0 %v3437_v47  ;;  %v746_v47 = vrot.slane %v4093_v63, 2 }
 0x15e   : > { %v4188_v20 = vpop.f32.mrb[30].mxu1 }
 0x15f   : > { %2394 = vmatmul.mubr.f32.gmra.mrb[136].mxu1 %v4725_v31  ;;  %v1037_v58 = vpop.f32.mrb[31].mxu1 }
 0x160   : > { %1654 = vmatmul.mubr.f32.gmra.mrb[8].mxu0 %v2812_v39  ;;  %2396 = vmatprep.mubr.f32.mxu1 %v3907_v56 }
 0x161   : > { %1658 = vmatprep.mubr.f32.mxu0 %v3470_v0  ;;  %v747_v0 = vsel %vm603_vm1, %v743_v33, %v746_v47 }
 0x162   : > { %v4194_v3 = vpop.f32.mrb[32].mxu1 }
 0x163   : > { %2397 = vmatmul.mubr.f32.gmra.mrb[138].mxu1 %v3919_v23  ;;  %v1042_v32 = vpop.f32.mrb[33].mxu1 }
 0x164   : > { %1659 = vmatmul.mubr.f32.gmra.mrb[10].mxu0 %v2813_v17  ;;  %2399 = vmatprep.mubr.f32.mxu1 %v728_v10 }
 0x165   : > { %1663 = vmatprep.mubr.f32.mxu0 %v3499_v18 }
 0x166   : > { %v4199_v36 = vpop.f32.mrb[34].mxu1 }
 0x167   : > { %2400 = vmatmul.mubr.f32.gmra.mrb[140].mxu1 %v730_v34  ;;  %v1047_v56 = vpop.f32.mrb[35].mxu1 }
 0x168   : > { %1664 = vmatmul.mubr.f32.gmra.mrb[12].mxu0 %v2814_v7  ;;  %2402 = vmatprep.mubr.f32.mxu1 %v743_v33 }
 0x169   : > { %1668 = vmatprep.mubr.f32.mxu0 %v4688_v15 }
 0x16a   : > { %v4203_v23 = vpop.f32.mrb[36].mxu1 }
 0x16b   : > { %2403 = vmatmul.mubr.f32.gmra.mrb[142].mxu1 %v747_v0  ;;  %v1052_v54 = vpop.f32.mrb[37].mxu1 }
 0x16c   : > { %1669 = vmatmul.mubr.f32.gmra.mrb[14].mxu0 %v2815_v27 }
 0x16e   : > { %v4205_v63 = vpop.f32.mrb[38].mxu1 }
 0x16f   : > { %v1057_v18 = vpop.f32.mrb[39].mxu1 }
 0x172   : > { %v4207_v52 = vpop.f32.mrb[40].mxu1 }
 0x173   : > { %v1062_v35 = vpop.f32.mrb[41].mxu1 }
 0x176   : > { %v4209_v30 = vpop.f32.mrb[42].mxu1 }
 0x177   : > { %v1067_v57 = vpop.f32.mrb[43].mxu1 }
 0x17a   : > { %v4211_v59 = vpop.f32.mrb[44].mxu1 }
 0x17b   : > { %v1072_v48 = vpop.f32.mrb[45].mxu1 }
 0x17e   : > { %v4213_v53 = vpop.f32.mrb[46].mxu1 }
 0x17f   : > { %v1077_v15 = vpop.f32.mrb[47].mxu1 }
 0x182   : > { %v4215_v46 = vpop.f32.mrb[48].mxu1 }
 0x183   : > { %v1082_v8 = vpop.f32.mrb[49].mxu1 }
 0x186   : > { %v4217_v2 = vpop.f32.mrb[50].mxu1 }
 0x187   : > { %v1087_v5 = vpop.f32.mrb[51].mxu1 }
 0x18a   : > { %v4219_v19 = vpop.f32.mrb[52].mxu1 }
 0x18b   : > { %v1092_v31 = vpop.f32.mrb[53].mxu1 }
 0x18e   : > { %v4221_v45 = vpop.f32.mrb[54].mxu1 }
 0x18f   : > { %v1097_v61 = vpop.f32.mrb[55].mxu1 }
 0x192   : > { %v4223_v16 = vpop.f32.mrb[56].mxu1 }
 0x193   : > { %v1102_v9 = vpop.f32.mrb[57].mxu1 }
 0x196   : > { %v4225_v10 = vpop.f32.mrb[58].mxu1 }
 0x197   : > { %v1107_v41 = vpop.f32.mrb[59].mxu1 }
 0x19a   : > { %v4227_v25 = vpop.f32.mrb[60].mxu1 }
 0x19b   : > { %v1112_v34 = vpop.f32.mrb[61].mxu1 }
 0x19e   : > { %v4229_v42 = vpop.f32.mrb[62].mxu1 }
 0x19f   : > { %v1117_v37 = vpop.f32.mrb[63].mxu1 }
 0x1a2   : > { %v1675_v60 = vpop.f32.mrb[64].mxu1 }
 0x1a3   : > { %v1677_v22 = vpop.f32.mrb[65].mxu1 }
 0x1a6   : > { %v1680_v49 = vpop.f32.mrb[66].mxu1 }
 0x1a7   : > { %v1682_v13 = vpop.f32.mrb[67].mxu1 }
 0x1aa   : > { %v1685_v51 = vpop.f32.mrb[68].mxu1 }
 0x1ab   : > { %v1687_v11 = vpop.f32.mrb[69].mxu1 }
 0x1ae   : > { %v1690_v40 = vpop.f32.mrb[70].mxu1 }
 0x1af   : > { %v1692_v14 = vpop.f32.mrb[71].mxu1 }
 0x1b2   : > { %v1695_v58 = vpop.f32.mrb[72].mxu1 }
 0x1b3   : > { %v1697_v39 = vpop.f32.mrb[73].mxu1 }
 0x1b6   : > { %v1700_v33 = vpop.f32.mrb[74].mxu1 }
 0x1b7   : > { %v1702_v32 = vpop.f32.mrb[75].mxu1 }
 0x1ba   : > { %v1705_v17 = vpop.f32.mrb[76].mxu1 }
 0x1bb   : > { %v1707_v47 = vpop.f32.mrb[77].mxu1 }
 0x1be   : > { %v1710_v56 = vpop.f32.mrb[78].mxu1 }
 0x1bf   : > { %v1712_v7 = vpop.f32.mrb[79].mxu1 }
 0x1c2   : > { %v1715_v0 = vpop.f32.mrb[80].mxu1 }
 0x1c3   : > { %v1450_v54 = vpop.f32.mrb[16].mxu0  ;;  %v1717_v27 = vpop.f32.mrb[81].mxu1 }
 0x1c4   : > { %v2669_v18 = vadd.f32 %v1450_v54, %v4151_v12  ;;  %v1452_v35 = vpop.f32.mrb[17].mxu0 }
 0x1c6   : > { %v4232_v57 = vadd.f32 %v2669_v18, %v1675_v60  ;;  %v1720_v48 = vpop.f32.mrb[82].mxu1 }
 0x1c7   : > { %v1455_v15 = vpop.f32.mrb[18].mxu0  ;;  %v1722_v8 = vpop.f32.mrb[83].mxu1 }
 0x1c8   : > { %v2671_v5 = vadd.f32 %v1455_v15, %v4157_v1  ;;  %v1457_v31 = vpop.f32.mrb[19].mxu0 }
 0x1ca   : > { %v4235_v61 = vadd.f32 %v2671_v5, %v1680_v49  ;;  %v1725_v9 = vpop.f32.mrb[84].mxu1 }
 0x1cb   : > { %v1460_v41 = vpop.f32.mrb[20].mxu0  ;;  %v1727_v34 = vpop.f32.mrb[85].mxu1 }
 0x1cc   : > { %v2673_v37 = vadd.f32 %v1460_v41, %v4162_v24  ;;  %v1462_v22 = vpop.f32.mrb[21].mxu0 }
 0x1ce   : > { %v4238_v13 = vadd.f32 %v2673_v37, %v1685_v51  ;;  %v1730_v12 = vpop.f32.mrb[86].mxu1 }
 0x1cf   : > { %v1465_v11 = vpop.f32.mrb[22].mxu0  ;;  %v1732_v60 = vpop.f32.mrb[87].mxu1 }
 0x1d0   : > { %v2675_v14 = vadd.f32 %v1465_v11, %v4168_v21  ;;  %v1467_v39 = vpop.f32.mrb[23].mxu0 }
 0x1d2   : > { %v4241_v32 = vadd.f32 %v2675_v14, %v1690_v40  ;;  %v1735_v1 = vpop.f32.mrb[88].mxu1 }
 0x1d3   : > { %v1470_v47 = vpop.f32.mrb[24].mxu0  ;;  %v1737_v49 = vpop.f32.mrb[89].mxu1 }
 0x1d4   : > { %v2677_v7 = vadd.f32 %v1470_v47, %v4173_v28  ;;  %v1472_v54 = vpop.f32.mrb[25].mxu0 }
 0x1d6   : > { %v4244_v27 = vadd.f32 %v2677_v7, %v1695_v58  ;;  %v1740_v24 = vpop.f32.mrb[90].mxu1 }
 0x1d7   : > { %v1475_v18 = vpop.f32.mrb[26].mxu0  ;;  %v1742_v51 = vpop.f32.mrb[91].mxu1 }
 0x1d8   : > { %v2679_v35 = vadd.f32 %v1475_v18, %v4178_v55  ;;  %v1477_v15 = vpop.f32.mrb[27].mxu0 }
 0x1da   : > { %v4247_v8 = vadd.f32 %v2679_v35, %v1700_v33  ;;  %v1745_v21 = vpop.f32.mrb[92].mxu1 }
 0x1db   : > { %v1480_v5 = vpop.f32.mrb[28].mxu0  ;;  %v1747_v40 = vpop.f32.mrb[93].mxu1 }
 0x1dc   : > { %v2681_v31 = vadd.f32 %v1480_v5, %v4183_v6  ;;  %v1482_v41 = vpop.f32.mrb[29].mxu0 }
 0x1de   : > { %v4250_v34 = vadd.f32 %v2681_v31, %v1705_v17  ;;  %v1750_v28 = vpop.f32.mrb[94].mxu1 }
 0x1df   : > { %v1485_v37 = vpop.f32.mrb[30].mxu0  ;;  %v1752_v58 = vpop.f32.mrb[95].mxu1 }
 0x1e0   : > { %v2683_v22 = vadd.f32 %v1485_v37, %v4188_v20  ;;  %v1487_v11 = vpop.f32.mrb[31].mxu0 }
 0x1e2   : > { %v4253_v60 = vadd.f32 %v2683_v22, %v1710_v56  ;;  %v1755_v55 = vpop.f32.mrb[96].mxu1 }
 0x1e3   : > { %v1490_v14 = vpop.f32.mrb[32].mxu0  ;;  %v1757_v33 = vpop.f32.mrb[97].mxu1 }
 0x1e4   : > { %v2685_v39 = vadd.f32 %v1490_v14, %v4194_v3  ;;  %v1492_v47 = vpop.f32.mrb[33].mxu0 }
 0x1e6   : > { %v4256_v49 = vadd.f32 %v2685_v39, %v1715_v0  ;;  %v1760_v6 = vpop.f32.mrb[98].mxu1 }
 0x1e7   : > { %v1495_v7 = vpop.f32.mrb[34].mxu0  ;;  %v1762_v17 = vpop.f32.mrb[99].mxu1 }
 0x1e8   : > { %v2687_v54 = vadd.f32 %v1495_v7, %v4199_v36  ;;  %v1497_v18 = vpop.f32.mrb[35].mxu0 }
 0x1ea   : > { %v4259_v51 = vadd.f32 %v2687_v54, %v1720_v48  ;;  %v1765_v20 = vpop.f32.mrb[100].mxu1 }
 0x1eb   : > { %v1500_v35 = vpop.f32.mrb[36].mxu0  ;;  %v1767_v56 = vpop.f32.mrb[101].mxu1 }
 0x1ec   : > { %v2689_v15 = vadd.f32 %v1500_v35, %v4203_v23  ;;  %v1502_v5 = vpop.f32.mrb[37].mxu0 }
 0x1ee   : > { %v4262_v40 = vadd.f32 %v2689_v15, %v1725_v9  ;;  %v1770_v3 = vpop.f32.mrb[102].mxu1 }
 0x1ef   : > { %v1505_v31 = vpop.f32.mrb[38].mxu0  ;;  %v1772_v0 = vpop.f32.mrb[103].mxu1 }
 0x1f0   : > { %v2691_v41 = vadd.f32 %v1505_v31, %v4205_v63  ;;  %v1507_v37 = vpop.f32.mrb[39].mxu0 }
 0x1f2   : > { %v4265_v58 = vadd.f32 %v2691_v41, %v1730_v12  ;;  %v1775_v36 = vpop.f32.mrb[104].mxu1 }
 0x1f3   : > { %v1510_v22 = vpop.f32.mrb[40].mxu0  ;;  %v1777_v48 = vpop.f32.mrb[105].mxu1 }
 0x1f4   : > { %v2693_v11 = vadd.f32 %v1510_v22, %v4207_v52  ;;  %v1512_v14 = vpop.f32.mrb[41].mxu0 }
 0x1f6   : > { %v4268_v33 = vadd.f32 %v2693_v11, %v1735_v1  ;;  %v4270_v23 = vpop.f32.mrb[106].mxu1 }
 0x1f7   : > { %v1515_v9 = vpop.f32.mrb[42].mxu0  ;;  %v1782_v39 = vpop.f32.mrb[107].mxu1 }
 0x1f8   : > { %v2695_v47 = vadd.f32 %v1515_v9, %v4209_v30  ;;  %v1517_v7 = vpop.f32.mrb[43].mxu0 }
 0x1fa   : > { %v4273_v17 = vpop.f32.mrb[108].mxu1  ;;  %v4275_v63 = vadd.f32 %v2695_v47, %v1740_v24 }
 0x1fb   : > { %v1520_v12 = vpop.f32.mrb[44].mxu0  ;;  %v1787_v54 = vpop.f32.mrb[109].mxu1 }
 0x1fc   : > { %v2697_v18 = vadd.f32 %v1520_v12, %v4211_v59  ;;  %v1522_v35 = vpop.f32.mrb[45].mxu0 }
 0x1fe   : > { %v4278_v52 = vpop.f32.mrb[110].mxu1  ;;  %v4280_v1 = vadd.f32 %v2697_v18, %v1745_v21 }
 0x1ff   : > { %v1525_v56 = vpop.f32.mrb[46].mxu0  ;;  %v1792_v15 = vpop.f32.mrb[111].mxu1 }
 0x200   : > { %v2699_v5 = vadd.f32 %v1525_v56, %v4213_v53  ;;  %v1527_v31 = vpop.f32.mrb[47].mxu0 }
 0x202   : > { %v4283_v30 = vpop.f32.mrb[112].mxu1  ;;  %v4285_v0 = vadd.f32 %v2699_v5, %v1750_v28 }
 0x203   : > { %v1530_v24 = vpop.f32.mrb[48].mxu0  ;;  %v4287_v41 = vpop.f32.mrb[113].mxu1 }
 0x204   : > { %v2701_v37 = vadd.f32 %v1530_v24, %v4215_v46  ;;  %v1532_v59 = vpop.f32.mrb[49].mxu0 }
 0x206   : > { %v4290_v22 = vpop.f32.mrb[114].mxu1  ;;  %v4292_v48 = vadd.f32 %v2701_v37, %v1755_v55 }
 0x207   : > { %v1535_v21 = vpop.f32.mrb[50].mxu0  ;;  %v4294_v11 = vpop.f32.mrb[115].mxu1 }
 0x208   : > { %v2703_v53 = vadd.f32 %v1535_v21, %v4217_v2  ;;  %v1537_v14 = vpop.f32.mrb[51].mxu0 }
 0x20a   : > { %v4297_v9 = vpop.f32.mrb[116].mxu1  ;;  %v4299_v28 = vadd.f32 %v2703_v53, %v1760_v6 }
 0x20b   : > { %v1540_v39 = vpop.f32.mrb[52].mxu0  ;;  %v4301_v47 = vpop.f32.mrb[117].mxu1 }
 0x20c   : > { %v2705_v46 = vadd.f32 %v1540_v39, %v4219_v19  ;;  %v1542_v7 = vpop.f32.mrb[53].mxu0 }
 0x20e   : > { %v4304_v12 = vpop.f32.mrb[118].mxu1  ;;  %v4306_v55 = vadd.f32 %v2705_v46, %v1765_v20 }
 0x20f   : > { %v1545_v54 = vpop.f32.mrb[54].mxu0  ;;  %v4308_v18 = vpop.f32.mrb[119].mxu1 }
 0x210   : > { %v2707_v2 = vadd.f32 %v1545_v54, %v4221_v45  ;;  %v1547_v35 = vpop.f32.mrb[55].mxu0 }
 0x212   : > { %v2371_v19 = vpop.f32.mrb[120].mxu1  ;;  %v4318_v6 = vadd.f32 %v2707_v2, %v1770_v3 }
 0x213   : > { %v1550_v56 = vpop.f32.mrb[56].mxu0  ;;  %v4321_v20 = vadd.f32 %v4235_v61, %v2371_v19  ;;  %v1900_v15 = vpop.f32.mrb[121].mxu1 }
 0x214   : > { %v2709_v45 = vadd.f32 %v1550_v56, %v4223_v16  ;;  %v1552_v5 = vpop.f32.mrb[57].mxu0  ;;  %v4325_v31 = vadd.f32 %v4232_v57, %v1900_v15 }
 0x215   : > { %2136 = vst [vmem:[%s4316_s24 + $0x48] sm:$0xff] %v4321_v20 }
 0x216   : > { %2135 = vst [vmem:[%s4316_s24 + $0x40] sm:$0xff] %v4325_v31  ;;  %v2374_v24 = vpop.f32.mrb[122].mxu1  ;;  %v4331_v3 = vadd.f32 %v2709_v45, %v1775_v36 }
 0x217   : > { %v1555_v37 = vpop.f32.mrb[58].mxu0  ;;  %v4334_v61 = vadd.f32 %v4241_v32, %v2374_v24  ;;  %v1910_v59 = vpop.f32.mrb[123].mxu1 }
 0x218   : > { %v2711_v16 = vadd.f32 %v1555_v37, %v4225_v10  ;;  %v1557_v21 = vpop.f32.mrb[59].mxu0  ;;  %v4338_v57 = vadd.f32 %v4238_v13, %v1910_v59 }
 0x219   : > { %2138 = vst [vmem:[%s4316_s24 + $0x58] sm:$0xff] %v4334_v61 }
 0x21a   : > { %2137 = vst [vmem:[%s4316_s24 + $0x50] sm:$0xff] %v4338_v57  ;;  %v2377_v53 = vpop.f32.mrb[124].mxu1  ;;  %v4345_v36 = vadd.f32 %v2711_v16, %v4270_v23 }
 0x21b   : > { %v1560_v14 = vpop.f32.mrb[60].mxu0  ;;  %v4348_v32 = vadd.f32 %v4247_v8, %v2377_v53  ;;  %v1920_v39 = vpop.f32.mrb[125].mxu1 }
 0x21c   : > { %v2713_v10 = vadd.f32 %v1560_v14, %v4227_v25  ;;  %v1562_v46 = vpop.f32.mrb[61].mxu0  ;;  %v4352_v13 = vadd.f32 %v4244_v27, %v1920_v39 }
 0x21d   : > { %2140 = vst [vmem:[%s4316_s24 + $0x68] sm:$0xff] %v4348_v32 }
 0x21e   : > { %2139 = vst [vmem:[%s4316_s24 + $0x60] sm:$0xff] %v4352_v13  ;;  %v2380_v7 = vpop.f32.mrb[126].mxu1  ;;  %v4359_v23 = vadd.f32 %v2713_v10, %v4273_v17 }
 0x21f   : > { %v1565_v54 = vpop.f32.mrb[62].mxu0  ;;  %v4362_v8 = vadd.f32 %v4253_v60, %v2380_v7  ;;  %v1930_v2 = vpop.f32.mrb[127].mxu1 }
 0x220   : > { %v2715_v25 = vadd.f32 %v1565_v54, %v4229_v42  ;;  %v1567_v35 = vpop.f32.mrb[63].mxu0  ;;  %v4366_v27 = vadd.f32 %v4250_v34, %v1930_v2 }
 0x221   : > { %2142 = vst [vmem:[%s4316_s24 + $0x78] sm:$0xff] %v4362_v8 }
 0x222   : > { %2141 = vst [vmem:[%s4316_s24 + $0x70] sm:$0xff] %v4366_v27  ;;  %v2383_v17 = vpop.f32.mrb[128].mxu1  ;;  %v4373_v19 = vadd.f32 %v2715_v25, %v4278_v52 }
 0x223   : > { %v1635_v56 = vpop.f32.mrb[0].mxu0  ;;  %v4376_v60 = vadd.f32 %v4259_v51, %v2383_v17  ;;  %v1940_v15 = vpop.f32.mrb[129].mxu1 }
 0x224   : > { %v2661_v42 = vadd.f32 %v1635_v56, %v4100_v43  ;;  %v1637_v34 = vpop.f32.mrb[1].mxu0  ;;  %v4380_v45 = vadd.f32 %v4256_v49, %v1940_v15 }
 0x225   : > { %2144 = vst [vmem:[%s4316_s24 + $0x88] sm:$0xff] %v4376_v60 }
 0x226   : > { %v1861_v5 = vadd.f32 %v2661_v42, %v4287_v41  ;;  %2143 = vst [vmem:[%s4316_s24 + $0x80] sm:$0xff] %v4380_v45  ;;  %v2386_v52 = vpop.f32.mrb[130].mxu1 }
 0x227   : > { %v1640_v24 = vpop.f32.mrb[2].mxu0  ;;  %v4388_v51 = vadd.f32 %v4265_v58, %v2386_v52  ;;  %v1950_v37 = vpop.f32.mrb[131].mxu1 }
 0x228   : > { %2127 = vst [vmem:[%s4316_s24] sm:$0xff] %v1861_v5  ;;  %v2662_v43 = vadd.f32 %v1640_v24, %v4106_v44  ;;  %v1642_v59 = vpop.f32.mrb[3].mxu0  ;;  %v4393_v49 = vadd.f32 %v4262_v40, %v1950_v37  ;;  %v2057_v58 = vmul.f32 %v1861_v5, %v1861_v5 }
 0x229   : > { %2146 = vst [vmem:[%s4316_s24 + $0x98] sm:$0xff] %v4388_v51 }
 0x22a   : > { %v1866_v41 = vadd.f32 %v2662_v43, %v4283_v30  ;;  %2145 = vst [vmem:[%s4316_s24 + $0x90] sm:$0xff] %v4393_v49  ;;  %v2389_v16 = vpop.f32.mrb[132].mxu1 }
 0x22b   : > { %v1645_v21 = vpop.f32.mrb[4].mxu0  ;;  %v4401_v53 = vadd.f32 %v4275_v63, %v2389_v16  ;;  %v1960_v14 = vpop.f32.mrb[133].mxu1 }
 0x22c   : > { %v2019_v44 = vadd.f32 %v1866_v41, %v1861_v5  ;;  %v2058_v39 = vmul.f32 %v1866_v41, %v1866_v41  ;;  %2128 = vst [vmem:[%s4316_s24 + $0x8] sm:$0xff] %v1866_v41  ;;  %v2663_v40 = vadd.f32 %v1645_v21, %v4111_v38  ;;  %v1647_v10 = vpop.f32.mrb[5].mxu0  ;;  %v4406_v30 = vadd.f32 %v4268_v33, %v1960_v14 }
 0x22d   : > { %2148 = vst [vmem:[%s4316_s24 + $0xa8] sm:$0xff] %v4401_v53 }
 0x22e   : > { %v2089_v46 = vadd.f32 %v2058_v39, %v2057_v58  ;;  %v1871_v7 = vadd.f32 %v2663_v40, %v4294_v11  ;;  %2147 = vst [vmem:[%s4316_s24 + $0xa0] sm:$0xff] %v4406_v30  ;;  %v2392_v63 = vpop.f32.mrb[134].mxu1 }
 0x22f   : > { %v1650_v54 = vpop.f32.mrb[6].mxu0  ;;  %v4414_v2 = vadd.f32 %v4285_v0, %v2392_v63  ;;  %v1970_v25 = vpop.f32.mrb[135].mxu1 }
 0x230   : > { %v2020_v38 = vadd.f32 %v2019_v44, %v1871_v7  ;;  %v2059_v35 = vmul.f32 %v1871_v7, %v1871_v7  ;;  %2129 = vst [vmem:[%s4316_s24 + $0x10] sm:$0xff] %v1871_v7  ;;  %v2664_v33 = vadd.f32 %v1650_v54, %v4117_v50  ;;  %v1652_v17 = vpop.f32.mrb[7].mxu0  ;;  %v4419_v56 = vadd.f32 %v4280_v1, %v1970_v25 }
 0x231   : > { %2150 = vst [vmem:[%s4316_s24 + $0xb8] sm:$0xff] %v4414_v2 }
 0x232   : > { %v2090_v11 = vadd.f32 %v2089_v46, %v2059_v35  ;;  %v1876_v15 = vadd.f32 %v2664_v33, %v4290_v22  ;;  %2149 = vst [vmem:[%s4316_s24 + $0xb0] sm:$0xff] %v4419_v56  ;;  %v2395_v0 = vpop.f32.mrb[136].mxu1 }
 0x233   : > { %v1655_v42 = vpop.f32.mrb[8].mxu0  ;;  %v4427_v34 = vadd.f32 %v4299_v28, %v2395_v0  ;;  %v1980_v5 = vpop.f32.mrb[137].mxu1 }
 0x234   : > { %v2021_v50 = vadd.f32 %v2020_v38, %v1876_v15  ;;  %v2060_v52 = vmul.f32 %v1876_v15, %v1876_v15  ;;  %2130 = vst [vmem:[%s4316_s24 + $0x18] sm:$0xff] %v1876_v15  ;;  %v2665_v1 = vadd.f32 %v1655_v42, %v4123_v62  ;;  %v1657_v24 = vpop.f32.mrb[9].mxu0  ;;  %v4432_v37 = vadd.f32 %v4292_v48, %v1980_v5 }
 0x235   : > { %2152 = vst [vmem:[%s4316_s24 + $0xc8] sm:$0xff] %v4427_v34  ;;  %v2065_v42 = vmul.f32 %v4325_v31, %v4325_v31 }
 0x236   : > { %v2091_v22 = vadd.f32 %v2090_v11, %v2060_v52  ;;  %v1881_v43 = vadd.f32 %v2665_v1, %v4301_v47  ;;  %2151 = vst [vmem:[%s4316_s24 + $0xc0] sm:$0xff] %v4432_v37  ;;  %v2398_v28 = vpop.f32.mrb[138].mxu1 }
 0x237   : > { %v1660_v59 = vpop.f32.mrb[10].mxu0  ;;  %v4440_v41 = vadd.f32 %v4318_v6, %v2398_v28  ;;  %v1990_v16 = vpop.f32.mrb[139].mxu1 }
 0x238   : > { %v2022_v62 = vadd.f32 %v2021_v50, %v1881_v43  ;;  %v2061_v58 = vmul.f32 %v1881_v43, %v1881_v43  ;;  %2131 = vst [vmem:[%s4316_s24 + $0x20] sm:$0xff] %v1881_v43  ;;  %v2666_v48 = vadd.f32 %v1660_v59, %v4129_v29  ;;  %v1662_v21 = vpop.f32.mrb[11].mxu0  ;;  %v4445_v14 = vadd.f32 %v4306_v55, %v1990_v16 }
 0x239   : > { %2154 = vst [vmem:[%s4316_s24 + $0xd8] sm:$0xff] %v4440_v41 }
 0x23a   : > { %v2092_v47 = vadd.f32 %v2091_v22, %v2061_v58  ;;  %v1886_v44 = vadd.f32 %v2666_v48, %v4297_v9  ;;  %2153 = vst [vmem:[%s4316_s24 + $0xd0] sm:$0xff] %v4445_v14  ;;  %v2401_v6 = vpop.f32.mrb[140].mxu1  ;;  %v2068_v22 = vmul.f32 %v4334_v61, %v4334_v61 }
 0x23b   : > { %v1665_v39 = vpop.f32.mrb[12].mxu0  ;;  %v4453_v40 = vadd.f32 %v4345_v36, %v2401_v6  ;;  %v2000_v10 = vpop.f32.mrb[141].mxu1 }
 0x23c   : > { %v2023_v29 = vadd.f32 %v2022_v62, %v1886_v44  ;;  %v2062_v46 = vmul.f32 %v1886_v44, %v1886_v44  ;;  %2132 = vst [vmem:[%s4316_s24 + $0x28] sm:$0xff] %v1886_v44  ;;  %v2667_v55 = vadd.f32 %v1665_v39, %v4135_v26  ;;  %v1667_v7 = vpop.f32.mrb[13].mxu0  ;;  %v4458_v63 = vadd.f32 %v4331_v3, %v2000_v10 }
 0x23d   : > { %2156 = vst [vmem:[%s4316_s24 + $0xe8] sm:$0xff] %v4453_v40 }
 0x23e   : > { %v2093_v9 = vadd.f32 %v2092_v47, %v2062_v46  ;;  %v1891_v54 = vadd.f32 %v2667_v55, %v4308_v18  ;;  %2155 = vst [vmem:[%s4316_s24 + $0xe0] sm:$0xff] %v4458_v63  ;;  %v2404_v36 = vpop.f32.mrb[142].mxu1 }
 0x23f   : > { %v1670_v25 = vpop.f32.mrb[14].mxu0  ;;  %v4466_v38 = vadd.f32 %v4373_v19, %v2404_v36  ;;  %v2010_v26 = vpop.f32.mrb[143].mxu1 }
 0x240   : > { %v2024_v35 = vadd.f32 %v2023_v29, %v1891_v54  ;;  %v2063_v33 = vmul.f32 %v1891_v54, %v1891_v54  ;;  %2133 = vst [vmem:[%s4316_s24 + $0x30] sm:$0xff] %v1891_v54  ;;  %v2668_v3 = vadd.f32 %v1670_v25, %v4143_v4  ;;  %v1672_v17 = vpop.f32.mrb[15].mxu0  ;;  %v4471_v11 = vadd.f32 %v4359_v23, %v2010_v26 }
 0x241   : > { %2158 = vst [vmem:[%s4316_s24 + $0xf8] sm:$0xff] %v4466_v38  ;;  %v2066_v23 = vmul.f32 %v4321_v20, %v4321_v20 }
 0x242   : > { %v2094_v18 = vadd.f32 %v2093_v9, %v2063_v33  ;;  %v1896_v15 = vadd.f32 %v2668_v3, %v4304_v12  ;;  %2157 = vst [vmem:[%s4316_s24 + $0xf0] sm:$0xff] %v4471_v11  ;;  %v2067_v12 = vmul.f32 %v4338_v57, %v4338_v57 }
 0x244   : > { %v2025_v0 = vadd.f32 %v2024_v35, %v1896_v15  ;;  %v2064_v19 = vmul.f32 %v1896_v15, %v1896_v15  ;;  %2134 = vst [vmem:[%s4316_s24 + $0x38] sm:$0xff] %v1896_v15 }
 0x246   : > { %v2026_v5 = vadd.f32 %v2025_v0, %v4325_v31  ;;  %v2095_v4 = vadd.f32 %v2094_v18, %v2064_v19  ;;  %v2069_v31 = vmul.f32 %v4352_v13, %v4352_v13 }
 0x248   : > { %v2027_v50 = vadd.f32 %v2026_v5, %v4321_v20  ;;  %v2096_v52 = vadd.f32 %v2095_v4, %v2065_v42  ;;  %v2070_v20 = vmul.f32 %v4348_v32, %v4348_v32 }
 0x24a   : > { %v2028_v1 = vadd.f32 %v2027_v50, %v4338_v57  ;;  %v2097_v24 = vadd.f32 %v2096_v52, %v2066_v23  ;;  %v2071_v57 = vmul.f32 %v4366_v27, %v4366_v27 }
 0x24c   : > { %v2029_v43 = vadd.f32 %v2028_v1, %v4334_v61  ;;  %v2098_v28 = vadd.f32 %v2097_v24, %v2067_v12  ;;  %v2072_v61 = vmul.f32 %v4362_v8, %v4362_v8  ;;  %v2087_v24 = vmul.f32 %v4471_v11, %v4471_v11 }
 0x24e   : > { %v2030_v59 = vadd.f32 %v2029_v43, %v4352_v13  ;;  %v2099_v16 = vadd.f32 %v2098_v28, %v2068_v22  ;;  %v2073_v13 = vmul.f32 %v4380_v45, %v4380_v45  ;;  %v2088_v22 = vmul.f32 %v4466_v38, %v4466_v38 }
 0x250   : > { %v2031_v62 = vadd.f32 %v2030_v59, %v4348_v32  ;;  %v2100_v58 = vadd.f32 %v2099_v16, %v2069_v31  ;;  %v2074_v32 = vmul.f32 %v4376_v60, %v4376_v60 }
 0x252   : > { %v2032_v48 = vadd.f32 %v2031_v62, %v4366_v27  ;;  %v2101_v21 = vadd.f32 %v2100_v58, %v2070_v20  ;;  %v2075_v27 = vmul.f32 %v4393_v49, %v4393_v49 }
 0x254   : > { %v2033_v47 = vadd.f32 %v2032_v48, %v4362_v8  ;;  %v2102_v44 = vadd.f32 %v2101_v21, %v2071_v57  ;;  %v2076_v8 = vmul.f32 %v4388_v51, %v4388_v51 }
 0x256   : > { %v2034_v6 = vadd.f32 %v2033_v47, %v4380_v45  ;;  %v2103_v39 = vadd.f32 %v2102_v44, %v2072_v61  ;;  %v2077_v45 = vmul.f32 %v4406_v30, %v4406_v30 }
 0x258   : > { %v2035_v10 = vadd.f32 %v2034_v6, %v4376_v60  ;;  %v2104_v29 = vadd.f32 %v2103_v39, %v2073_v13  ;;  %v2078_v60 = vmul.f32 %v4401_v53, %v4401_v53 }
 0x25a   : > { %v2105_v46 = vadd.f32 %v2104_v29, %v2074_v32  ;;  %v2036_v55 = vadd.f32 %v2035_v10, %v4393_v49  ;;  %v2079_v49 = vmul.f32 %v4419_v56, %v4419_v56 }
 0x25c   : > { %v2037_v7 = vadd.f32 %v2036_v55, %v4388_v51  ;;  %v2106_v9 = vadd.f32 %v2105_v46, %v2075_v27  ;;  %v2080_v51 = vmul.f32 %v4414_v2, %v4414_v2 }
 0x25e   : > { %v2038_v54 = vadd.f32 %v2037_v7, %v4406_v30  ;;  %v2107_v36 = vadd.f32 %v2106_v9, %v2076_v8  ;;  %v2081_v30 = vmul.f32 %v4432_v37, %v4432_v37 }
 0x260   : > { %v2039_v25 = vadd.f32 %v2038_v54, %v4401_v53  ;;  %v2108_v26 = vadd.f32 %v2107_v36, %v2077_v45  ;;  %v2082_v53 = vmul.f32 %v4427_v34, %v4427_v34 }
 0x262   : > { %v2040_v35 = vadd.f32 %v2039_v25, %v4419_v56  ;;  %v2109_v33 = vadd.f32 %v2108_v26, %v2078_v60  ;;  %v2083_v56 = vmul.f32 %v4445_v14, %v4445_v14 }
 0x264   : > { %v2041_v3 = vadd.f32 %v2040_v35, %v4414_v2  ;;  %v2110_v17 = vadd.f32 %v2109_v33, %v2079_v49  ;;  %v2084_v2 = vmul.f32 %v4440_v41, %v4440_v41 }
 0x266   : > { %v2042_v18 = vadd.f32 %v2041_v3, %v4432_v37  ;;  %v2111_v15 = vadd.f32 %v2110_v17, %v2080_v51  ;;  %v2085_v37 = vmul.f32 %v4458_v63, %v4458_v63 }
 0x268   : > { %v2043_v0 = vadd.f32 %v2042_v18, %v4427_v34  ;;  %v2112_v19 = vadd.f32 %v2111_v15, %v2081_v30  ;;  %v2086_v34 = vmul.f32 %v4453_v40, %v4453_v40 }
 0x26a   : > { %v2044_v42 = vadd.f32 %v2043_v0, %v4445_v14  ;;  %v2113_v5 = vadd.f32 %v2112_v19, %v2082_v53 }
 0x26c   : > { %v2045_v4 = vadd.f32 %v2044_v42, %v4440_v41  ;;  %v2114_v23 = vadd.f32 %v2113_v5, %v2083_v56 }
 0x26e   : > { %v2046_v50 = vadd.f32 %v2045_v4, %v4458_v63  ;;  %v2115_v52 = vadd.f32 %v2114_v23, %v2084_v2 }
 0x270   : > { %v2047_v12 = vadd.f32 %v2046_v50, %v4453_v40  ;;  %v2116_v1 = vadd.f32 %v2115_v52, %v2085_v37 }
 0x272   : > { %v2048_v14 = vadd.f32 %v2047_v12, %v4471_v11  ;;  %v2117_v41 = vadd.f32 %v2116_v1, %v2086_v34 }
 0x274   : > { %v2049_v63 = vadd.f32 %v2048_v14, %v4466_v38  ;;  %v2118_v43 = vadd.f32 %v2117_v41, %v2087_v24 }
 0x276   : > { %v2050_v28 = vrot.slane %v2049_v63, 4  ;;  %v2119_v31 = vadd.f32 %v2118_v43, %v2088_v22 }
 0x278   : > { %v2051_v59 = vadd.f32 %v2050_v28, %v2049_v63  ;;  %v2120_v16 = vrot.slane %v2119_v31, 4 }
 0x27a   : > { %v2052_v40 = vrot.slane %v2051_v59, 2  ;;  %v2121_v20 = vadd.f32 %v2120_v16, %v2119_v31 }
 0x27c   : > { %v2053_v62 = vadd.f32 %v2052_v40, %v2051_v59  ;;  %v2122_v58 = vrot.slane %v2121_v20, 2 }
 0x27e   : > { %v2054_v57 = vrot.slane %v2053_v62, 1  ;;  %v2123_v48 = vadd.f32 %v2122_v58, %v2121_v20 }
 0x280   : > { %v2055_v11 = vadd.f32 %v2054_v57, %v2053_v62  ;;  %v2124_v21 = vrot.slane %v2123_v48, 1 }
 0x282   : > { %2056 = vst [vmem:[%s265_s19] sm:$0x1] %v2055_v11  ;;  %v2125_v38 = vadd.f32 %v2124_v21, %v2123_v48 }
 0x284   : > { %2126 = vst [vmem:[%s268_s22] sm:$0x1] %v2125_v38 }
 0x285 PF: > { %s17_s21 = sadd.s32 1, %s2822_s21  }
 0x286   : > { %p14_p4 = scmp.ge.s32.totalorder %s17_s21, 4  }
 0x288   :  { %16 = sbr.rel (!%p14_p4) target bundleno = 1 (0x1), region = 91 }

// kernel: residual_block_forward.4
= control target key start
LH: loop header
LB: loop body
LE: loop exit
PB: predicated region body
PF: predicated region fallthrough
CT: control target
= control target key end

     0   :  { %s2973_s21 = smov 0   ;;  %s4775_s0 = inlined_call_operand.vmem [shape: f32[2,16,16,128], index: 0, kind: input, shape index: {}]   ;;  %s4776_s1 = inlined_call_operand.vmem [shape: f32[1152,128], index: 1, kind: input, shape index: {}]   ;;  %s4777_s2 = inlined_call_operand.vmem [shape: f32[1,128], index: 2, kind: input, shape index: {}]   ;;  %s4778_s3 = inlined_call_operand.vmem [shape: f32[1,128], index: 3, kind: input, shape index: {}]   ;;  %s4779_s4 = inlined_call_operand.vmem [shape: f32[2,16,16,128], index: 4, kind: output, shape index: {0}]   ;;  %s4780_s5 = inlined_call_operand.vmem [shape: f32[2,1,128], index: 5, kind: output, shape index: {1}]   ;;  %s4781_s6 = inlined_call_operand.vmem [shape: f32[2,1,128], index: 6, kind: output, shape index: {2}]  }
   0x1 LB: > { %s2374_s22 = sadd.s32 4294967295, %s2934_s21   ;;  %p2378_p0 = scmp.ge.s32.totalorder %s2934_s21, 1  ;;  %s2934_s21 = sphi %s2973_s21, %s17_s21  }
   0x2   : > { %p217_p1 = scmp.lt.s32.totalorder %s2934_s21, 3 }
   0x4   : > { %p218_p2 = pnand %p2378_p0, %p217_p1 }
   0x6   : > { %221 = sbr.rel (%p218_p2) target bundleno = 645 (0x285), region = 36 }
   0xd   : > { %v2984_v0 = vld [vmem:[%s4776_s1] sm:$0xff]  ;;  %v2989_v1 = vld [vmem:[%s4776_s1 + $0x8] sm:$0xff]  ;;  %vm600_vm0 = vcmask 1046528   ;;  %v4782_v3 = vmov 0.0|0.0   ;;  %v3006_v6 = vld [vmem:[%s4776_s1 + $0x10] sm:$0xff]  ;;  %v2937_v8 = vmov 0.0  }
   0xe   : > { %v2994_v2 = vld [vmem:[%s4776_s1 + $0x100] sm:$0xff]  ;;  %2517 = vmatprep.subr.bf16.mxu1 %v4782_v3  ;;  %2565 = vmatprep.subr.bf16.mxu0 %v4782_v3  ;;  %v2518_v4 = vpack.c.bf16 %v2989_v1, %v2984_v0  ;;  %v893_v5 = vld [vmem:[%s4776_s1 + $0x108] sm:$0xff]  ;;  %v3011_v7 = vld [vmem:[%s4776_s1 + $0x18] sm:$0xff]  ;;  %411 = vst [vmem:[#allocation2] sm:$0xff] %v2937_v8  ;;  %v3015_v9 = vrot.slane %v2937_v8, 1  ;;  %p253_p3 = scmp.lt.s32.totalorder %s2374_s22, 1 }
   0xf   : > { %413 = vst [vmem:[#allocation2 + $0x10] sm:$0x3] %v2937_v8  ;;  %414 = vst [vmem:[#allocation2 + $0x18] sm:$0xff] %v2937_v8  ;;  %v2566_v10 = vpack.c.bf16 %v893_v5, %v2994_v2  ;;  %v894_v11 = vld [vmem:[%s4776_s1 + $0x110] sm:$0xff]  ;;  %v895_v12 = vld [vmem:[%s4776_s1 + $0x118] sm:$0xff]  ;;  %v2521_v13 = vpack.c.bf16 %v3011_v7, %v3006_v6  ;;  %vm713_vm1 = vcmask 1045504  }
  0x10   : > { %415 = vst [vmem:[#allocation2 + $0x20] sm:$0xff] %v2937_v8  ;;  %416 = vst [vmem:[#allocation2 + $0x28] sm:$0x3] %v2937_v8  ;;  %2519 = vmatpush1.bf16.msra.mxu1 %v2518_v4  ;;  %v2569_v14 = vpack.c.bf16 %v895_v12, %v894_v11  ;;  %v864_v15 = vld [vmem:[%s4776_s1 + $0x20] sm:$0xff]  ;;  %v865_v16 = vld [vmem:[%s4776_s1 + $0x28] sm:$0xff]  ;;  %1068 = vmatprep.mubr.f32.mxu1 %v3015_v9  ;;  %s4940_s22 = smov (!%p253_p3, %s2374_s22), 1 }
  0x11   : > { %417 = vst [vmem:[#allocation2 + $0x30] sm:$0xff] %v2937_v8  ;;  %418 = vst [vmem:[#allocation2 + $0x38] sm:$0xff] %v2937_v8  ;;  %2567 = vmatpush1.bf16.msra.mxu0 %v2566_v10  ;;  %2520 = vmatprep.subr.bf16.mxu1 %v4782_v3  ;;  %v896_v17 = vld [vmem:[%s4776_s1 + $0x120] sm:$0xff]  ;;  %v897_v18 = vld [vmem:[%s4776_s1 + $0x128] sm:$0xff]  ;;  %v2524_v19 = vpack.c.bf16 %v865_v16, %v864_v15  ;;  %s2387_s17 = sshll.u32 %s4940_s22, 8  ;;  %s265_s9 = scalar_lea.vmem %s4780_s5, %s4940_s22 }
  0x12   : > { %419 = vst [vmem:[#allocation2 + $0x40] sm:$0x3] %v2937_v8  ;;  %420 = vst [vmem:[#allocation2 + $0x48] sm:$0xff] %v2937_v8  ;;  %2568 = vmatprep.subr.bf16.mxu0 %v4782_v3  ;;  %v2572_v20 = vpack.c.bf16 %v897_v18, %v896_v17  ;;  %v866_v21 = vld [vmem:[%s4776_s1 + $0x30] sm:$0xff]  ;;  %v867_v22 = vld [vmem:[%s4776_s1 + $0x38] sm:$0xff]  ;;  %s3145_s30 = scalar_lea.vmem %s4775_s0, %s2387_s17  ;;  %s4529_s7 = scalar_lea.vmem %s4779_s4, %s2387_s17 }
  0x13   : > { %421 = vst [vmem:[#allocation2 + $0x50] sm:$0xff] %v2937_v8  ;;  %422 = vst [vmem:[#allocation2 + $0x58] sm:$0x3] %v2937_v8  ;;  %v898_v23 = vld [vmem:[%s4776_s1 + $0x130] sm:$0xff]  ;;  %v899_v24 = vld [vmem:[%s4776_s1 + $0x138] sm:$0xff]  ;;  %v2527_v25 = vpack.c.bf16 %v867_v22, %v866_v21  ;;  %s268_s12 = scalar_lea.vmem %s4781_s6, %s4940_s22 }
  0x14   : > { %423 = vst [vmem:[#allocation2 + $0x60] sm:$0xff] %v2937_v8  ;;  %424 = vst [vmem:[#allocation2 + $0x68] sm:$0xff] %v2937_v8  ;;  %2522 = vmatpush1.bf16.msra.mxu1 %v2521_v13  ;;  %v2575_v26 = vpack.c.bf16 %v899_v24, %v898_v23  ;;  %v868_v27 = vld [vmem:[%s4776_s1 + $0x40] sm:$0xff]  ;;  %v869_v28 = vld [vmem:[%s4776_s1 + $0x48] sm:$0xff] }
  0x15   : > { %425 = vst [vmem:[#allocation2 + $0x70] sm:$0x3] %v2937_v8  ;;  %426 = vst [vmem:[#allocation2 + $0x78] sm:$0xff] %v2937_v8  ;;  %2570 = vmatpush1.bf16.msra.mxu0 %v2569_v14  ;;  %2523 = vmatprep.subr.bf16.mxu1 %v4782_v3  ;;  %v900_v29 = vld [vmem:[%s4776_s1 + $0x140] sm:$0xff]  ;;  %v901_v30 = vld [vmem:[%s4776_s1 + $0x148] sm:$0xff]  ;;  %v2530_v31 = vpack.c.bf16 %v869_v28, %v868_v27 }
  0x16   : > { %427 = vst [vmem:[#allocation2 + $0x80] sm:$0xff] %v2937_v8  ;;  %428 = vst [vmem:[#allocation2 + $0x88] sm:$0x3] %v2937_v8  ;;  %2571 = vmatprep.subr.bf16.mxu0 %v4782_v3  ;;  %v2578_v32 = vpack.c.bf16 %v901_v30, %v900_v29  ;;  %v870_v33 = vld [vmem:[%s4776_s1 + $0x50] sm:$0xff]  ;;  %v871_v34 = vld [vmem:[%s4776_s1 + $0x58] sm:$0xff] }
  0x17   : > { %429 = vst [vmem:[#allocation2 + $0x90] sm:$0xff] %v2937_v8  ;;  %430 = vst [vmem:[#allocation2 + $0x98] sm:$0xff] %v2937_v8  ;;  %v902_v35 = vld [vmem:[%s4776_s1 + $0x150] sm:$0xff]  ;;  %v903_v36 = vld [vmem:[%s4776_s1 + $0x158] sm:$0xff]  ;;  %v2533_v37 = vpack.c.bf16 %v871_v34, %v870_v33 }
  0x18   : > { %431 = vst [vmem:[#allocation2 + $0xa0] sm:$0x3] %v2937_v8  ;;  %432 = vst [vmem:[#allocation2 + $0xa8] sm:$0xff] %v2937_v8  ;;  %2525 = vmatpush1.bf16.msra.mxu1 %v2524_v19  ;;  %v2581_v38 = vpack.c.bf16 %v903_v36, %v902_v35  ;;  %v872_v39 = vld [vmem:[%s4776_s1 + $0x60] sm:$0xff]  ;;  %v873_v40 = vld [vmem:[%s4776_s1 + $0x68] sm:$0xff] }
  0x19   : > { %433 = vst [vmem:[#allocation2 + $0xb0] sm:$0xff] %v2937_v8  ;;  %434 = vst [vmem:[#allocation2 + $0xb8] sm:$0x3] %v2937_v8  ;;  %2573 = vmatpush1.bf16.msra.mxu0 %v2572_v20  ;;  %2526 = vmatprep.subr.bf16.mxu1 %v4782_v3  ;;  %v904_v41 = vld [vmem:[%s4776_s1 + $0x160] sm:$0xff]  ;;  %v905_v42 = vld [vmem:[%s4776_s1 + $0x168] sm:$0xff]  ;;  %v2536_v47 = vpack.c.bf16 %v873_v40, %v872_v39 }
  0x1a   : > { %435 = vst [vmem:[#allocation2 + $0xc0] sm:$0xff] %v2937_v8  ;;  %436 = vst [vmem:[#allocation2 + $0xc8] sm:$0xff] %v2937_v8  ;;  %2574 = vmatprep.subr.bf16.mxu0 %v4782_v3  ;;  %v269_v43 = vld [vmem:[%s3145_s30] sm:$0xff]  ;;  %v270_v48 = vld [vmem:[%s3145_s30 + $0x8] sm:$0xff]  ;;  %v2584_v50 = vpack.c.bf16 %v905_v42, %v904_v41 }
  0x1b   : > { %437 = vst [vmem:[#allocation2 + $0xd0] sm:$0x3] %v2937_v8  ;;  %438 = vst [vmem:[#allocation2 + $0xd8] sm:$0xff] %v2937_v8  ;;  %v3165_v44 = vld [vmem:[%s4777_s2] ss:$0 sm:$0xff]  ;;  %v271_v49 = vld [vmem:[%s3145_s30 + $0x10] sm:$0xff] }
  0x1c   : > { %439 = vst [vmem:[#allocation2 + $0xe0] sm:$0xff] %v2937_v8  ;;  %440 = vst [vmem:[#allocation2 + $0xe8] sm:$0x3] %v2937_v8  ;;  %2528 = vmatpush1.bf16.msra.mxu1 %v2527_v25  ;;  %v3170_v45 = vld [vmem:[%s4778_s3] ss:$0 sm:$0xff]  ;;  %v309_v46 = vmul.f32 %v3165_v44, %v269_v43  ;;  %v874_v51 = vld [vmem:[%s4776_s1 + $0x70] sm:$0xff]  ;;  %v310_v54 = vmul.f32 %v3165_v44, %v270_v48  ;;  %v311_v58 = vmul.f32 %v3165_v44, %v271_v49 }
  0x1d   : > { %441 = vst [vmem:[#allocation2 + $0xf0] sm:$0xff] %v2937_v8  ;;  %442 = vst [vmem:[#allocation2 + $0xf8] sm:$0xff] %v2937_v8  ;;  %2576 = vmatpush1.bf16.msra.mxu0 %v2575_v26  ;;  %2529 = vmatprep.subr.bf16.mxu1 %v4782_v3  ;;  %v875_v52 = vld [vmem:[%s4776_s1 + $0x78] sm:$0xff]  ;;  %v906_v56 = vld [vmem:[%s4776_s1 + $0x170] sm:$0xff] }
  0x1e   : > { %443 = vst [vmem:[#allocation2 + $0x100] sm:$0x3] %v2937_v8  ;;  %444 = vst [vmem:[#allocation2 + $0x108] sm:$0xff] %v2937_v8  ;;  %2577 = vmatprep.subr.bf16.mxu0 %v4782_v3  ;;  %v347_v53 = vadd.f32 %v3170_v45, %v309_v46  ;;  %v272_v55 = vld [vmem:[%s3145_s30 + $0x18] sm:$0xff]  ;;  %v273_v60 = vld [vmem:[%s3145_s30 + $0x20] sm:$0xff]  ;;  %v348_v63 = vadd.f32 %v3170_v45, %v310_v54  ;;  %v2539_v2 = vpack.c.bf16 %v875_v52, %v874_v51 }
  0x1f   : > { %445 = vst [vmem:[#allocation2 + $0x110] sm:$0xff] %v2937_v8  ;;  %446 = vst [vmem:[#allocation2 + $0x118] sm:$0x3] %v2937_v8  ;;  %v907_v57 = vld [vmem:[%s4776_s1 + $0x178] sm:$0xff]  ;;  %v312_v59 = vmul.f32 %v3165_v44, %v272_v55  ;;  %v876_v61 = vld [vmem:[%s4776_s1 + $0x80] sm:$0xff]  ;;  %v349_v5 = vadd.f32 %v3170_v45, %v311_v58  ;;  %v313_v7 = vmul.f32 %v3165_v44, %v273_v60 }
  0x20   : > { %447 = vst [vmem:[#allocation2 + $0x120] sm:$0xff] %v2937_v8  ;;  %448 = vst [vmem:[#allocation2 + $0x128] sm:$0xff] %v2937_v8  ;;  %2531 = vmatpush1.bf16.msra.mxu1 %v2530_v31  ;;  %v379_v62 = vmax.f32 %v347_v53, 0.0  ;;  %v274_v0 = vld [vmem:[%s3145_s30 + $0x28] sm:$0xff]  ;;  %v275_v1 = vld [vmem:[%s3145_s30 + $0x30] sm:$0xff]  ;;  %v2587_v12 = vpack.c.bf16 %v907_v57, %v906_v56  ;;  %v380_v13 = vmax.f32 %v348_v63, 0.0 }
  0x21   : > { %449 = vst [vmem:[#allocation2 + $0x130] sm:$0x3] %v2937_v8  ;;  %450 = vst [vmem:[#allocation2 + $0x138] sm:$0xff] %v2937_v8  ;;  %2579 = vmatpush1.bf16.msra.mxu0 %v2578_v32  ;;  %2532 = vmatprep.subr.bf16.mxu1 %v4782_v3  ;;  %v877_v4 = vld [vmem:[%s4776_s1 + $0x88] sm:$0xff]  ;;  %v350_v6 = vadd.f32 %v3170_v45, %v312_v59  ;;  %v276_v10 = vld [vmem:[%s3145_s30 + $0x38] sm:$0xff]  ;;  %v314_v14 = vmul.f32 %v3165_v44, %v274_v0  ;;  %v381_v19 = vmax.f32 %v349_v5, 0.0 }
  0x22   : > { %451 = vst [vmem:[#allocation2 + $0x140] sm:$0xff] %v2937_v8  ;;  %452 = vst [vmem:[#allocation2 + $0x148] sm:$0x3] %v2937_v8  ;;  %2580 = vmatprep.subr.bf16.mxu0 %v4782_v3  ;;  %v277_v11 = vld [vmem:[%s3145_s30 + $0x40] sm:$0xff]  ;;  %v315_v15 = vmul.f32 %v3165_v44, %v275_v1  ;;  %v278_v16 = vld [vmem:[%s3145_s30 + $0x48] sm:$0xff]  ;;  %v351_v21 = vadd.f32 %v3170_v45, %v313_v7  ;;  %v316_v22 = vmul.f32 %v3165_v44, %v276_v10 }
  0x23   : > { %453 = vst [vmem:[#allocation2 + $0x150] sm:$0xff] %v2937_v8  ;;  %454 = vst [vmem:[#allocation2 + $0x158] sm:$0xff] %v2937_v8  ;;  %v908_v17 = vld [vmem:[%s4776_s1 + $0x180] sm:$0xff]  ;;  %v909_v18 = vld [vmem:[%s4776_s1 + $0x188] sm:$0xff]  ;;  %v382_v20 = vmax.f32 %v350_v6, 0.0  ;;  %v2542_v24 = vpack.c.bf16 %v877_v4, %v876_v61  ;;  %v352_v25 = vadd.f32 %v3170_v45, %v314_v14  ;;  %v317_v27 = vmul.f32 %v3165_v44, %v277_v11 }
  0x24   : > { %455 = vst [vmem:[#allocation2 + $0x160] sm:$0x3] %v2937_v8  ;;  %456 = vst [vmem:[#allocation2 + $0x168] sm:$0xff] %v2937_v8  ;;  %2534 = vmatpush1.bf16.msra.mxu1 %v2533_v37  ;;  %v279_v23 = vld [vmem:[%s3145_s30 + $0x50] sm:$0xff]  ;;  %v353_v26 = vadd.f32 %v3170_v45, %v315_v15  ;;  %v280_v28 = vld [vmem:[%s3145_s30 + $0x58] sm:$0xff]  ;;  %v383_v29 = vmax.f32 %v351_v21, 0.0  ;;  %v354_v30 = vadd.f32 %v3170_v45, %v316_v22 }
  0x25   : > { %457 = vst [vmem:[#allocation2 + $0x170] sm:$0xff] %v2937_v8  ;;  %458 = vst [vmem:[#allocation2 + $0x178] sm:$0x3] %v2937_v8  ;;  %2582 = vmatpush1.bf16.msra.mxu0 %v2581_v38  ;;  %2535 = vmatprep.subr.bf16.mxu1 %v4782_v3  ;;  %v318_v31 = vmul.f32 %v3165_v44, %v278_v16  ;;  %v319_v32 = vmul.f32 %v3165_v44, %v279_v23  ;;  %v878_v34 = vld [vmem:[%s4776_s1 + $0x90] sm:$0xff]  ;;  %v879_v35 = vld [vmem:[%s4776_s1 + $0x98] sm:$0xff]  ;;  %v384_v36 = vmax.f32 %v352_v25, 0.0 }
  0x26   : > { %459 = vst [vmem:[#allocation2 + $0x180] sm:$0xff] %v2937_v8  ;;  %460 = vst [vmem:[#allocation2 + $0x188] sm:$0xff] %v2937_v8  ;;  %2583 = vmatprep.subr.bf16.mxu0 %v4782_v3  ;;  %v2590_v33 = vpack.c.bf16 %v909_v18, %v908_v17  ;;  %v385_v37 = vmax.f32 %v353_v26, 0.0  ;;  %v355_v38 = vadd.f32 %v3170_v45, %v317_v27  ;;  %v910_v39 = vld [vmem:[%s4776_s1 + $0x190] sm:$0xff]  ;;  %v911_v40 = vld [vmem:[%s4776_s1 + $0x198] sm:$0xff]  ;;  %v386_v41 = vmax.f32 %v354_v30, 0.0 }
  0x27   : > { %461 = vst [vmem:[#allocation2 + $0x190] sm:$0x3] %v2937_v8  ;;  %464 = vst [vmem:[#allocation2 + $0x1a8] sm:$0x3] %v2937_v8  ;;  %v356_v42 = vadd.f32 %v3170_v45, %v318_v31  ;;  %v357_v43 = vadd.f32 %v3170_v45, %v319_v32  ;;  %v320_v46 = vmul.f32 %v3165_v44, %v280_v28  ;;  %v880_v54 = vld [vmem:[%s4776_s1 + $0xa0] sm:$0xff]  ;;  %v881_v55 = vld [vmem:[%s4776_s1 + $0xa8] sm:$0xff] }
  0x28   : > { %2537 = vmatpush1.bf16.msra.mxu1 %v2536_v47  ;;  %466 = vst [vmem:[#allocation2 + $0x19] sm:$0xff] %v379_v62  ;;  %467 = vst [vmem:[#allocation2 + $0x21] sm:$0xff] %v380_v13  ;;  %v387_v47 = vmax.f32 %v355_v38, 0.0  ;;  %v2545_v48 = vpack.c.bf16 %v879_v35, %v878_v34  ;;  %v2593_v53 = vpack.c.bf16 %v911_v40, %v910_v39  ;;  %v912_v56 = vld [vmem:[%s4776_s1 + $0x1a0] sm:$0xff]  ;;  %v913_v57 = vld [vmem:[%s4776_s1 + $0x1a8] sm:$0xff] }
  0x29   : > { %2585 = vmatpush1.bf16.msra.mxu0 %v2584_v50  ;;  %2538 = vmatprep.subr.bf16.mxu1 %v4782_v3  ;;  %468 = vst [vmem:[#allocation2 + $0x31] sm:$0xff] %v381_v19  ;;  %469 = vst [vmem:[#allocation2 + $0x39] sm:$0xff] %v382_v20  ;;  %v388_v50 = vmax.f32 %v356_v42, 0.0  ;;  %v389_v51 = vmax.f32 %v357_v43, 0.0  ;;  %v358_v52 = vadd.f32 %v3170_v45, %v320_v46  ;;  %v281_v60 = vld [vmem:[%s3145_s30 + $0x60] sm:$0xff]  ;;  %v882_v62 = vld [vmem:[%s4776_s1 + $0xb0] sm:$0xff] }
  0x2a   : > { %2586 = vmatprep.subr.bf16.mxu0 %v4782_v3  ;;  %470 = vst [vmem:[#allocation2 + $0x49] sm:$0xff] %v383_v29  ;;  %471 = vst [vmem:[#allocation2 + $0x51] sm:$0xff] %v384_v36  ;;  %v2548_v59 = vpack.c.bf16 %v881_v55, %v880_v54  ;;  %v2596_v61 = vpack.c.bf16 %v913_v57, %v912_v56  ;;  %v883_v63 = vld [vmem:[%s4776_s1 + $0xb8] sm:$0xff]  ;;  %v282_v0 = vld [vmem:[%s3145_s30 + $0x68] sm:$0xff]  ;;  %v321_v4 = vmul.f32 %v3165_v44, %v281_v60 }
  0x2b   : > { %472 = vst [vmem:[#allocation2 + $0x61] sm:$0xff] %v385_v37  ;;  %473 = vst [vmem:[#allocation2 + $0x69] sm:$0xff] %v386_v41  ;;  %v390_v58 = vmax.f32 %v358_v52, 0.0  ;;  %v914_v1 = vld [vmem:[%s4776_s1 + $0x1b0] sm:$0xff]  ;;  %v2551_v5 = vpack.c.bf16 %v883_v63, %v882_v62  ;;  %v322_v6 = vmul.f32 %v3165_v44, %v282_v0  ;;  %v884_v10 = vld [vmem:[%s4776_s1 + $0xc0] sm:$0xff]  ;;  %v714_v0 = vrot.slane %v2937_v8, 2 }
  0x2c   : > { %2540 = vmatpush1.bf16.msra.mxu1 %v2539_v2  ;;  %474 = vst [vmem:[#allocation2 + $0x79] sm:$0xff] %v387_v47  ;;  %475 = vst [vmem:[#allocation2 + $0x81] sm:$0xff] %v388_v50  ;;  %v915_v2 = vld [vmem:[%s4776_s1 + $0x1b8] sm:$0xff]  ;;  %v885_v11 = vld [vmem:[%s4776_s1 + $0xc8] sm:$0xff]  ;;  %v359_v15 = vadd.f32 %v3170_v45, %v321_v4 }
  0x2d   : > { %2588 = vmatpush1.bf16.msra.mxu0 %v2587_v12  ;;  %2541 = vmatprep.subr.bf16.mxu1 %v4782_v3  ;;  %476 = vst [vmem:[#allocation2 + $0x91] sm:$0xff] %v389_v51  ;;  %477 = vst [vmem:[#allocation2 + $0x99] sm:$0xff] %v390_v58  ;;  %v2599_v7 = vpack.c.bf16 %v915_v2, %v914_v1  ;;  %v916_v12 = vld [vmem:[%s4776_s1 + $0x1c0] sm:$0xff]  ;;  %v917_v13 = vld [vmem:[%s4776_s1 + $0x1c8] sm:$0xff]  ;;  %v2554_v16 = vpack.c.bf16 %v885_v11, %v884_v10 }
  0x2e   : > { %2589 = vmatprep.subr.bf16.mxu0 %v4782_v3  ;;  %v283_v14 = vld [vmem:[%s3145_s30 + $0x70] sm:$0xff]  ;;  %v360_v18 = vadd.f32 %v3170_v45, %v322_v6  ;;  %v2602_v19 = vpack.c.bf16 %v917_v13, %v916_v12  ;;  %v887_v20 = vld [vmem:[%s4776_s1 + $0xd8] sm:$0xff]  ;;  %v285_v25 = vld [vmem:[%s3145_s30 + $0x80] sm:$0xff]  ;;  %v391_v26 = vmax.f32 %v359_v15, 0.0 }
  0x2f   : > { %v3248_v49 = vld [vmem:[#allocation2 + $0x18] sm:$0xff]  ;;  %v886_v17 = vld [vmem:[%s4776_s1 + $0xd0] sm:$0xff]  ;;  %v323_v23 = vmul.f32 %v3165_v44, %v283_v14  ;;  %v888_v29 = vld [vmem:[%s4776_s1 + $0xe0] sm:$0xff]  ;;  %v325_v36 = vmul.f32 %v3165_v44, %v285_v25 }
  0x30   : > { %2543 = vmatpush1.bf16.msra.mxu1 %v2542_v24  ;;  %1293 = vmatprep.mubr.f32.mxu0 %v3248_v49  ;;  %v918_v21 = vld [vmem:[%s4776_s1 + $0x1d0] sm:$0xff]  ;;  %v919_v22 = vld [vmem:[%s4776_s1 + $0x1d8] sm:$0xff]  ;;  %v2557_v27 = vpack.c.bf16 %v887_v20, %v886_v17  ;;  %v889_v30 = vld [vmem:[%s4776_s1 + $0xe8] sm:$0xff]  ;;  %v392_v32 = vmax.f32 %v360_v18, 0.0  ;;  %478 = vst [vmem:[#allocation2 + $0xa9] sm:$0xff] %v391_v26  ;;  %v606_v26 = vrot.slane %v3248_v49, 1 }
  0x31   : > { %2591 = vmatpush1.bf16.msra.mxu0 %v2590_v33  ;;  %2544 = vmatprep.subr.bf16.mxu1 %v4782_v3  ;;  %v284_v24 = vld [vmem:[%s3145_s30 + $0x78] sm:$0xff]  ;;  %v2605_v28 = vpack.c.bf16 %v919_v22, %v918_v21  ;;  %v920_v31 = vld [vmem:[%s4776_s1 + $0x1e0] sm:$0xff]  ;;  %v921_v33 = vld [vmem:[%s4776_s1 + $0x1e8] sm:$0xff]  ;;  %v361_v34 = vadd.f32 %v3170_v45, %v323_v23  ;;  %v363_v43 = vadd.f32 %v3170_v45, %v325_v36 }
  0x32   : > { %2592 = vmatprep.subr.bf16.mxu0 %v4782_v3  ;;  %v324_v35 = vmul.f32 %v3165_v44, %v284_v24  ;;  %v286_v37 = vld [vmem:[%s3145_s30 + $0x88] sm:$0xff]  ;;  %v287_v38 = vld [vmem:[%s3145_s30 + $0x90] sm:$0xff]  ;;  %479 = vst [vmem:[#allocation2 + $0xb1] sm:$0xff] %v392_v32  ;;  %v288_v39 = vld [vmem:[%s3145_s30 + $0x98] sm:$0xff]  ;;  %v2560_v46 = vpack.c.bf16 %v889_v30, %v888_v29  ;;  %v2608_v47 = vpack.c.bf16 %v921_v33, %v920_v31 }
  0x33   : > { %v289_v40 = vld [vmem:[%s3145_s30 + $0xa0] sm:$0xff]  ;;  %v393_v41 = vmax.f32 %v361_v34, 0.0  ;;  %v327_v50 = vmul.f32 %v3165_v44, %v287_v38  ;;  %v290_v51 = vld [vmem:[%s3145_s30 + $0xa8] sm:$0xff]  ;;  %v890_v52 = vld [vmem:[%s4776_s1 + $0xf0] sm:$0xff]  ;;  %v395_v55 = vmax.f32 %v363_v43, 0.0  ;;  %v328_v56 = vmul.f32 %v3165_v44, %v288_v39 }
  0x34   : > { %2546 = vmatpush1.bf16.msra.mxu1 %v2545_v48  ;;  %v362_v42 = vadd.f32 %v3170_v45, %v324_v35  ;;  %v326_v48 = vmul.f32 %v3165_v44, %v286_v37  ;;  %v329_v57 = vmul.f32 %v3165_v44, %v289_v40  ;;  %v291_v58 = vld [vmem:[%s3145_s30 + $0xb0] sm:$0xff]  ;;  %v923_v60 = vld [vmem:[%s4776_s1 + $0x1f8] sm:$0xff]  ;;  %v330_v4 = vmul.f32 %v3165_v44, %v290_v51  ;;  %v924_v12 = vld [vmem:[%s4776_s1 + $0x200] sm:$0xff] }
  0x35   : > { %2594 = vmatpush1.bf16.msra.mxu0 %v2593_v53  ;;  %2547 = vmatprep.subr.bf16.mxu1 %v4782_v3  ;;  %v891_v53 = vld [vmem:[%s4776_s1 + $0xf8] sm:$0xff]  ;;  %480 = vst [vmem:[#allocation2 + $0xc1] sm:$0xff] %v393_v41  ;;  %v365_v63 = vadd.f32 %v3170_v45, %v327_v50  ;;  %482 = vst [vmem:[#allocation2 + $0xd9] sm:$0xff] %v395_v55  ;;  %v366_v1 = vadd.f32 %v3170_v45, %v328_v56  ;;  %v925_v13 = vld [vmem:[%s4776_s1 + $0x208] sm:$0xff]  ;;  %v719_v37 = vrot.slane %v3248_v49, 2 }
  0x36   : > { %2595 = vmatprep.subr.bf16.mxu0 %v4782_v3  ;;  %v394_v54 = vmax.f32 %v362_v42, 0.0  ;;  %v364_v62 = vadd.f32 %v3170_v45, %v326_v48  ;;  %v367_v2 = vadd.f32 %v3170_v45, %v329_v57  ;;  %v331_v10 = vmul.f32 %v3165_v44, %v291_v58  ;;  %v3377_v17 = vld [vmem:[#allocation2 + $0x20] sm:$0xff]  ;;  %v927_v29 = vld [vmem:[%s4776_s1 + $0x218] sm:$0xff]  ;;  %v958_v34 = vld [vmem:[%s4776_s1 + $0x310] sm:$0xff] }
  0x37   : > { %v398_v15 = vmax.f32 %v366_v1, 0.0  ;;  %v956_v18 = vld [vmem:[%s4776_s1 + $0x300] sm:$0xff]  ;;  %v2614_v23 = vpack.c.bf16 %v925_v13, %v924_v12  ;;  %v292_v31 = vld [vmem:[%s3145_s30 + $0xb8] sm:$0xff]  ;;  %v720_v41 = vrot.slane %v3377_v17, 2  ;;  %v3427_v48 = vld [vmem:[#allocation2 + $0x30] sm:$0xff] }
  0x38   : > { %2549 = vmatpush1.bf16.msra.mxu1 %v2548_v59  ;;  %v922_v59 = vld [vmem:[%s4776_s1 + $0x1f0] sm:$0xff]  ;;  %481 = vst [vmem:[#allocation2 + $0xc9] sm:$0xff] %v394_v54  ;;  %v396_v6 = vmax.f32 %v364_v62, 0.0  ;;  %v399_v20 = vmax.f32 %v367_v2, 0.0  ;;  %v369_v22 = vadd.f32 %v3170_v45, %v331_v10  ;;  %v293_v33 = vld [vmem:[%s3145_s30 + $0xc0] sm:$0xff]  ;;  %v959_v35 = vld [vmem:[%s4776_s1 + $0x318] sm:$0xff]  ;;  %v332_v39 = vmul.f32 %v3165_v44, %v292_v31 }
  0x39   : > { %2597 = vmatpush1.bf16.msra.mxu0 %v2596_v61  ;;  %2550 = vmatprep.subr.bf16.mxu1 %v4782_v3  ;;  %v500_v61 = vld [vmem:[#allocation2 + $0x10] sm:$0x3]  ;;  %v2611_v11 = vpack.c.bf16 %v923_v60, %v922_v59  ;;  %485 = vst [vmem:[#allocation2 + $0xf9] sm:$0xff] %v398_v15  ;;  %v928_v43 = vld [vmem:[%s4776_s1 + $0x220] sm:$0xff]  ;;  %v3430_v50 = vld [vmem:[#allocation2 + $0x38] sm:$0xff]  ;;  %v3433_v51 = vpack.c.bf16 %v959_v35, %v958_v34  ;;  %v611_v55 = vrot.slane %v3427_v48, 1 }
  0x3a   : > { %2598 = vmatprep.subr.bf16.mxu0 %v4782_v3  ;;  %v604_v14 = vrot.slane %v500_v61, 1  ;;  %483 = vst [vmem:[#allocation2 + $0xe1] sm:$0xff] %v396_v6  ;;  %v717_v24 = vrot.slane %v500_v61, 2  ;;  %486 = vst [vmem:[#allocation2 + $0x109] sm:$0xff] %v399_v20  ;;  %v401_v30 = vmax.f32 %v369_v22, 0.0  ;;  %v3449_v57 = vsel %vm713_vm1, %v719_v37, %v720_v41  ;;  %v930_v61 = vld [vmem:[%s4776_s1 + $0x230] sm:$0xff] }
  0x3b   : > { %v612_v59 = vrot.slane %v3430_v50, 1  ;;  %v3455_v60 = vld [vmem:[#allocation2 + $0x40] sm:$0x3]  ;;  %v3473_v1 = vld [vmem:[%s4776_s1 + $0x248] sm:$0xff]  ;;  %v962_v6 = vld [vmem:[%s4776_s1 + $0x330] sm:$0xff] }
  0x3c   : > { %2552 = vmatpush1.bf16.msra.mxu1 %v2551_v5  ;;  %v2563_v5 = vpack.c.bf16 %v891_v53, %v890_v52  ;;  %v605_v25 = vsel %vm600_vm0, %v3015_v9, %v604_v14  ;;  %v3399_v9 = vld [vmem:[#allocation2 + $0x28] sm:$0x3]  ;;  %488 = vst [vmem:[#allocation2 + $0x121] sm:$0xff] %v401_v30  ;;  %v718_v36 = vsel %vm713_vm1, %v714_v0, %v717_v24  ;;  %v960_v52 = vld [vmem:[%s4776_s1 + $0x320] sm:$0xff]  ;;  %v3500_v12 = vld [vmem:[%s4776_s1 + $0x258] sm:$0xff] }
  0x3d   : > { %2600 = vmatpush1.bf16.msra.mxu0 %v2599_v7  ;;  %2553 = vmatprep.subr.bf16.mxu1 %v4782_v3  ;;  %v397_v7 = vmax.f32 %v365_v63, 0.0  ;;  %v609_v42 = vrot.slane %v3399_v9, 1  ;;  %v961_v53 = vld [vmem:[%s4776_s1 + $0x328] sm:$0xff]  ;;  %v722_v54 = vrot.slane %v3399_v9, 2  ;;  %v931_v63 = vld [vmem:[%s4776_s1 + $0x238] sm:$0xff]  ;;  %v295_v14 = vld [vmem:[%s3145_s30 + $0xd0] sm:$0xff] }
  0x3e   : > { %2601 = vmatprep.subr.bf16.mxu0 %v4782_v3  ;;  %v3476_v2 = vpack.c.bf16 %v961_v53, %v960_v52  ;;  %v294_v10 = vld [vmem:[%s3145_s30 + $0xc8] sm:$0xff]  ;;  %v296_v20 = vld [vmem:[%s3145_s30 + $0xd8] sm:$0xff]  ;;  %v3513_v22 = vld [vmem:[#allocation2 + $0x50] sm:$0xff] }
  0x3f   : > { %484 = vst [vmem:[#allocation2 + $0xf1] sm:$0xff] %v397_v7  ;;  %v963_v7 = vld [vmem:[%s4776_s1 + $0x338] sm:$0xff]  ;;  %v3505_v15 = vsel %vm713_vm1, %v720_v41, %v722_v54  ;;  %v964_v30 = vld [vmem:[%s4776_s1 + $0x340] sm:$0xff]  ;;  %v965_v31 = vld [vmem:[%s4776_s1 + $0x348] sm:$0xff] }
  0x40   : > { %2555 = vmatpush1.bf16.msra.mxu1 %v2554_v16  ;;  %v368_v16 = vadd.f32 %v3170_v45, %v330_v4  ;;  %v724_v4 = vrot.slane %v3427_v48, 2  ;;  %v3519_v24 = vpack.c.bf16 %v963_v7, %v962_v6  ;;  %v298_v9 = vld [vmem:[%s3145_s30 + $0xe8] sm:$0xff]  ;;  %v299_v37 = vld [vmem:[%s3145_s30 + $0xf0] sm:$0xff]  ;;  %v3551_v41 = vld [vmem:[#allocation2 + $0x58] sm:$0x3] }
  0x41   : > { %2603 = vmatpush1.bf16.msra.mxu0 %v2602_v19  ;;  %2556 = vmatprep.subr.bf16.mxu1 %v4782_v3  ;;  %v957_v19 = vld [vmem:[%s4776_s1 + $0x308] sm:$0xff]  ;;  %v338_v53 = vmul.f32 %v3165_v44, %v298_v9  ;;  %v300_v54 = vld [vmem:[%s3145_s30 + $0xf8] sm:$0xff] }
  0x42   : > { %2604 = vmatprep.subr.bf16.mxu0 %v4782_v3  ;;  %v400_v21 = vmax.f32 %v368_v16, 0.0  ;;  %v3401_v32 = vpack.c.bf16 %v957_v19, %v956_v18  ;;  %v3508_v16 = vsel %vm600_vm0, %v611_v55, %v612_v59  ;;  %v2623_v18 = vpack.c.bf16 %v931_v63, %v930_v61 }
  0x43   : > { %v339_v61 = vmul.f32 %v3165_v44, %v299_v37 }
  0x44   : > { %2558 = vmatpush1.bf16.msra.mxu1 %v2557_v27  ;;  %v607_v27 = vrot.slane %v3377_v17, 1  ;;  %487 = vst [vmem:[#allocation2 + $0x111] sm:$0xff] %v400_v21  ;;  %v3511_v21 = vld [vmem:[#allocation2 + $0x48] sm:$0xff] }
  0x45   : > { %2606 = vmatpush1.bf16.msra.mxu0 %v2605_v28  ;;  %2559 = vmatprep.subr.bf16.mxu1 %v4782_v3  ;;  %v926_v28 = vld [vmem:[%s4776_s1 + $0x210] sm:$0xff]  ;;  %v616_v34 = vrot.slane %v3511_v21, 1  ;;  %v377_v7 = vadd.f32 %v3170_v45, %v339_v61 }
  0x46   : > { %2607 = vmatprep.subr.bf16.mxu0 %v4782_v3  ;;  %v2617_v38 = vpack.c.bf16 %v927_v29, %v926_v28  ;;  %v3416_v40 = vsel %vm600_vm0, %v606_v26, %v607_v27  ;;  %v3452_v58 = vsel %vm600_vm0, %v607_v27, %v609_v42  ;;  %v297_v26 = vld [vmem:[%s3145_s30 + $0xe0] sm:$0xff]  ;;  %v727_v28 = vrot.slane %v3455_v60, 2 }
  0x48   : > { %2561 = vmatpush1.bf16.msra.mxu1 %v2560_v46  ;;  %v929_v46 = vld [vmem:[%s4776_s1 + $0x228] sm:$0xff] }
  0x49   : > { %2609 = vmatpush1.bf16.msra.mxu0 %v2608_v47  ;;  %2562 = vmatprep.subr.bf16.mxu1 %v4782_v3  ;;  %v333_v47 = vmul.f32 %v3165_v44, %v293_v33  ;;  %v2620_v56 = vpack.c.bf16 %v929_v46, %v928_v43  ;;  %v337_v43 = vmul.f32 %v3165_v44, %v297_v26 }
  0x4a   : > { %2610 = vmatprep.subr.bf16.mxu0 %v4782_v3  ;;  %v3557_v46 = vpack.c.bf16 %v965_v31, %v964_v30  ;;  %v938_v31 = vld [vmem:[%s4776_s1 + $0x270] sm:$0xff] }
  0x4b   : > { %v371_v62 = vadd.f32 %v3170_v45, %v333_v47 }
  0x4c   : > { %2564 = vmatpush1.bf16.msra.mxu1 %v2563_v5  ;;  %v725_v5 = vrot.slane %v3430_v50, 2 }
  0x4d   : > { %2612 = vmatpush1.bf16.msra.mxu0 %v2611_v11  ;;  %2741 = vmatprep.subr.bf16.mxu1 %v4782_v3  ;;  %v3495_v11 = vld [vmem:[%s4776_s1 + $0x250] sm:$0xff]  ;;  %v403_v19 = vmax.f32 %v371_v62, 0.0  ;;  %v619_v62 = vrot.slane %v3551_v41, 1 }
  0x4e   : > { %2613 = vmatprep.subr.bf16.mxu0 %v4782_v3  ;;  %v3525_v27 = vsel %vm713_vm1, %v724_v4, %v725_v5  ;;  %v2629_v29 = vpack.c.bf16 %v3500_v12, %v3495_v11  ;;  %v3564_v55 = vsel %vm713_vm1, %v725_v5, %v727_v28  ;;  %v936_v4 = vld [vmem:[%s4776_s1 + $0x260] sm:$0xff]  ;;  %v937_v5 = vld [vmem:[%s4776_s1 + $0x268] sm:$0xff]  ;;  %v970_v11 = vld [vmem:[%s4776_s1 + $0x370] sm:$0xff] }
  0x4f   : > { %1069 = vmatmul.mubr.f32.vlgmr.msra.gmra.mrb[0].mxu1 %v2937_v8  ;;  %490 = vst [vmem:[#allocation2 + $0x139] sm:$0xff] %v403_v19  ;;  %v971_v12 = vld [vmem:[%s4776_s1 + $0x378] sm:$0xff] }
  0x50   : > { %1294 = vmatmul.mubr.f32.vlgmr.msra.gmra.mrb[0].mxu0 %v714_v0  ;;  %1073 = vmatprep.mubr.f32.mxu1 %v605_v25  ;;  %v3468_v0 = vld [vmem:[%s4776_s1 + $0x240] sm:$0xff]  ;;  %v334_v25 = vmul.f32 %v3165_v44, %v294_v10  ;;  %v340_v10 = vmul.f32 %v3165_v44, %v300_v54  ;;  %v973_v54 = vld [vmem:[%s4776_s1 + $0x388] sm:$0xff] }
  0x51   : > { %2615 = vmatpush1.bf16.msra.mxu0 %v2614_v23  ;;  %1298 = vmatprep.mubr.f32.mxu0 %v3377_v17  ;;  %v2626_v23 = vpack.c.bf16 %v3473_v1, %v3468_v0  ;;  %v376_v0 = vadd.f32 %v3170_v45, %v338_v53  ;;  %v972_v53 = vld [vmem:[%s4776_s1 + $0x380] sm:$0xff] }
  0x52   : > { %2616 = vmatprep.subr.bf16.mxu0 %v4782_v3  ;;  %2757 = vmatpush1.bf16.msra.mxu1 %v3401_v32  ;;  %v372_v35 = vadd.f32 %v3170_v45, %v334_v25  ;;  %v2632_v25 = vpack.c.bf16 %v937_v5, %v936_v4  ;;  %v378_v9 = vadd.f32 %v3170_v45, %v340_v10  ;;  %v974_v4 = vld [vmem:[%s4776_s1 + $0x390] sm:$0xff]  ;;  %v975_v5 = vld [vmem:[%s4776_s1 + $0x398] sm:$0xff] }
  0x53   : > { %1074 = vmatmul.mubr.f32.gmra.mrb[2].mxu1 %v2937_v8  ;;  %2742 = vmatprep.subr.bf16.mxu1 %v4782_v3  ;;  %v370_v8 = vadd.f32 %v3170_v45, %v332_v39  ;;  %v729_v39 = vrot.slane %v3511_v21, 2  ;;  %v408_v19 = vmax.f32 %v376_v0, 0.0  ;;  %v3694_v0 = vpack.c.bf16 %v973_v54, %v972_v53 }
  0x54   : > { %1299 = vmatmul.mubr.f32.gmra.mrb[2].mxu0 %v718_v36  ;;  %1078 = vmatprep.mubr.f32.mxu1 %v3416_v40  ;;  %v336_v36 = vmul.f32 %v3165_v44, %v296_v20  ;;  %v404_v47 = vmax.f32 %v372_v35, 0.0  ;;  %v409_v20 = vmax.f32 %v377_v7, 0.0 }
  0x55   : > { %1303 = vmatprep.mubr.f32.mxu0 %v3427_v48  ;;  %2618 = vmatpush1.bf16.msra.mxu0 %v2617_v38  ;;  %v402_v13 = vmax.f32 %v370_v8, 0.0  ;;  %v617_v38 = vrot.slane %v3513_v22, 1  ;;  %v967_v8 = vld [vmem:[%s4776_s1 + $0x358] sm:$0xff]  ;;  %495 = vst [vmem:[#allocation2 + $0x171] sm:$0xff] %v408_v19  ;;  %4854 = vst [vmem:[#allocation3_spill] sm:$0xff] %v3694_v0 }
  0x56   : > { %2619 = vmatprep.subr.bf16.mxu0 %v4782_v3  ;;  %2758 = vmatpush1.bf16.msra.mxu1 %v3433_v51  ;;  %v374_v52 = vadd.f32 %v3170_v45, %v336_v36  ;;  %491 = vst [vmem:[#allocation2 + $0x141] sm:$0xff] %v404_v47  ;;  %496 = vst [vmem:[#allocation2 + $0x181] sm:$0xff] %v409_v20  ;;  %v941_v47 = vld [vmem:[%s4776_s1 + $0x288] sm:$0xff]  ;;  %v3717_v20 = vld [vmem:[#allocation2 + $0x98] sm:$0xff] }
  0x57   : > { %1079 = vmatmul.mubr.f32.gmra.mrb[4].mxu1 %v3248_v49  ;;  %2743 = vmatprep.subr.bf16.mxu1 %v4782_v3  ;;  %v614_v49 = vrot.slane %v3455_v60, 1  ;;  %489 = vst [vmem:[#allocation2 + $0x129] sm:$0xff] %v402_v13  ;;  %v375_v60 = vadd.f32 %v3170_v45, %v337_v43  ;;  %v3582_v1 = vsel %vm600_vm0, %v616_v34, %v617_v38  ;;  %v3594_v13 = vld [vmem:[#allocation2 + $0x68] sm:$0xff]  ;;  %v512_v34 = vld [vmem:[#allocation2 + $0x70] sm:$0x3]  ;;  %v3658_v43 = vld [vmem:[#allocation2 + $0x80] sm:$0xff] }
  0x58   : > { %1304 = vmatmul.mubr.f32.gmra.mrb[4].mxu0 %v3449_v57  ;;  %1083 = vmatprep.mubr.f32.mxu1 %v3452_v58  ;;  %v406_v63 = vmax.f32 %v374_v52, 0.0  ;;  %v3617_v28 = vsel %vm600_vm0, %v617_v38, %v619_v62  ;;  %v622_v30 = vrot.slane %v3594_v13, 1  ;;  %v735_v38 = vrot.slane %v3594_v13, 2  ;;  %v942_v62 = vld [vmem:[%s4776_s1 + $0x290] sm:$0xff] }
  0x59   : > { %1308 = vmatprep.mubr.f32.mxu0 %v3430_v50  ;;  %2621 = vmatpush1.bf16.msra.mxu0 %v2620_v56  ;;  %v3542_v33 = vsel %vm600_vm0, %v612_v59, %v614_v49  ;;  %v966_v56 = vld [vmem:[%s4776_s1 + $0x350] sm:$0xff]  ;;  %v407_v6 = vmax.f32 %v375_v60, 0.0  ;;  %v3592_v49 = vld [vmem:[#allocation2 + $0x60] sm:$0xff]  ;;  %v3665_v52 = vpack.c.bf16 %v971_v12, %v970_v11  ;;  %v627_v60 = vrot.slane %v3658_v43, 1 }
  0x5a   : > { %2622 = vmatprep.subr.bf16.mxu0 %v4782_v3  ;;  %2759 = vmatpush1.bf16.msra.mxu1 %v3476_v2  ;;  %493 = vst [vmem:[#allocation2 + $0x159] sm:$0xff] %v406_v63  ;;  %v943_v63 = vld [vmem:[%s4776_s1 + $0x298] sm:$0xff]  ;;  %v740_v7 = vrot.slane %v3658_v43, 2  ;;  %v632_v11 = vrot.slane %v3717_v20, 1  ;;  %v745_v53 = vrot.slane %v3717_v20, 2 }
  0x5b   : > { %1084 = vmatmul.mubr.f32.gmra.mrb[6].mxu1 %v3377_v17  ;;  %2744 = vmatprep.subr.bf16.mxu1 %v4782_v3  ;;  %v335_v17 = vmul.f32 %v3165_v44, %v295_v14  ;;  %v3598_v14 = vpack.c.bf16 %v967_v8, %v966_v56  ;;  %v969_v44 = vld [vmem:[%s4776_s1 + $0x368] sm:$0xff]  ;;  %494 = vst [vmem:[#allocation2 + $0x169] sm:$0xff] %v407_v6  ;;  %v737_v56 = vrot.slane %v512_v34, 2 }
  0x5c   : > { %1309 = vmatmul.mubr.f32.gmra.mrb[6].mxu0 %v3505_v15  ;;  %1088 = vmatprep.mubr.f32.mxu1 %v3508_v16  ;;  %v2641_v19 = vpack.c.bf16 %v943_v63, %v942_v62  ;;  %v949_v62 = vld [vmem:[%s4776_s1 + $0x2c8] sm:$0xff] }
  0x5d   : > { %1313 = vmatprep.mubr.f32.mxu0 %v3511_v21  ;;  %2624 = vmatpush1.bf16.msra.mxu0 %v2623_v18  ;;  %v373_v42 = vadd.f32 %v3170_v45, %v335_v17  ;;  %v968_v18 = vld [vmem:[%s4776_s1 + $0x360] sm:$0xff]  ;;  %v939_v17 = vld [vmem:[%s4776_s1 + $0x278] sm:$0xff]  ;;  %v410_v45 = vmax.f32 %v378_v9, 0.0  ;;  %v3710_v10 = vsel %vm713_vm1, %v735_v38, %v737_v56 }
  0x5e   : > { %2625 = vmatprep.subr.bf16.mxu0 %v4782_v3  ;;  %2760 = vmatpush1.bf16.msra.mxu1 %v3519_v24  ;;  %v3632_v35 = vpack.c.bf16 %v969_v44, %v968_v18  ;;  %v2635_v36 = vpack.c.bf16 %v939_v17, %v938_v31  ;;  %v3715_v18 = vld [vmem:[#allocation2 + $0x90] sm:$0xff]  ;;  %v977_v31 = vld [vmem:[%s4776_s1 + $0x3a8] sm:$0xff] }
  0x5f   : > { %1089 = vmatmul.mubr.f32.gmra.mrb[8].mxu1 %v3427_v48  ;;  %2745 = vmatprep.subr.bf16.mxu1 %v4782_v3  ;;  %v405_v59 = vmax.f32 %v373_v42, 0.0  ;;  %v730_v48 = vrot.slane %v3513_v22, 2  ;;  %497 = vst [vmem:[#allocation2 + $0x189] sm:$0xff] %v410_v45  ;;  %v3656_v42 = vld [vmem:[#allocation2 + $0x78] sm:$0xff]  ;;  %v518_v45 = vld [vmem:[#allocation2 + $0xa0] sm:$0x3] }
  0x60   : > { %1314 = vmatmul.mubr.f32.gmra.mrb[8].mxu0 %v3525_v27  ;;  %1093 = vmatprep.mubr.f32.mxu1 %v3542_v33  ;;  %v626_v8 = vrot.slane %v3656_v42, 1  ;;  %v739_v6 = vrot.slane %v3656_v42, 2  ;;  %v634_v56 = vrot.slane %v518_v45, 1 }
  0x61   : > { %1318 = vmatprep.mubr.f32.mxu0 %v3513_v22  ;;  %2627 = vmatpush1.bf16.msra.mxu0 %v2626_v23  ;;  %492 = vst [vmem:[#allocation2 + $0x151] sm:$0xff] %v405_v59  ;;  %v732_v23 = vrot.slane %v3551_v41, 2  ;;  %v3614_v26 = vsel %vm713_vm1, %v729_v39, %v730_v48  ;;  %v624_v39 = vrot.slane %v512_v34, 1  ;;  %v940_v41 = vld [vmem:[%s4776_s1 + $0x280] sm:$0xff]  ;;  %v631_v34 = vrot.slane %v3715_v18, 1 }
  0x62   : > { %2628 = vmatprep.subr.bf16.mxu0 %v4782_v3  ;;  %2761 = vmatpush1.bf16.msra.mxu1 %v3557_v46  ;;  %v2638_v61 = vpack.c.bf16 %v941_v47, %v940_v41  ;;  %v3740_v17 = vsel %vm713_vm1, %v739_v6, %v740_v7  ;;  %v979_v41 = vld [vmem:[%s4776_s1 + $0x3b8] sm:$0xff]  ;;  %v744_v47 = vrot.slane %v3715_v18, 2 }
  0x63   : > { %1094 = vmatmul.mubr.f32.gmra.mrb[10].mxu1 %v3430_v50  ;;  %2746 = vmatprep.subr.bf16.mxu1 %v4782_v3  ;;  %v621_v50 = vrot.slane %v3592_v49, 1  ;;  %v3683_v59 = vsel %vm600_vm0, %v622_v30, %v624_v39  ;;  %v978_v39 = vld [vmem:[%s4776_s1 + $0x3b0] sm:$0xff]  ;;  %v3775_v54 = vsel %vm600_vm0, %v631_v34, %v632_v11 }
  0x64   : > { %1319 = vmatmul.mubr.f32.gmra.mrb[10].mxu0 %v3564_v55  ;;  %1098 = vmatprep.mubr.f32.mxu1 %v3582_v1  ;;  %v3789_v63 = vpack.c.bf16 %v979_v41, %v978_v39  ;;  %v3802_v6 = vsel %vm713_vm1, %v744_v47, %v745_v53  ;;  %v982_v34 = vld [vmem:[%s4776_s1 + $0x3d0] sm:$0xff]  ;;  %v952_v47 = vld [vmem:[%s4776_s1 + $0x2e0] sm:$0xff] }
  0x65   : > { %1323 = vmatprep.mubr.f32.mxu0 %v3592_v49  ;;  %2630 = vmatpush1.bf16.msra.mxu0 %v2629_v29  ;;  %v734_v29 = vrot.slane %v3592_v49, 2  ;;  %v3650_v37 = vsel %vm600_vm0, %v621_v50, %v622_v30  ;;  %v945_v50 = vld [vmem:[%s4776_s1 + $0x2a8] sm:$0xff]  ;;  %v976_v30 = vld [vmem:[%s4776_s1 + $0x3a0] sm:$0xff]  ;;  %4860 = vst [vmem:[#allocation9_spill] sm:$0xff] %v3802_v6 }
  0x66   : > { %2631 = vmatprep.subr.bf16.mxu0 %v4782_v3  ;;  %2762 = vmatpush1.bf16.msra.mxu1 %v3598_v14  ;;  %4859 = vst [vmem:[#allocation8_spill] sm:$0xff] %v3789_v63 }
  0x67   : > { %1099 = vmatmul.mubr.f32.gmra.mrb[12].mxu1 %v3511_v21  ;;  %2747 = vmatprep.subr.bf16.mxu1 %v4782_v3  ;;  %v3647_v21 = vsel %vm713_vm1, %v730_v48, %v732_v23  ;;  %v515_v48 = vld [vmem:[#allocation2 + $0x88] sm:$0x3]  ;;  %v944_v23 = vld [vmem:[%s4776_s1 + $0x2a0] sm:$0xff] }
  0x68   : > { %1324 = vmatmul.mubr.f32.gmra.mrb[12].mxu0 %v3614_v26  ;;  %1103 = vmatprep.mubr.f32.mxu1 %v3617_v28  ;;  %v629_v44 = vrot.slane %v515_v48, 1  ;;  %v742_v9 = vrot.slane %v515_v48, 2  ;;  %v2644_v12 = vpack.c.bf16 %v945_v50, %v944_v23  ;;  %v3782_v48 = vld [vmem:[#allocation2 + $0xb0] sm:$0xff]  ;;  %v521_v50 = vld [vmem:[#allocation2 + $0xb8] sm:$0x3] }
  0x69   : > { %1328 = vmatprep.mubr.f32.mxu0 %v3594_v13  ;;  %2633 = vmatpush1.bf16.msra.mxu0 %v2632_v25  ;;  %v3727_v25 = vpack.c.bf16 %v975_v5, %v974_v4  ;;  %v980_v4 = vld [vmem:[%s4776_s1 + $0x3c0] sm:$0xff]  ;;  %v981_v5 = vld [vmem:[%s4776_s1 + $0x3c8] sm:$0xff]  ;;  %v639_v39 = vrot.slane %v521_v50, 1 }
  0x6a   : > { %2634 = vmatprep.subr.bf16.mxu0 %v4782_v3  ;;  %2763 = vmatpush1.bf16.msra.mxu1 %v3632_v35 }
  0x6b   : > { %1104 = vmatmul.mubr.f32.gmra.mrb[14].mxu1 %v3513_v22  ;;  %2748 = vmatprep.subr.bf16.mxu1 %v4782_v3  ;;  %v3680_v22 = vsel %vm713_vm1, %v734_v29, %v735_v38  ;;  %4855 = vst [vmem:[#allocation4_spill] sm:$0xff] %v3727_v25  ;;  %v946_v29 = vld [vmem:[%s4776_s1 + $0x2b0] sm:$0xff]  ;;  %v3756_v38 = vpack.c.bf16 %v977_v31, %v976_v30  ;;  %v951_v31 = vld [vmem:[%s4776_s1 + $0x2d8] sm:$0xff] }
  0x6c   : > { %1329 = vmatmul.mubr.f32.gmra.mrb[14].mxu0 %v3647_v21  ;;  %1108 = vmatprep.mubr.f32.mxu1 %v3650_v37  ;;  %v950_v30 = vld [vmem:[%s4776_s1 + $0x2d0] sm:$0xff] }
  0x6d   : > { %1333 = vmatprep.mubr.f32.mxu0 %v3656_v42  ;;  %2636 = vmatpush1.bf16.msra.mxu0 %v2635_v36  ;;  %v947_v36 = vld [vmem:[%s4776_s1 + $0x2b8] sm:$0xff]  ;;  %4857 = vst [vmem:[#allocation6_spill] sm:$0xff] %v3756_v38  ;;  %v2653_v41 = vpack.c.bf16 %v951_v31, %v950_v30 }
  0x6e   : > { %2637 = vmatprep.subr.bf16.mxu0 %v4782_v3  ;;  %2764 = vmatpush1.bf16.msra.mxu1 %v3665_v52 }
  0x6f   : > { %1109 = vmatmul.mubr.f32.gmra.mrb[16].mxu1 %v3592_v49  ;;  %2749 = vmatprep.subr.bf16.mxu1 %v4782_v3  ;;  %v3713_v49 = vsel %vm600_vm0, %v626_v8, %v627_v60  ;;  %v2647_v8 = vpack.c.bf16 %v947_v36, %v946_v29 }
  0x70   : > { %1334 = vmatmul.mubr.f32.gmra.mrb[16].mxu0 %v3680_v22  ;;  %1113 = vmatprep.mubr.f32.mxu1 %v3683_v59 }
  0x71   : > { %1338 = vmatprep.mubr.f32.mxu0 %v3658_v43  ;;  %2639 = vmatpush1.bf16.msra.mxu0 %v2638_v61  ;;  %v3780_v61 = vld [vmem:[#allocation2 + $0xa8] sm:$0xff] }
  0x72   : > { %2640 = vmatprep.subr.bf16.mxu0 %v4782_v3  ;;  %2765 = vmatpush1.bf16.msra.mxu1 %v3694_v0  ;;  %v4003_v0 = vld [vmem:[#allocation2 + $0x128] sm:$0xff] }
  0x73   : > { %1114 = vmatmul.mubr.f32.gmra.mrb[18].mxu1 %v3594_v13  ;;  %2750 = vmatprep.subr.bf16.mxu1 %v4782_v3  ;;  %v3744_v13 = vsel %vm600_vm0, %v627_v60, %v629_v44  ;;  %v948_v60 = vld [vmem:[%s4776_s1 + $0x2c0] sm:$0xff]  ;;  %v636_v44 = vrot.slane %v3780_v61, 1  ;;  %4881 = vst [vmem:[#allocation29_spill] sm:$0xff] %v4003_v0 }
  0x74   : > { %1339 = vmatmul.mubr.f32.gmra.mrb[18].mxu0 %v3710_v10  ;;  %1118 = vmatprep.mubr.f32.mxu1 %v3713_v49  ;;  %4856 = vst [vmem:[#allocation5_spill] sm:$0xff] %v3744_v13  ;;  %v2650_v23 = vpack.c.bf16 %v949_v62, %v948_v60  ;;  %v984_v62 = vld [vmem:[%s4776_s1 + $0x3e0] sm:$0xff] }
  0x75   : > { %1343 = vmatprep.mubr.f32.mxu0 %v3715_v18  ;;  %2642 = vmatpush1.bf16.msra.mxu0 %v2641_v19  ;;  %v637_v19 = vrot.slane %v3782_v48, 1 }
  0x76   : > { %2643 = vmatprep.subr.bf16.mxu0 %v4782_v3  ;;  %2766 = vmatpush1.bf16.msra.mxu1 %v3727_v25 }
  0x77   : > { %1119 = vmatmul.mubr.f32.gmra.mrb[20].mxu1 %v3656_v42  ;;  %2751 = vmatprep.subr.bf16.mxu1 %v4782_v3  ;;  %v3772_v42 = vsel %vm713_vm1, %v740_v7, %v742_v9  ;;  %v747_v7 = vrot.slane %v518_v45, 2  ;;  %v3818_v9 = vpack.c.bf16 %v981_v5, %v980_v4  ;;  %v750_v45 = vrot.slane %v3782_v48, 2  ;;  %v985_v4 = vld [vmem:[%s4776_s1 + $0x3e8] sm:$0xff] }
  0x78   : > { %1344 = vmatmul.mubr.f32.gmra.mrb[20].mxu0 %v3740_v17  ;;  %1123 = vmatprep.mubr.f32.mxu1 %v3744_v13  ;;  %4858 = vst [vmem:[#allocation7_spill] sm:$0xff] %v3772_v42  ;;  %v3837_v36 = vsel %vm600_vm0, %v636_v44, %v637_v19  ;;  %v3868_v44 = vsel %vm600_vm0, %v637_v19, %v639_v39  ;;  %v955_v19 = vld [vmem:[%s4776_s1 + $0x2f8] sm:$0xff]  ;;  %v4001_v13 = vld [vmem:[#allocation2 + $0x120] sm:$0xff] }
  0x79   : > { %1348 = vmatprep.mubr.f32.mxu0 %v3717_v20  ;;  %2645 = vmatpush1.bf16.msra.mxu0 %v2644_v12  ;;  %4861 = vst [vmem:[#allocation10_spill] sm:$0xff] %v3818_v9  ;;  %v749_v12 = vrot.slane %v3780_v61, 2  ;;  %v3834_v29 = vsel %vm713_vm1, %v745_v53, %v747_v7  ;;  %v953_v53 = vld [vmem:[%s4776_s1 + $0x2e8] sm:$0xff]  ;;  %v752_v7 = vrot.slane %v521_v50, 2  ;;  %v954_v50 = vld [vmem:[%s4776_s1 + $0x2f0] sm:$0xff]  ;;  %v987_v39 = vld [vmem:[%s4776_s1 + $0x3f8] sm:$0xff] }
  0x7a   : > { %2646 = vmatprep.subr.bf16.mxu0 %v4782_v3  ;;  %2767 = vmatpush1.bf16.msra.mxu1 %v3756_v38  ;;  %4862 = vst [vmem:[#allocation11_spill] sm:$0xff] %v3834_v29  ;;  %v2656_v31 = vpack.c.bf16 %v953_v53, %v952_v47  ;;  %v988_v53 = vld [vmem:[%s4776_s1 + $0x400] sm:$0xff]  ;;  %v3973_v38 = vld [vmem:[#allocation2 + $0x108] sm:$0xff]  ;;  %4880 = vst [vmem:[#allocation28_spill] sm:$0xff] %v4001_v13 }
  0x7b   : > { %1124 = vmatmul.mubr.f32.gmra.mrb[22].mxu1 %v3658_v43  ;;  %2752 = vmatprep.subr.bf16.mxu1 %v4782_v3  ;;  %v3806_v43 = vsel %vm600_vm0, %v632_v11, %v634_v56  ;;  %v983_v11 = vld [vmem:[%s4776_s1 + $0x3d8] sm:$0xff]  ;;  %v3842_v56 = vld [vmem:[#allocation2 + $0xc0] sm:$0xff]  ;;  %v3864_v5 = vsel %vm713_vm1, %v749_v12, %v750_v45  ;;  %v986_v12 = vld [vmem:[%s4776_s1 + $0x3f0] sm:$0xff]  ;;  %4874 = vst [vmem:[#allocation22_spill] sm:$0xff] %v3973_v38 }
  0x7c   : > { %1349 = vmatmul.mubr.f32.gmra.mrb[22].mxu0 %v3772_v42  ;;  %1128 = vmatprep.mubr.f32.mxu1 %v3775_v54  ;;  %v3851_v60 = vpack.c.bf16 %v983_v11, %v982_v34  ;;  %4864 = vst [vmem:[#allocation13_spill] sm:$0xff] %v3864_v5  ;;  %v524_v34 = vld [vmem:[#allocation2 + $0xd0] sm:$0x3]  ;;  %v3880_v11 = vpack.c.bf16 %v985_v4, %v984_v62  ;;  %v754_v47 = vrot.slane %v3842_v56, 2  ;;  %v989_v62 = vld [vmem:[%s4776_s1 + $0x408] sm:$0xff]  ;;  %v662_v42 = vrot.slane %v4003_v0, 1 }
  0x7d   : > { %1353 = vmatprep.mubr.f32.mxu0 %v3780_v61  ;;  %2648 = vmatpush1.bf16.msra.mxu0 %v2647_v8  ;;  %v3844_v8 = vld [vmem:[#allocation2 + $0xc8] sm:$0xff] }
  0x7e   : > { %2649 = vmatprep.subr.bf16.mxu0 %v4782_v3  ;;  %2768 = vmatpush1.bf16.msra.mxu1 %v3789_v63  ;;  %4863 = vst [vmem:[#allocation12_spill] sm:$0xff] %v3851_v60  ;;  %v642_v30 = vrot.slane %v3844_v8, 1  ;;  %4865 = vst [vmem:[#allocation14_spill] sm:$0xff] %v3880_v11  ;;  %v4867_v63 = vmov 0.0|0.0  }
  0x7f   : > { %1129 = vmatmul.mubr.f32.gmra.mrb[24].mxu1 %v3715_v18  ;;  %2753 = vmatprep.subr.bf16.mxu1 %v4782_v3 }
  0x80   : > { %1354 = vmatmul.mubr.f32.gmra.mrb[24].mxu0 %v3802_v6  ;;  %1133 = vmatprep.mubr.f32.mxu1 %v3806_v43  ;;  %v533_v6 = vld [vmem:[#allocation2 + $0x118] sm:$0x3] }
  0x81   : > { %1358 = vmatprep.mubr.f32.mxu0 %v3782_v48  ;;  %2651 = vmatpush1.bf16.msra.mxu0 %v2650_v23  ;;  %v641_v23 = vrot.slane %v3842_v56, 1 }
  0x82   : > { %2652 = vmatprep.subr.bf16.mxu0 %v4782_v3  ;;  %2769 = vmatpush1.bf16.msra.mxu1 %v3818_v9  ;;  %v3909_v9 = vld [vmem:[#allocation2 + $0xe0] sm:$0xff] }
  0x83   : > { %1134 = vmatmul.mubr.f32.gmra.mrb[26].mxu1 %v3717_v20  ;;  %2754 = vmatprep.subr.bf16.mxu1 %v4782_v3  ;;  %v3904_v4 = vsel %vm600_vm0, %v641_v23, %v642_v30  ;;  %v3917_v23 = vpack.c.bf16 %v989_v62, %v988_v53  ;;  %v527_v53 = vld [vmem:[#allocation2 + $0xe8] sm:$0x3] }
  0x84   : > { %1359 = vmatmul.mubr.f32.gmra.mrb[26].mxu0 %v3834_v29  ;;  %1138 = vmatprep.mubr.f32.mxu1 %v3837_v36  ;;  %v649_v62 = vrot.slane %v527_v53, 1  ;;  %v3975_v29 = vld [vmem:[#allocation2 + $0x110] sm:$0xff] }
  0x85   : > { %1363 = vmatprep.mubr.f32.mxu0 %v3842_v56  ;;  %2654 = vmatpush1.bf16.msra.mxu0 %v2653_v41  ;;  %v3893_v41 = vsel %vm713_vm1, %v750_v45, %v752_v7  ;;  %v2659_v45 = vpack.c.bf16 %v955_v19, %v954_v50  ;;  %v3907_v7 = vld [vmem:[#allocation2 + $0xd8] sm:$0xff]  ;;  %4875 = vst [vmem:[#allocation23_spill] sm:$0xff] %v3975_v29  ;;  %v657_v25 = vrot.slane %v3975_v29, 1 }
  0x86   : > { %2655 = vmatprep.subr.bf16.mxu0 %v4782_v3  ;;  %2770 = vmatpush1.bf16.msra.mxu1 %v3851_v60  ;;  %4866 = vst [vmem:[#allocation15_spill] sm:$0xff] %v3893_v41  ;;  %v644_v60 = vrot.slane %v524_v34, 1 }
  0x87   : > { %1139 = vmatmul.mubr.f32.gmra.mrb[28].mxu1 %v3780_v61  ;;  %2755 = vmatprep.subr.bf16.mxu1 %v4782_v3  ;;  %v755_v3 = vrot.slane %v3844_v8, 2 }
  0x88   : > { %1364 = vmatmul.mubr.f32.gmra.mrb[28].mxu0 %v3864_v5  ;;  %1143 = vmatprep.mubr.f32.mxu1 %v3868_v44  ;;  %v3913_v5 = vpack.c.bf16 %v987_v39, %v986_v12  ;;  %v3926_v19 = vsel %vm600_vm0, %v642_v30, %v644_v60  ;;  %v646_v12 = vrot.slane %v3907_v7, 1  ;;  %v647_v39 = vrot.slane %v3909_v9, 1 }
  0x89   : > { %1368 = vmatprep.mubr.f32.mxu0 %v3844_v8  ;;  %2657 = vmatpush1.bf16.msra.mxu0 %v2656_v31  ;;  %v757_v31 = vrot.slane %v524_v34, 2  ;;  %v3923_v50 = vsel %vm713_vm1, %v754_v47, %v755_v3  ;;  %v759_v60 = vrot.slane %v3907_v7, 2  ;;  %v760_v47 = vrot.slane %v3909_v9, 2 }
  0x8a   : > { %2658 = vmatprep.subr.bf16.mxu0 %v4867_v63  ;;  %2771 = vmatpush1.bf16.msra.mxu1 %v3880_v11  ;;  %4868 = vst [vmem:[#allocation16_spill] sm:$0xff] %v3913_v5  ;;  %4869 = vst [vmem:[#allocation17_spill] sm:$0xff] %v3923_v50  ;;  %v3942_v34 = vsel %vm600_vm0, %v646_v12, %v647_v39  ;;  %v762_v11 = vrot.slane %v527_v53, 2 }
  0x8b   : > { %1144 = vmatmul.mubr.f32.gmra.mrb[30].mxu1 %v3782_v48  ;;  %2756 = vmatprep.subr.bf16.mxu1 %v4867_v63  ;;  %v3939_v30 = vsel %vm713_vm1, %v755_v3, %v757_v31  ;;  %v3954_v3 = vsel %vm713_vm1, %v759_v60, %v760_v47  ;;  %v3957_v31 = vsel %vm600_vm0, %v647_v39, %v649_v62 }
  0x8c   : > { %1369 = vmatmul.mubr.f32.gmra.mrb[30].mxu0 %v3893_v41  ;;  %1148 = vmatprep.mubr.f32.mxu1 %v3904_v4  ;;  %4870 = vst [vmem:[#allocation18_spill] sm:$0xff] %v3939_v30  ;;  %4872 = vst [vmem:[#allocation20_spill] sm:$0xff] %v3954_v3  ;;  %v530_v41 = vld [vmem:[#allocation2 + $0x100] sm:$0x3]  ;;  %v3967_v60 = vsel %vm713_vm1, %v760_v47, %v762_v11 }
  0x8d   : > { %1373 = vmatprep.mubr.f32.mxu0 %v3907_v7  ;;  %2660 = vmatpush1.bf16.msra.mxu0 %v2659_v45  ;;  %v3945_v45 = vld [vmem:[#allocation2 + $0xf0] sm:$0xff]  ;;  %4873 = vst [vmem:[#allocation21_spill] sm:$0xff] %v3967_v60 }
  0x8e   : > { %2772 = vmatpush1.bf16.msra.mxu1 %v3913_v5  ;;  %2661 = vmatprep.subr.bf16.mxu0 %v4867_v63  ;;  %v3947_v5 = vld [vmem:[#allocation2 + $0xf8] sm:$0xff]  ;;  %v651_v12 = vrot.slane %v3945_v45, 1  ;;  %v764_v53 = vrot.slane %v3945_v45, 2 }
  0x8f   : > { %1149 = vmatmul.mubr.f32.gmra.mrb[32].mxu1 %v3842_v56  ;;  %2710 = vmatprep.subr.bf16.mxu1 %v3917_v23  ;;  %4871 = vst [vmem:[#allocation19_spill] sm:$0xff] %v3947_v5  ;;  %v765_v62 = vrot.slane %v3947_v5, 2 }
  0x90   : > { %1374 = vmatmul.mubr.f32.gmra.mrb[32].mxu0 %v3923_v50  ;;  %1153 = vmatprep.mubr.f32.mxu1 %v3926_v19  ;;  %v652_v50 = vrot.slane %v3947_v5, 1 }
  0x91   : > { %1378 = vmatprep.mubr.f32.mxu0 %v3909_v9  ;;  %v3982_v11 = vsel %vm713_vm1, %v764_v53, %v765_v62 }
  0x92   : > { %v3970_v39 = vsel %vm600_vm0, %v651_v12, %v652_v50  ;;  %4876 = vst [vmem:[#allocation24_spill] sm:$0xff] %v3982_v11  ;;  %v656_v12 = vrot.slane %v3973_v38, 1 }
  0x93   : > { %1154 = vmatmul.mubr.f32.gmra.mrb[34].mxu1 %v3844_v8 }
  0x94   : > { %1379 = vmatmul.mubr.f32.gmra.mrb[34].mxu0 %v3939_v30  ;;  %1158 = vmatprep.mubr.f32.mxu1 %v3942_v34  ;;  %v654_v30 = vrot.slane %v530_v41, 1 }
  0x95   : > { %1383 = vmatprep.mubr.f32.mxu0 %v3945_v45 }
  0x96   : > { %v3985_v47 = vsel %vm600_vm0, %v652_v50, %v654_v30  ;;  %v3998_v50 = vsel %vm600_vm0, %v656_v12, %v657_v25  ;;  %v770_v30 = vrot.slane %v3975_v29, 2  ;;  %v661_v12 = vrot.slane %v4001_v13, 1 }
  0x97   : > { %1159 = vmatmul.mubr.f32.gmra.mrb[36].mxu1 %v3907_v7  ;;  %4877 = vst [vmem:[#allocation25_spill] sm:$0xff] %v3985_v47  ;;  %4879 = vst [vmem:[#allocation27_spill] sm:$0xff] %v3998_v50 }
  0x98   : > { %1384 = vmatmul.mubr.f32.gmra.mrb[36].mxu0 %v3954_v3  ;;  %1163 = vmatprep.mubr.f32.mxu1 %v3957_v31  ;;  %v767_v3 = vrot.slane %v530_v41, 2  ;;  %v769_v41 = vrot.slane %v3973_v38, 2 }
  0x99   : > { %1388 = vmatprep.mubr.f32.mxu0 %v3947_v5 }
  0x9a   : > { %v3995_v53 = vsel %vm713_vm1, %v765_v62, %v767_v3  ;;  %v4010_v3 = vsel %vm713_vm1, %v769_v41, %v770_v30 }
  0x9b   : > { %1164 = vmatmul.mubr.f32.gmra.mrb[38].mxu1 %v3909_v9  ;;  %4878 = vst [vmem:[#allocation26_spill] sm:$0xff] %v3995_v53  ;;  %4882 = vst [vmem:[#allocation30_spill] sm:$0xff] %v4010_v3 }
  0x9c   : > { %1389 = vmatmul.mubr.f32.gmra.mrb[38].mxu0 %v3967_v60  ;;  %1168 = vmatprep.mubr.f32.mxu1 %v3970_v39  ;;  %v659_v60 = vrot.slane %v533_v6, 1 }
  0x9d   : > { %1393 = vmatprep.mubr.f32.mxu0 %v3973_v38 }
  0x9e   : > { %v4013_v62 = vsel %vm600_vm0, %v657_v25, %v659_v60  ;;  %v4026_v25 = vsel %vm600_vm0, %v661_v12, %v662_v42  ;;  %v775_v60 = vrot.slane %v4003_v0, 2 }
  0x9f   : > { %1169 = vmatmul.mubr.f32.gmra.mrb[40].mxu1 %v3945_v45  ;;  %4883 = vst [vmem:[#allocation31_spill] sm:$0xff] %v4013_v62  ;;  %4885 = vst [vmem:[#allocation33_spill] sm:$0xff] %v4026_v25 }
  0xa0   : > { %1394 = vmatmul.mubr.f32.gmra.mrb[40].mxu0 %v3982_v11  ;;  %1173 = vmatprep.mubr.f32.mxu1 %v3985_v47  ;;  %v772_v11 = vrot.slane %v533_v6, 2  ;;  %v536_v47 = vld [vmem:[#allocation2 + $0x130] sm:$0x3]  ;;  %v774_v6 = vrot.slane %v4001_v13, 2 }
  0xa1   : > { %1398 = vmatprep.mubr.f32.mxu0 %v3975_v29 }
  0xa2   : > { %v4023_v41 = vsel %vm713_vm1, %v770_v30, %v772_v11  ;;  %v4038_v11 = vsel %vm713_vm1, %v774_v6, %v775_v60 }
  0xa3   : > { %1174 = vmatmul.mubr.f32.gmra.mrb[42].mxu1 %v3947_v5  ;;  %4884 = vst [vmem:[#allocation32_spill] sm:$0xff] %v4023_v41  ;;  %4887 = vst [vmem:[#allocation35_spill] sm:$0xff] %v4038_v11  ;;  %v539_v5 = vld [vmem:[#allocation2 + $0x148] sm:$0x3] }
  0xa4   : > { %1399 = vmatmul.mubr.f32.gmra.mrb[42].mxu0 %v3995_v53  ;;  %1178 = vmatprep.mubr.f32.mxu1 %v3998_v50  ;;  %v664_v53 = vrot.slane %v536_v47, 1  ;;  %v4029_v50 = vld [vmem:[#allocation2 + $0x138] sm:$0xff] }
  0xa5   : > { %1403 = vmatprep.mubr.f32.mxu0 %v4001_v13  ;;  %4886 = vst [vmem:[#allocation34_spill] sm:$0xff] %v4029_v50  ;;  %v666_v12 = vrot.slane %v4029_v50, 1 }
  0xa6   : > { %v4041_v30 = vsel %vm600_vm0, %v662_v42, %v664_v53 }
  0xa7   : > { %1179 = vmatmul.mubr.f32.gmra.mrb[44].mxu1 %v3973_v38  ;;  %v4031_v38 = vld [vmem:[#allocation2 + $0x140] sm:$0xff]  ;;  %4888 = vst [vmem:[#allocation36_spill] sm:$0xff] %v4041_v30 }
  0xa8   : > { %1404 = vmatmul.mubr.f32.gmra.mrb[44].mxu0 %v4010_v3  ;;  %1183 = vmatprep.mubr.f32.mxu1 %v4013_v62  ;;  %v777_v3 = vrot.slane %v536_v47, 2  ;;  %v667_v62 = vrot.slane %v4031_v38, 1  ;;  %v779_v47 = vrot.slane %v4029_v50, 2  ;;  %v780_v53 = vrot.slane %v4031_v38, 2 }
  0xa9   : > { %1408 = vmatprep.mubr.f32.mxu0 %v4003_v0 }
  0xaa   : > { %v4051_v6 = vsel %vm713_vm1, %v775_v60, %v777_v3  ;;  %v4054_v42 = vsel %vm600_vm0, %v666_v12, %v667_v62  ;;  %v4066_v3 = vsel %vm713_vm1, %v779_v47, %v780_v53 }
  0xab   : > { %1184 = vmatmul.mubr.f32.gmra.mrb[46].mxu1 %v3975_v29  ;;  %4889 = vst [vmem:[#allocation37_spill] sm:$0xff] %v4051_v6  ;;  %4890 = vst [vmem:[#allocation38_spill] sm:$0xff] %v4054_v42  ;;  %v542_v29 = vld [vmem:[#allocation2 + $0x160] sm:$0x3] }
  0xac   : > { %1409 = vmatmul.mubr.f32.gmra.mrb[46].mxu0 %v4023_v41  ;;  %1188 = vmatprep.mubr.f32.mxu1 %v4026_v25  ;;  %v669_v41 = vrot.slane %v539_v5, 1  ;;  %v4057_v25 = vld [vmem:[#allocation2 + $0x150] sm:$0xff]  ;;  %4891 = vst [vmem:[#allocation39_spill] sm:$0xff] %v4066_v3 }
  0xad   : > { %1413 = vmatprep.mubr.f32.mxu0 %v4029_v50  ;;  %v671_v12 = vrot.slane %v4057_v25, 1 }
  0xae   : > { %v4069_v60 = vsel %vm600_vm0, %v667_v62, %v669_v41 }
  0xaf   : > { %1189 = vmatmul.mubr.f32.gmra.mrb[48].mxu1 %v4001_v13  ;;  %v4059_v13 = vld [vmem:[#allocation2 + $0x158] sm:$0xff]  ;;  %4892 = vst [vmem:[#allocation40_spill] sm:$0xff] %v4069_v60 }
  0xb0   : > { %1414 = vmatmul.mubr.f32.gmra.mrb[48].mxu0 %v4038_v11  ;;  %1193 = vmatprep.mubr.f32.mxu1 %v4041_v30  ;;  %v782_v11 = vrot.slane %v539_v5, 2  ;;  %v672_v30 = vrot.slane %v4059_v13, 1  ;;  %v784_v5 = vrot.slane %v4057_v25, 2  ;;  %v785_v41 = vrot.slane %v4059_v13, 2 }
  0xb1   : > { %1418 = vmatprep.mubr.f32.mxu0 %v4031_v38 }
  0xb2   : > { %v4079_v47 = vsel %vm713_vm1, %v780_v53, %v782_v11  ;;  %v4082_v62 = vsel %vm600_vm0, %v671_v12, %v672_v30  ;;  %v4094_v11 = vsel %vm713_vm1, %v784_v5, %v785_v41 }
  0xb3   : > { %1194 = vmatmul.mubr.f32.gmra.mrb[50].mxu1 %v4003_v0  ;;  %4893 = vst [vmem:[#allocation41_spill] sm:$0xff] %v4079_v47  ;;  %4894 = vst [vmem:[#allocation42_spill] sm:$0xff] %v4082_v62  ;;  %v545_v0 = vld [vmem:[#allocation2 + $0x178] sm:$0x3] }
  0xb4   : > { %1419 = vmatmul.mubr.f32.gmra.mrb[50].mxu0 %v4051_v6  ;;  %1198 = vmatprep.mubr.f32.mxu1 %v4054_v42  ;;  %v674_v6 = vrot.slane %v542_v29, 1  ;;  %v4085_v42 = vld [vmem:[#allocation2 + $0x168] sm:$0xff]  ;;  %4895 = vst [vmem:[#allocation43_spill] sm:$0xff] %v4094_v11 }
  0xb5   : > { %1423 = vmatprep.mubr.f32.mxu0 %v4057_v25  ;;  %v676_v12 = vrot.slane %v4085_v42, 1 }
  0xb6   : > { %v4097_v53 = vsel %vm600_vm0, %v672_v30, %v674_v6 }
  0xb7   : > { %1199 = vmatmul.mubr.f32.gmra.mrb[52].mxu1 %v4029_v50  ;;  %v4087_v50 = vld [vmem:[#allocation2 + $0x170] sm:$0xff] }
  0xb8   : > { %1424 = vmatmul.mubr.f32.gmra.mrb[52].mxu0 %v4066_v3  ;;  %1203 = vmatprep.mubr.f32.mxu1 %v4069_v60  ;;  %v787_v3 = vrot.slane %v542_v29, 2  ;;  %v677_v60 = vrot.slane %v4087_v50, 1  ;;  %v789_v29 = vrot.slane %v4085_v42, 2  ;;  %v790_v6 = vrot.slane %v4087_v50, 2 }
  0xb9   : > { %1428 = vmatprep.mubr.f32.mxu0 %v4059_v13 }
  0xba   : > { %v4107_v5 = vsel %vm713_vm1, %v785_v41, %v787_v3  ;;  %v4110_v30 = vsel %vm600_vm0, %v676_v12, %v677_v60  ;;  %v792_v41 = vrot.slane %v545_v0, 2  ;;  %v4125_v12 = vld [vmem:[#allocation2 + $0x188] sm:$0xff] }
  0xbb   : > { %1204 = vmatmul.mubr.f32.gmra.mrb[54].mxu1 %v4031_v38  ;;  %4896 = vst [vmem:[#allocation44_spill] sm:$0xff] %v4107_v5 }
  0xbc   : > { %1429 = vmatmul.mubr.f32.gmra.mrb[54].mxu0 %v4079_v47  ;;  %1208 = vmatprep.mubr.f32.mxu1 %v4082_v62  ;;  %v679_v47 = vrot.slane %v545_v0, 1  ;;  %v4113_v62 = vld [vmem:[#allocation2 + $0x180] sm:$0xff]  ;;  %v990_v0 = vld [vmem:[%s4776_s1 + $0x410] sm:$0xff] }
  0xbd   : > { %1433 = vmatprep.mubr.f32.mxu0 %v4085_v42 }
  0xbe   : > { %v4123_v3 = vsel %vm600_vm0, %v677_v60, %v679_v47  ;;  %v991_v60 = vld [vmem:[%s4776_s1 + $0x418] sm:$0xff] }
  0xbf   : > { %1209 = vmatmul.mubr.f32.gmra.mrb[56].mxu1 %v4057_v25  ;;  %v2713_v47 = vpack.c.bf16 %v991_v60, %v990_v0  ;;  %v4903_v0 = vld [vmem:[#allocation9_spill] sm:$0xff]  ;;  %v4904_v60 = vld [vmem:[#allocation4_spill] sm:$0xff] }
  0xc0   : > { %1434 = vmatmul.mubr.f32.gmra.mrb[56].mxu0 %v4094_v11  ;;  %1213 = vmatprep.mubr.f32.mxu1 %v4097_v53  ;;  %v4120_v11 = vsel %vm713_vm1, %v789_v29, %v790_v6  ;;  %v992_v29 = vld [vmem:[%s4776_s1 + $0x420] sm:$0xff] }
  0xc1   : > { %1438 = vmatprep.mubr.f32.mxu0 %v4087_v50 }
  0xc3   : > { %1214 = vmatmul.mubr.f32.gmra.mrb[58].mxu1 %v4059_v13 }
  0xc4   : > { %1439 = vmatmul.mubr.f32.gmra.mrb[58].mxu0 %v4107_v5  ;;  %1218 = vmatprep.mubr.f32.mxu1 %v4110_v30  ;;  %v4132_v5 = vsel %vm713_vm1, %v790_v6, %v792_v41  ;;  %v993_v6 = vld [vmem:[%s4776_s1 + $0x428] sm:$0xff]  ;;  %v1003_v41 = vld [vmem:[%s4776_s1 + $0x478] sm:$0xff] }
  0xc5   : > { %1443 = vmatprep.mubr.f32.mxu0 %v4113_v62 }
  0xc7   : > { %1219 = vmatmul.mubr.f32.gmra.mrb[60].mxu1 %v4085_v42 }
  0xc8   : > { %1444 = vmatmul.mubr.f32.gmra.mrb[60].mxu0 %v4120_v11  ;;  %1223 = vmatprep.mubr.f32.mxu1 %v4123_v3 }
  0xc9   : > { %1448 = vmatprep.mubr.f32.mxu0 %v4125_v12 }
  0xcb   : > { %1224 = vmatmul.mubr.f32.gmra.mrb[62].mxu1 %v4087_v50 }
  0xcc   : > { %1449 = vmatmul.mubr.f32.gmra.mrb[62].mxu0 %v4132_v5  ;;  %1783 = vmatprep.mubr.f32.mxu1 %v3775_v54 }
  0xcd   : > { %1518 = vmatprep.mubr.f32.mxu0 %v3449_v57  ;;  %v994_v57 = vld [vmem:[%s4776_s1 + $0x430] sm:$0xff] }
  0xcf   : > { %1784 = vmatmul.mubr.f32.vlgmr.msra.gmra.mrb[64].mxu1 %v3715_v18  ;;  %v997_v18 = vld [vmem:[%s4776_s1 + $0x448] sm:$0xff] }
  0xd0   : > { %1519 = vmatmul.mubr.f32.vlgmr.msra.gmra.mrb[0].mxu0 %v3416_v40  ;;  %1788 = vmatprep.mubr.f32.mxu1 %v3806_v43  ;;  %v2717_v40 = vpack.c.bf16 %v993_v6, %v992_v29  ;;  %v4907_v29 = vld [vmem:[#allocation11_spill] sm:$0xff]  ;;  %v4908_v6 = vld [vmem:[#allocation6_spill] sm:$0xff] }
  0xd1   : > { %2663 = vmatpush1.bf16.msra.mxu0 %v3401_v32  ;;  %1523 = vmatprep.mubr.f32.mxu0 %v3505_v15  ;;  %v995_v32 = vld [vmem:[%s4776_s1 + $0x438] sm:$0xff]  ;;  %v996_v15 = vld [vmem:[%s4776_s1 + $0x440] sm:$0xff] }
  0xd2   : > { %2664 = vmatprep.subr.bf16.mxu0 %v4867_v63  ;;  %2712 = vmatpush3.bf16.msra.mxu1 %v3917_v23  ;;  %v1001_v23 = vld [vmem:[%s4776_s1 + $0x468] sm:$0xff] }
  0xd3   : > { %1789 = vmatmul.mubr.f32.gmra.mrb[66].mxu1 %v3717_v20  ;;  %2714 = vmatprep.subr.bf16.mxu1 %v2713_v47  ;;  %v998_v20 = vld [vmem:[%s4776_s1 + $0x450] sm:$0xff] }
  0xd4   : > { %1524 = vmatmul.mubr.f32.gmra.mrb[2].mxu0 %v3452_v58  ;;  %1793 = vmatprep.mubr.f32.mxu1 %v3837_v36  ;;  %v2721_v58 = vpack.c.bf16 %v995_v32, %v994_v57  ;;  %v4910_v57 = vld [vmem:[#allocation33_spill] sm:$0xff] }
  0xd5   : > { %1528 = vmatprep.mubr.f32.mxu0 %v3525_v27  ;;  %2666 = vmatpush1.bf16.msra.mxu0 %v3433_v51  ;;  %v2725_v51 = vpack.c.bf16 %v997_v18, %v996_v15  ;;  %v4911_v32 = vld [vmem:[#allocation13_spill] sm:$0xff]  ;;  %v4914_v15 = vld [vmem:[#allocation36_spill] sm:$0xff]  ;;  %v4915_v18 = vld [vmem:[#allocation15_spill] sm:$0xff] }
  0xd6   : > { %2667 = vmatprep.subr.bf16.mxu0 %v4867_v63  ;;  %2716 = vmatpush3.bf16.msra.mxu1 %v2713_v47  ;;  %v4906_v47 = vld [vmem:[#allocation31_spill] sm:$0xff] }
  0xd7   : > { %1794 = vmatmul.mubr.f32.gmra.mrb[68].mxu1 %v3780_v61  ;;  %2718 = vmatprep.subr.bf16.mxu1 %v2717_v40  ;;  %v999_v61 = vld [vmem:[%s4776_s1 + $0x458] sm:$0xff] }
  0xd8   : > { %1529 = vmatmul.mubr.f32.gmra.mrb[4].mxu0 %v3508_v16  ;;  %1798 = vmatprep.mubr.f32.mxu1 %v3868_v44 }
  0xd9   : > { %1533 = vmatprep.mubr.f32.mxu0 %v3564_v55  ;;  %2669 = vmatpush1.bf16.msra.mxu0 %v3476_v2  ;;  %v2729_v2 = vpack.c.bf16 %v999_v61, %v998_v20  ;;  %v4918_v20 = vld [vmem:[#allocation38_spill] sm:$0xff]  ;;  %v4919_v61 = vld [vmem:[#allocation17_spill] sm:$0xff] }
  0xda   : > { %2670 = vmatprep.subr.bf16.mxu0 %v4867_v63  ;;  %2720 = vmatpush3.bf16.msra.mxu1 %v2717_v40  ;;  %v4909_v40 = vld [vmem:[#allocation23_spill] sm:$0xff] }
  0xdb   : > { %1799 = vmatmul.mubr.f32.gmra.mrb[70].mxu1 %v3782_v48  ;;  %2722 = vmatprep.subr.bf16.mxu1 %v2721_v58  ;;  %v1000_v48 = vld [vmem:[%s4776_s1 + $0x460] sm:$0xff] }
  0xdc   : > { %1534 = vmatmul.mubr.f32.gmra.mrb[6].mxu0 %v3542_v33  ;;  %1803 = vmatprep.mubr.f32.mxu1 %v3904_v4 }
  0xdd   : > { %1538 = vmatprep.mubr.f32.mxu0 %v3614_v26  ;;  %2672 = vmatpush1.bf16.msra.mxu0 %v3519_v24  ;;  %v2733_v24 = vpack.c.bf16 %v1001_v23, %v1000_v48  ;;  %v4922_v48 = vld [vmem:[#allocation40_spill] sm:$0xff]  ;;  %v4923_v23 = vld [vmem:[#allocation18_spill] sm:$0xff] }
  0xde   : > { %2673 = vmatprep.subr.bf16.mxu0 %v4867_v63  ;;  %2724 = vmatpush3.bf16.msra.mxu1 %v2721_v58  ;;  %v4912_v58 = vld [vmem:[#allocation8_spill] sm:$0xff] }
  0xdf   : > { %1804 = vmatmul.mubr.f32.gmra.mrb[72].mxu1 %v3842_v56  ;;  %2726 = vmatprep.subr.bf16.mxu1 %v2725_v51  ;;  %v1002_v56 = vld [vmem:[%s4776_s1 + $0x470] sm:$0xff] }
  0xe0   : > { %1539 = vmatmul.mubr.f32.gmra.mrb[8].mxu0 %v3582_v1  ;;  %1808 = vmatprep.mubr.f32.mxu1 %v3926_v19 }
  0xe1   : > { %1543 = vmatprep.mubr.f32.mxu0 %v3647_v21  ;;  %2675 = vmatpush1.bf16.msra.mxu0 %v3557_v46  ;;  %v2737_v46 = vpack.c.bf16 %v1003_v41, %v1002_v56  ;;  %v4926_v56 = vld [vmem:[#allocation20_spill] sm:$0xff] }
  0xe2   : > { %2676 = vmatprep.subr.bf16.mxu0 %v4867_v63  ;;  %2728 = vmatpush3.bf16.msra.mxu1 %v2725_v51  ;;  %v4916_v51 = vld [vmem:[#allocation10_spill] sm:$0xff]  ;;  %v4927_v41 = vld [vmem:[#allocation16_spill] sm:$0xff] }
  0xe3   : > { %1809 = vmatmul.mubr.f32.gmra.mrb[74].mxu1 %v3844_v8  ;;  %2730 = vmatprep.subr.bf16.mxu1 %v2729_v2  ;;  %v4900_v8 = vld [vmem:[#allocation19_spill] sm:$0xff] }
  0xe4   : > { %1544 = vmatmul.mubr.f32.gmra.mrb[10].mxu0 %v3617_v28  ;;  %1813 = vmatprep.mubr.f32.mxu1 %v3942_v34 }
  0xe5   : > { %1548 = vmatprep.mubr.f32.mxu0 %v3680_v22  ;;  %2678 = vmatpush1.bf16.msra.mxu0 %v3598_v14  ;;  %v4897_v14 = vld [vmem:[#allocation25_spill] sm:$0xff] }
  0xe6   : > { %2679 = vmatprep.subr.bf16.mxu0 %v4867_v63  ;;  %2732 = vmatpush3.bf16.msra.mxu1 %v2729_v2  ;;  %v4920_v2 = vld [vmem:[#allocation12_spill] sm:$0xff] }
  0xe7   : > { %1814 = vmatmul.mubr.f32.gmra.mrb[76].mxu1 %v3907_v7  ;;  %2734 = vmatprep.subr.bf16.mxu1 %v2733_v24  ;;  %v4901_v7 = vld [vmem:[#allocation5_spill] sm:$0xff] }
  0xe8   : > { %1549 = vmatmul.mubr.f32.gmra.mrb[12].mxu0 %v3650_v37  ;;  %1818 = vmatprep.mubr.f32.mxu1 %v3957_v31 }
  0xe9   : > { %1553 = vmatprep.mubr.f32.mxu0 %v3710_v10  ;;  %2681 = vmatpush1.bf16.msra.mxu0 %v3632_v35  ;;  %v4898_v35 = vld [vmem:[#allocation7_spill] sm:$0xff] }
  0xea   : > { %2682 = vmatprep.subr.bf16.mxu0 %v4867_v63  ;;  %2736 = vmatpush3.bf16.msra.mxu1 %v2733_v24  ;;  %v4924_v24 = vld [vmem:[#allocation14_spill] sm:$0xff] }
  0xeb   : > { %1819 = vmatmul.mubr.f32.gmra.mrb[78].mxu1 %v3909_v9  ;;  %2738 = vmatprep.subr.bf16.mxu1 %v2737_v46  ;;  %v4899_v9 = vld [vmem:[#allocation3_spill] sm:$0xff] }
  0xec   : > { %1554 = vmatmul.mubr.f32.gmra.mrb[14].mxu0 %v3683_v59  ;;  %1823 = vmatprep.mubr.f32.mxu1 %v3970_v39 }
  0xed   : > { %1558 = vmatprep.mubr.f32.mxu0 %v3740_v17  ;;  %2684 = vmatpush1.bf16.msra.mxu0 %v3665_v52  ;;  %v4902_v52 = vld [vmem:[#allocation27_spill] sm:$0xff] }
  0xee   : > { %2685 = vmatprep.subr.bf16.mxu0 %v4867_v63  ;;  %2740 = vmatpush3.bf16.msra.mxu1 %v2737_v46  ;;  %v4286_v46 = vld [vmem:[#allocation2 + $0x190] sm:$0x3] }
  0xef   : > { %1824 = vmatmul.mubr.f32.gmra.mrb[80].mxu1 %v3945_v45  ;;  %v4905_v45 = vld [vmem:[#allocation22_spill] sm:$0xff] }
  0xf0   : > { %1559 = vmatmul.mubr.f32.gmra.mrb[16].mxu0 %v3713_v49  ;;  %1828 = vmatprep.mubr.f32.mxu1 %v4897_v14 }
  0xf1   : > { %1563 = vmatprep.mubr.f32.mxu0 %v4898_v35  ;;  %2687 = vmatpush1.bf16.msra.mxu0 %v4899_v9 }
  0xf2   : > { %2688 = vmatprep.subr.bf16.mxu0 %v4867_v63 }
  0xf3   : > { %1829 = vmatmul.mubr.f32.gmra.mrb[82].mxu1 %v4900_v8  ;;  %v4306_v8 = vld [vmem:[#allocation2 + $0x1a8] sm:$0x3] }
  0xf4   : > { %1564 = vmatmul.mubr.f32.gmra.mrb[18].mxu0 %v4901_v7  ;;  %1833 = vmatprep.mubr.f32.mxu1 %v4902_v52 }
  0xf5   : > { %1568 = vmatprep.mubr.f32.mxu0 %v4903_v0  ;;  %2690 = vmatpush1.bf16.msra.mxu0 %v4904_v60 }
  0xf6   : > { %2691 = vmatprep.subr.bf16.mxu0 %v4867_v63 }
  0xf7   : > { %1834 = vmatmul.mubr.f32.gmra.mrb[84].mxu1 %v4905_v45 }
  0xf8   : > { %1569 = vmatmul.mubr.f32.gmra.mrb[20].mxu0 %v3775_v54  ;;  %1838 = vmatprep.mubr.f32.mxu1 %v4906_v47  ;;  %v4913_v54 = vld [vmem:[#allocation28_spill] sm:$0xff] }
  0xf9   : > { %1573 = vmatprep.mubr.f32.mxu0 %v4907_v29  ;;  %2693 = vmatpush1.bf16.msra.mxu0 %v4908_v6  ;;  %v4933_v6 = vld [vmem:[#allocation35_spill] sm:$0xff] }
  0xfa   : > { %2694 = vmatprep.subr.bf16.mxu0 %v4867_v63 }
  0xfb   : > { %1839 = vmatmul.mubr.f32.gmra.mrb[86].mxu1 %v4909_v40 }
  0xfc   : > { %1574 = vmatmul.mubr.f32.gmra.mrb[22].mxu0 %v3806_v43  ;;  %1843 = vmatprep.mubr.f32.mxu1 %v4910_v57  ;;  %v4917_v43 = vld [vmem:[#allocation29_spill] sm:$0xff] }
  0xfd   : > { %1578 = vmatprep.mubr.f32.mxu0 %v4911_v32  ;;  %2696 = vmatpush1.bf16.msra.mxu0 %v4912_v58 }
  0xfe   : > { %2697 = vmatprep.subr.bf16.mxu0 %v4867_v63 }
  0xff   : > { %1844 = vmatmul.mubr.f32.gmra.mrb[88].mxu1 %v4913_v54  ;;  %v4934_v54 = vld [vmem:[#allocation37_spill] sm:$0xff] }
 0x100   : > { %1579 = vmatmul.mubr.f32.gmra.mrb[24].mxu0 %v3837_v36  ;;  %1848 = vmatprep.mubr.f32.mxu1 %v4914_v15  ;;  %v4921_v36 = vld [vmem:[#allocation34_spill] sm:$0xff] }
 0x101   : > { %1583 = vmatprep.mubr.f32.mxu0 %v4915_v18  ;;  %2699 = vmatpush1.bf16.msra.mxu0 %v4916_v51 }
 0x102   : > { %2700 = vmatprep.subr.bf16.mxu0 %v4867_v63 }
 0x103   : > { %1849 = vmatmul.mubr.f32.gmra.mrb[90].mxu1 %v4917_v43  ;;  %v4935_v43 = vld [vmem:[#allocation39_spill] sm:$0xff] }
 0x104   : > { %1584 = vmatmul.mubr.f32.gmra.mrb[26].mxu0 %v3868_v44  ;;  %1853 = vmatprep.mubr.f32.mxu1 %v4918_v20  ;;  %v4925_v44 = vld [vmem:[#allocation42_spill] sm:$0xff] }
 0x105   : > { %1588 = vmatprep.mubr.f32.mxu0 %v4919_v61  ;;  %2702 = vmatpush1.bf16.msra.mxu0 %v4920_v2 }
 0x106   : > { %2703 = vmatprep.subr.bf16.mxu0 %v4867_v63 }
 0x107   : > { %1854 = vmatmul.mubr.f32.gmra.mrb[92].mxu1 %v4921_v36 }
 0x108   : > { %1589 = vmatmul.mubr.f32.gmra.mrb[28].mxu0 %v3904_v4  ;;  %1858 = vmatprep.mubr.f32.mxu1 %v4922_v48  ;;  %v4928_v4 = vld [vmem:[#allocation21_spill] sm:$0xff] }
 0x109   : > { %1593 = vmatprep.mubr.f32.mxu0 %v4923_v23  ;;  %2705 = vmatpush1.bf16.msra.mxu0 %v4924_v24 }
 0x10a   : > { %2706 = vmatprep.subr.bf16.mxu0 %v4867_v63  ;;  %v829_v63 = vrot.slane %v4113_v62, 1 }
 0x10b   : > { %1859 = vmatmul.mubr.f32.gmra.mrb[94].mxu1 %v4031_v38  ;;  %v4929_v38 = vld [vmem:[#allocation24_spill] sm:$0xff] }
 0x10c   : > { %1594 = vmatmul.mubr.f32.gmra.mrb[30].mxu0 %v3926_v19  ;;  %1863 = vmatprep.mubr.f32.mxu1 %v4925_v44  ;;  %v830_v19 = vrot.slane %v4125_v12, 1 }
 0x10d   : > { %1598 = vmatprep.mubr.f32.mxu0 %v4926_v56  ;;  %2708 = vmatpush1.bf16.msra.mxu0 %v4927_v41 }
 0x10f   : > { %1864 = vmatmul.mubr.f32.gmra.mrb[96].mxu1 %v4057_v25  ;;  %v4931_v25 = vld [vmem:[#allocation30_spill] sm:$0xff] }
 0x110   : > { %1599 = vmatmul.mubr.f32.gmra.mrb[32].mxu0 %v3942_v34  ;;  %1868 = vmatprep.mubr.f32.mxu1 %v4097_v53  ;;  %v4930_v34 = vld [vmem:[#allocation26_spill] sm:$0xff] }
 0x111   : > { %1603 = vmatprep.mubr.f32.mxu0 %v4928_v4 }
 0x113   : > { %1869 = vmatmul.mubr.f32.gmra.mrb[98].mxu1 %v4059_v13  ;;  %v4293_v13 = vsel %vm600_vm0, %v829_v63, %v830_v19  ;;  %v2922_v63 = vld [vmem:[#allocation2 + $0x48] sm:$0xff] }
 0x114   : > { %1604 = vmatmul.mubr.f32.gmra.mrb[34].mxu0 %v3957_v31  ;;  %1873 = vmatprep.mubr.f32.mxu1 %v4110_v30  ;;  %v832_v31 = vrot.slane %v4286_v46, 1 }
 0x115   : > { %1608 = vmatprep.mubr.f32.mxu0 %v4929_v38 }
 0x117   : > { %1874 = vmatmul.mubr.f32.gmra.mrb[100].mxu1 %v4085_v42  ;;  %v4301_v42 = vsel %vm600_vm0, %v830_v19, %v832_v31 }
 0x118   : > { %1609 = vmatmul.mubr.f32.gmra.mrb[36].mxu0 %v3970_v39  ;;  %1878 = vmatprep.mubr.f32.mxu1 %v4123_v3  ;;  %v4303_v39 = vld [vmem:[#allocation2] sm:$0xff] }
 0x119   : > { %1613 = vmatprep.mubr.f32.mxu0 %v4930_v34  ;;  %v846_v9 = vrot.slane %v4303_v39, 1 }
 0x11b   : > { %1879 = vmatmul.mubr.f32.gmra.mrb[102].mxu1 %v4087_v50  ;;  %v4932_v50 = vld [vmem:[#allocation32_spill] sm:$0xff] }
 0x11c   : > { %1614 = vmatmul.mubr.f32.gmra.mrb[38].mxu0 %v4897_v14  ;;  %1883 = vmatprep.mubr.f32.mxu1 %v4293_v13  ;;  %v849_v14 = vrot.slane %v4306_v8, 1 }
 0x11d   : > { %1618 = vmatprep.mubr.f32.mxu0 %v4931_v25 }
 0x11e   : > { %v850_v40 = vsel %vm600_vm0, %v846_v9, %v849_v14  ;;  %v2927_v14 = vld [vmem:[#allocation2 + $0x80] sm:$0xff] }
 0x11f   : > { %1884 = vmatmul.mubr.f32.gmra.mrb[104].mxu1 %v4113_v62 }
 0x120   : > { %1619 = vmatmul.mubr.f32.gmra.mrb[40].mxu0 %v4902_v52  ;;  %1888 = vmatprep.mubr.f32.mxu1 %v4301_v42 }
 0x121   : > { %1623 = vmatprep.mubr.f32.mxu0 %v4932_v50 }
 0x122   : > { %v4313_v60 = vpop.f32.mrb[0].mxu1 }
 0x123   : > { %1889 = vmatmul.mubr.f32.gmra.mrb[106].mxu1 %v4125_v12  ;;  %v1072_v45 = vpop.f32.mrb[1].mxu1 }
 0x124   : > { %1624 = vmatmul.mubr.f32.gmra.mrb[42].mxu0 %v4906_v47  ;;  %1893 = vmatprep.mubr.f32.mxu1 %v846_v9 }
 0x125   : > { %1628 = vmatprep.mubr.f32.mxu0 %v4933_v6 }
 0x126   : > { %v4319_v58 = vpop.f32.mrb[2].mxu1 }
 0x127   : > { %1894 = vmatmul.mubr.f32.gmra.mrb[108].mxu1 %v4303_v39  ;;  %v1077_v52 = vpop.f32.mrb[3].mxu1 }
 0x128   : > { %1629 = vmatmul.mubr.f32.gmra.mrb[44].mxu0 %v4910_v57  ;;  %1898 = vmatprep.mubr.f32.mxu1 %v850_v40  ;;  %v4936_v57 = vld [vmem:[#allocation41_spill] sm:$0xff] }
 0x129   : > { %1633 = vmatprep.mubr.f32.mxu0 %v4934_v54 }
 0x12a   : > { %v4324_v51 = vpop.f32.mrb[4].mxu1 }
 0x12b   : > { %1899 = vmatmul.mubr.f32.gmra.mrb[110].mxu1 %v4303_v39  ;;  %v1082_v47 = vpop.f32.mrb[5].mxu1 }
 0x12c   : > { %1634 = vmatmul.mubr.f32.gmra.mrb[46].mxu0 %v4914_v15  ;;  %2469 = vmatprep.mubr.f32.mxu1 %v3525_v27  ;;  %v4937_v27 = vld [vmem:[#allocation43_spill] sm:$0xff] }
 0x12d   : > { %1638 = vmatprep.mubr.f32.mxu0 %v4935_v43 }
 0x12e   : > { %v4330_v2 = vpop.f32.mrb[6].mxu1 }
 0x12f   : > { %2470 = vmatmul.mubr.f32.vlgmr.msra.gmra.mrb[112].mxu1 %v3564_v55  ;;  %v1087_v36 = vpop.f32.mrb[7].mxu1 }
 0x130   : > { %1639 = vmatmul.mubr.f32.gmra.mrb[48].mxu0 %v4918_v20  ;;  %2472 = vmatprep.mubr.f32.mxu1 %v3614_v26  ;;  %v4938_v26 = vld [vmem:[#allocation44_spill] sm:$0xff] }
 0x131   : > { %1643 = vmatprep.mubr.f32.mxu0 %v4936_v57 }
 0x132   : > { %v4336_v24 = vpop.f32.mrb[8].mxu1 }
 0x133   : > { %2473 = vmatmul.mubr.f32.gmra.mrb[114].mxu1 %v3647_v21  ;;  %v1092_v15 = vpop.f32.mrb[9].mxu1 }
 0x134   : > { %1644 = vmatmul.mubr.f32.gmra.mrb[50].mxu0 %v4922_v48  ;;  %2475 = vmatprep.mubr.f32.mxu1 %v3680_v22  ;;  %v836_v22 = vrot.slane %v4113_v62, 2 }
 0x135   : > { %1648 = vmatprep.mubr.f32.mxu0 %v4937_v27 }
 0x136   : > { %v4342_v41 = vpop.f32.mrb[10].mxu1 }
 0x137   : > { %2476 = vmatmul.mubr.f32.gmra.mrb[116].mxu1 %v3710_v10  ;;  %v1097_v55 = vpop.f32.mrb[11].mxu1  ;;  %v837_v10 = vrot.slane %v4125_v12, 2 }
 0x138   : > { %1649 = vmatmul.mubr.f32.gmra.mrb[52].mxu0 %v4925_v44  ;;  %2478 = vmatprep.mubr.f32.mxu1 %v3740_v17 }
 0x139   : > { %1653 = vmatprep.mubr.f32.mxu0 %v4938_v26 }
 0x13a   : > { %v4348_v20 = vpop.f32.mrb[12].mxu1 }
 0x13b   : > { %2479 = vmatmul.mubr.f32.gmra.mrb[118].mxu1 %v4898_v35  ;;  %v1102_v21 = vpop.f32.mrb[13].mxu1  ;;  %v839_v35 = vrot.slane %v4286_v46, 2  ;;  %v2923_v46 = vld [vmem:[#allocation2 + $0x50] sm:$0xff] }
 0x13c   : > { %1654 = vmatmul.mubr.f32.gmra.mrb[54].mxu0 %v4097_v53  ;;  %2481 = vmatprep.mubr.f32.mxu1 %v4903_v0  ;;  %v838_v53 = vsel %vm713_vm1, %v836_v22, %v837_v10 }
 0x13d   : > { %1658 = vmatprep.mubr.f32.mxu0 %v4120_v11 }
 0x13e   : > { %v4356_v48 = vpop.f32.mrb[14].mxu1 }
 0x13f   : > { %2482 = vmatmul.mubr.f32.gmra.mrb[120].mxu1 %v4907_v29  ;;  %v1107_v17 = vpop.f32.mrb[15].mxu1 }
 0x140   : > { %1659 = vmatmul.mubr.f32.gmra.mrb[56].mxu0 %v4110_v30  ;;  %2484 = vmatprep.mubr.f32.mxu1 %v4911_v32  ;;  %v840_v30 = vsel %vm713_vm1, %v837_v10, %v839_v35 }
 0x141   : > { %1663 = vmatprep.mubr.f32.mxu0 %v4132_v5 }
 0x142   : > { %v4364_v0 = vpop.f32.mrb[16].mxu1 }
 0x143   : > { %2485 = vmatmul.mubr.f32.gmra.mrb[122].mxu1 %v4915_v18  ;;  %v1112_v62 = vpop.f32.mrb[17].mxu1 }
 0x144   : > { %1664 = vmatmul.mubr.f32.gmra.mrb[58].mxu0 %v4123_v3  ;;  %2487 = vmatprep.mubr.f32.mxu1 %v4919_v61 }
 0x145   : > { %1668 = vmatprep.mubr.f32.mxu0 %v838_v53 }
 0x146   : > { %v4370_v12 = vpop.f32.mrb[18].mxu1 }
 0x147   : > { %2488 = vmatmul.mubr.f32.gmra.mrb[124].mxu1 %v4923_v23  ;;  %v1117_v29 = vpop.f32.mrb[19].mxu1  ;;  %v2920_v23 = vld [vmem:[#allocation2 + $0x30] sm:$0xff] }
 0x148   : > { %1669 = vmatmul.mubr.f32.gmra.mrb[60].mxu0 %v4293_v13  ;;  %2490 = vmatprep.mubr.f32.mxu1 %v4926_v56  ;;  %v2924_v13 = vld [vmem:[#allocation2 + $0x60] sm:$0xff] }
 0x149   : > { %1673 = vmatprep.mubr.f32.mxu0 %v840_v30 }
 0x14a   : > { %v4375_v32 = vpop.f32.mrb[20].mxu1 }
 0x14b   : > { %2491 = vmatmul.mubr.f32.gmra.mrb[126].mxu1 %v4928_v4  ;;  %v1122_v3 = vpop.f32.mrb[21].mxu1  ;;  %v2921_v4 = vld [vmem:[#allocation2 + $0x38] sm:$0xff] }
 0x14c   : > { %1674 = vmatmul.mubr.f32.gmra.mrb[62].mxu0 %v4301_v42  ;;  %2493 = vmatprep.mubr.f32.mxu1 %v4929_v38  ;;  %v2925_v42 = vld [vmem:[#allocation2 + $0x68] sm:$0xff] }
 0x14d   : > { %1743 = vmatprep.mubr.f32.mxu0 %v3508_v16 }
 0x14e   : > { %v4381_v18 = vpop.f32.mrb[22].mxu1 }
 0x14f   : > { %2494 = vmatmul.mubr.f32.gmra.mrb[128].mxu1 %v4930_v34  ;;  %v1127_v61 = vpop.f32.mrb[23].mxu1 }
 0x150   : > { %1744 = vmatmul.mubr.f32.vlgmr.msra.gmra.mrb[0].mxu0 %v2920_v23  ;;  %2496 = vmatprep.mubr.f32.mxu1 %v4931_v25 }
 0x151   : > { %1748 = vmatprep.mubr.f32.mxu0 %v3542_v33 }
 0x152   : > { %v4386_v44 = vpop.f32.mrb[24].mxu1 }
 0x153   : > { %2497 = vmatmul.mubr.f32.gmra.mrb[130].mxu1 %v4932_v50  ;;  %v1132_v56 = vpop.f32.mrb[25].mxu1  ;;  %v2926_v50 = vld [vmem:[#allocation2 + $0x78] sm:$0xff] }
 0x154   : > { %1749 = vmatmul.mubr.f32.gmra.mrb[2].mxu0 %v2921_v4  ;;  %2499 = vmatprep.mubr.f32.mxu1 %v4933_v6 }
 0x155   : > { %1753 = vmatprep.mubr.f32.mxu0 %v3582_v1 }
 0x156   : > { %v4391_v16 = vpop.f32.mrb[26].mxu1 }
 0x157   : > { %2500 = vmatmul.mubr.f32.gmra.mrb[132].mxu1 %v4934_v54  ;;  %v1137_v38 = vpop.f32.mrb[27].mxu1 }
 0x158   : > { %1754 = vmatmul.mubr.f32.gmra.mrb[4].mxu0 %v2922_v63  ;;  %2502 = vmatprep.mubr.f32.mxu1 %v4935_v43 }
 0x159   : > { %1758 = vmatprep.mubr.f32.mxu0 %v3617_v28  ;;  %v853_v28 = vrot.slane %v4303_v39, 2 }
 0x15a   : > { %v4396_v33 = vpop.f32.mrb[28].mxu1 }
 0x15b   : > { %2503 = vmatmul.mubr.f32.gmra.mrb[134].mxu1 %v4936_v57  ;;  %v1142_v19 = vpop.f32.mrb[29].mxu1 }
 0x15c   : > { %1759 = vmatmul.mubr.f32.gmra.mrb[6].mxu0 %v2923_v46  ;;  %2505 = vmatprep.mubr.f32.mxu1 %v4937_v27 }
 0x15d   : > { %1763 = vmatprep.mubr.f32.mxu0 %v3650_v37  ;;  %v856_v37 = vrot.slane %v4306_v8, 2 }
 0x15e   : > { %v4401_v1 = vpop.f32.mrb[30].mxu1 }
 0x15f   : > { %2506 = vmatmul.mubr.f32.gmra.mrb[136].mxu1 %v4938_v26  ;;  %v1147_v34 = vpop.f32.mrb[31].mxu1 }
 0x160   : > { %1764 = vmatmul.mubr.f32.gmra.mrb[8].mxu0 %v2924_v13  ;;  %2508 = vmatprep.mubr.f32.mxu1 %v4120_v11 }
 0x161   : > { %1768 = vmatprep.mubr.f32.mxu0 %v3683_v59  ;;  %v857_v59 = vsel %vm713_vm1, %v853_v28, %v856_v37 }
 0x162   : > { %v4407_v31 = vpop.f32.mrb[32].mxu1 }
 0x163   : > { %2509 = vmatmul.mubr.f32.gmra.mrb[138].mxu1 %v4132_v5  ;;  %v1152_v25 = vpop.f32.mrb[33].mxu1 }
 0x164   : > { %1769 = vmatmul.mubr.f32.gmra.mrb[10].mxu0 %v2925_v42  ;;  %2511 = vmatprep.mubr.f32.mxu1 %v838_v53 }
 0x165   : > { %1773 = vmatprep.mubr.f32.mxu0 %v3713_v49 }
 0x166   : > { %v4412_v9 = vpop.f32.mrb[34].mxu1 }
 0x167   : > { %2512 = vmatmul.mubr.f32.gmra.mrb[140].mxu1 %v840_v30  ;;  %v1157_v11 = vpop.f32.mrb[35].mxu1 }
 0x168   : > { %1774 = vmatmul.mubr.f32.gmra.mrb[12].mxu0 %v2926_v50  ;;  %2514 = vmatprep.mubr.f32.mxu1 %v853_v28 }
 0x169   : > { %1778 = vmatprep.mubr.f32.mxu0 %v4901_v7 }
 0x16a   : > { %v4416_v5 = vpop.f32.mrb[36].mxu1 }
 0x16b   : > { %2515 = vmatmul.mubr.f32.gmra.mrb[142].mxu1 %v857_v59  ;;  %v1162_v39 = vpop.f32.mrb[37].mxu1 }
 0x16c   : > { %1779 = vmatmul.mubr.f32.gmra.mrb[14].mxu0 %v2927_v14 }
 0x16e   : > { %v4418_v8 = vpop.f32.mrb[38].mxu1 }
 0x16f   : > { %v1167_v49 = vpop.f32.mrb[39].mxu1 }
 0x172   : > { %v4420_v45 = vpop.f32.mrb[40].mxu1 }
 0x173   : > { %v1172_v6 = vpop.f32.mrb[41].mxu1 }
 0x176   : > { %v4422_v40 = vpop.f32.mrb[42].mxu1 }
 0x177   : > { %v1177_v52 = vpop.f32.mrb[43].mxu1 }
 0x17a   : > { %v4424_v54 = vpop.f32.mrb[44].mxu1 }
 0x17b   : > { %v1182_v47 = vpop.f32.mrb[45].mxu1 }
 0x17e   : > { %v4426_v43 = vpop.f32.mrb[46].mxu1 }
 0x17f   : > { %v1187_v7 = vpop.f32.mrb[47].mxu1 }
 0x182   : > { %v4428_v36 = vpop.f32.mrb[48].mxu1 }
 0x183   : > { %v1192_v57 = vpop.f32.mrb[49].mxu1 }
 0x186   : > { %v4430_v15 = vpop.f32.mrb[50].mxu1 }
 0x187   : > { %v1197_v27 = vpop.f32.mrb[51].mxu1 }
 0x18a   : > { %v4432_v55 = vpop.f32.mrb[52].mxu1 }
 0x18b   : > { %v1202_v26 = vpop.f32.mrb[53].mxu1 }
 0x18e   : > { %v4434_v21 = vpop.f32.mrb[54].mxu1 }
 0x18f   : > { %v1207_v22 = vpop.f32.mrb[55].mxu1 }
 0x192   : > { %v4436_v10 = vpop.f32.mrb[56].mxu1 }
 0x193   : > { %v1212_v17 = vpop.f32.mrb[57].mxu1 }
 0x196   : > { %v4438_v53 = vpop.f32.mrb[58].mxu1 }
 0x197   : > { %v1217_v35 = vpop.f32.mrb[59].mxu1 }
 0x19a   : > { %v4440_v62 = vpop.f32.mrb[60].mxu1 }
 0x19b   : > { %v1222_v30 = vpop.f32.mrb[61].mxu1 }
 0x19e   : > { %v4442_v29 = vpop.f32.mrb[62].mxu1 }
 0x19f   : > { %v1227_v3 = vpop.f32.mrb[63].mxu1 }
 0x1a2   : > { %v1785_v61 = vpop.f32.mrb[64].mxu1 }
 0x1a3   : > { %v1787_v23 = vpop.f32.mrb[65].mxu1 }
 0x1a6   : > { %v1790_v56 = vpop.f32.mrb[66].mxu1 }
 0x1a7   : > { %v1792_v4 = vpop.f32.mrb[67].mxu1 }
 0x1aa   : > { %v1795_v38 = vpop.f32.mrb[68].mxu1 }
 0x1ab   : > { %v1797_v63 = vpop.f32.mrb[69].mxu1 }
 0x1ae   : > { %v1800_v19 = vpop.f32.mrb[70].mxu1 }
 0x1af   : > { %v1802_v46 = vpop.f32.mrb[71].mxu1 }
 0x1b2   : > { %v1805_v34 = vpop.f32.mrb[72].mxu1 }
 0x1b3   : > { %v1807_v13 = vpop.f32.mrb[73].mxu1 }
 0x1b6   : > { %v1810_v28 = vpop.f32.mrb[74].mxu1 }
 0x1b7   : > { %v1812_v25 = vpop.f32.mrb[75].mxu1 }
 0x1ba   : > { %v1815_v42 = vpop.f32.mrb[76].mxu1 }
 0x1bb   : > { %v1817_v37 = vpop.f32.mrb[77].mxu1 }
 0x1be   : > { %v1820_v11 = vpop.f32.mrb[78].mxu1 }
 0x1bf   : > { %v1822_v50 = vpop.f32.mrb[79].mxu1 }
 0x1c2   : > { %v1825_v59 = vpop.f32.mrb[80].mxu1 }
 0x1c3   : > { %v1560_v39 = vpop.f32.mrb[16].mxu0  ;;  %v1827_v14 = vpop.f32.mrb[81].mxu1 }
 0x1c4   : > { %v2781_v49 = vadd.f32 %v1560_v39, %v4364_v0  ;;  %v1562_v6 = vpop.f32.mrb[17].mxu0 }
 0x1c6   : > { %v4445_v52 = vadd.f32 %v2781_v49, %v1785_v61  ;;  %v1830_v47 = vpop.f32.mrb[82].mxu1 }
 0x1c7   : > { %v1565_v7 = vpop.f32.mrb[18].mxu0  ;;  %v1832_v57 = vpop.f32.mrb[83].mxu1 }
 0x1c8   : > { %v2783_v27 = vadd.f32 %v1565_v7, %v4370_v12  ;;  %v1567_v26 = vpop.f32.mrb[19].mxu0 }
 0x1ca   : > { %v4448_v22 = vadd.f32 %v2783_v27, %v1790_v56  ;;  %v1835_v17 = vpop.f32.mrb[84].mxu1 }
 0x1cb   : > { %v1570_v35 = vpop.f32.mrb[20].mxu0  ;;  %v1837_v30 = vpop.f32.mrb[85].mxu1 }
 0x1cc   : > { %v2785_v3 = vadd.f32 %v1570_v35, %v4375_v32  ;;  %v1572_v23 = vpop.f32.mrb[21].mxu0 }
 0x1ce   : > { %v4451_v4 = vadd.f32 %v2785_v3, %v1795_v38  ;;  %v1840_v0 = vpop.f32.mrb[86].mxu1 }
 0x1cf   : > { %v1575_v63 = vpop.f32.mrb[22].mxu0  ;;  %v1842_v61 = vpop.f32.mrb[87].mxu1 }
 0x1d0   : > { %v2787_v46 = vadd.f32 %v1575_v63, %v4381_v18  ;;  %v1577_v13 = vpop.f32.mrb[23].mxu0 }
 0x1d2   : > { %v4454_v25 = vadd.f32 %v2787_v46, %v1800_v19  ;;  %v1845_v12 = vpop.f32.mrb[88].mxu1 }
 0x1d3   : > { %v1580_v37 = vpop.f32.mrb[24].mxu0  ;;  %v1847_v56 = vpop.f32.mrb[89].mxu1 }
 0x1d4   : > { %v2789_v50 = vadd.f32 %v1580_v37, %v4386_v44  ;;  %v1582_v39 = vpop.f32.mrb[25].mxu0 }
 0x1d6   : > { %v4457_v14 = vadd.f32 %v2789_v50, %v1805_v34  ;;  %v1850_v32 = vpop.f32.mrb[90].mxu1 }
 0x1d7   : > { %v1585_v49 = vpop.f32.mrb[26].mxu0  ;;  %v1852_v38 = vpop.f32.mrb[91].mxu1 }
 0x1d8   : > { %v2791_v6 = vadd.f32 %v1585_v49, %v4391_v16  ;;  %v1587_v7 = vpop.f32.mrb[27].mxu0 }
 0x1da   : > { %v4460_v57 = vadd.f32 %v2791_v6, %v1810_v28  ;;  %v1855_v18 = vpop.f32.mrb[92].mxu1 }
 0x1db   : > { %v1590_v27 = vpop.f32.mrb[28].mxu0  ;;  %v1857_v19 = vpop.f32.mrb[93].mxu1 }
 0x1dc   : > { %v2793_v26 = vadd.f32 %v1590_v27, %v4396_v33  ;;  %v1592_v35 = vpop.f32.mrb[29].mxu0 }
 0x1de   : > { %v4463_v30 = vadd.f32 %v2793_v26, %v1815_v42  ;;  %v1860_v44 = vpop.f32.mrb[94].mxu1 }
 0x1df   : > { %v1595_v3 = vpop.f32.mrb[30].mxu0  ;;  %v1862_v34 = vpop.f32.mrb[95].mxu1 }
 0x1e0   : > { %v2795_v23 = vadd.f32 %v1595_v3, %v4401_v1  ;;  %v1597_v63 = vpop.f32.mrb[31].mxu0 }
 0x1e2   : > { %v4466_v61 = vadd.f32 %v2795_v23, %v1820_v11  ;;  %v1865_v16 = vpop.f32.mrb[96].mxu1 }
 0x1e3   : > { %v1600_v46 = vpop.f32.mrb[32].mxu0  ;;  %v1867_v28 = vpop.f32.mrb[97].mxu1 }
 0x1e4   : > { %v2797_v13 = vadd.f32 %v1600_v46, %v4407_v31  ;;  %v1602_v37 = vpop.f32.mrb[33].mxu0 }
 0x1e6   : > { %v4469_v56 = vadd.f32 %v2797_v13, %v1825_v59  ;;  %v1870_v33 = vpop.f32.mrb[98].mxu1 }
 0x1e7   : > { %v1605_v50 = vpop.f32.mrb[34].mxu0  ;;  %v1872_v42 = vpop.f32.mrb[99].mxu1 }
 0x1e8   : > { %v2799_v39 = vadd.f32 %v1605_v50, %v4412_v9  ;;  %v1607_v49 = vpop.f32.mrb[35].mxu0 }
 0x1ea   : > { %v4472_v38 = vadd.f32 %v2799_v39, %v1830_v47  ;;  %v1875_v1 = vpop.f32.mrb[100].mxu1 }
 0x1eb   : > { %v1610_v6 = vpop.f32.mrb[36].mxu0  ;;  %v1877_v11 = vpop.f32.mrb[101].mxu1 }
 0x1ec   : > { %v2801_v7 = vadd.f32 %v1610_v6, %v4416_v5  ;;  %v1612_v27 = vpop.f32.mrb[37].mxu0 }
 0x1ee   : > { %v4475_v19 = vadd.f32 %v2801_v7, %v1835_v17  ;;  %v1880_v31 = vpop.f32.mrb[102].mxu1 }
 0x1ef   : > { %v1615_v26 = vpop.f32.mrb[38].mxu0  ;;  %v1882_v59 = vpop.f32.mrb[103].mxu1 }
 0x1f0   : > { %v2803_v35 = vadd.f32 %v1615_v26, %v4418_v8  ;;  %v1617_v3 = vpop.f32.mrb[39].mxu0 }
 0x1f2   : > { %v4478_v34 = vadd.f32 %v2803_v35, %v1840_v0  ;;  %v1885_v9 = vpop.f32.mrb[104].mxu1 }
 0x1f3   : > { %v1620_v23 = vpop.f32.mrb[40].mxu0  ;;  %v1887_v47 = vpop.f32.mrb[105].mxu1 }
 0x1f4   : > { %v2805_v63 = vadd.f32 %v1620_v23, %v4420_v45  ;;  %v1622_v46 = vpop.f32.mrb[41].mxu0 }
 0x1f6   : > { %v4481_v28 = vadd.f32 %v2805_v63, %v1845_v12  ;;  %v4483_v5 = vpop.f32.mrb[106].mxu1 }
 0x1f7   : > { %v1625_v17 = vpop.f32.mrb[42].mxu0  ;;  %v1892_v13 = vpop.f32.mrb[107].mxu1 }
 0x1f8   : > { %v2807_v37 = vadd.f32 %v1625_v17, %v4422_v40  ;;  %v1627_v50 = vpop.f32.mrb[43].mxu0 }
 0x1fa   : > { %v4486_v42 = vpop.f32.mrb[108].mxu1  ;;  %v4488_v8 = vadd.f32 %v2807_v37, %v1850_v32 }
 0x1fb   : > { %v1630_v0 = vpop.f32.mrb[44].mxu0  ;;  %v1897_v39 = vpop.f32.mrb[109].mxu1 }
 0x1fc   : > { %v2809_v49 = vadd.f32 %v1630_v0, %v4424_v54  ;;  %v1632_v6 = vpop.f32.mrb[45].mxu0 }
 0x1fe   : > { %v4491_v45 = vpop.f32.mrb[110].mxu1  ;;  %v4493_v12 = vadd.f32 %v2809_v49, %v1855_v18 }
 0x1ff   : > { %v1635_v11 = vpop.f32.mrb[46].mxu0  ;;  %v1902_v7 = vpop.f32.mrb[111].mxu1 }
 0x200   : > { %v2811_v27 = vadd.f32 %v1635_v11, %v4426_v43  ;;  %v1637_v26 = vpop.f32.mrb[47].mxu0 }
 0x202   : > { %v4496_v40 = vpop.f32.mrb[112].mxu1  ;;  %v4498_v59 = vadd.f32 %v2811_v27, %v1860_v44 }
 0x203   : > { %v1640_v32 = vpop.f32.mrb[48].mxu0  ;;  %v4500_v35 = vpop.f32.mrb[113].mxu1 }
 0x204   : > { %v2813_v3 = vadd.f32 %v1640_v32, %v4428_v36  ;;  %v1642_v54 = vpop.f32.mrb[49].mxu0 }
 0x206   : > { %v4503_v23 = vpop.f32.mrb[114].mxu1  ;;  %v4505_v47 = vadd.f32 %v2813_v3, %v1865_v16 }
 0x207   : > { %v1645_v18 = vpop.f32.mrb[50].mxu0  ;;  %v4507_v63 = vpop.f32.mrb[115].mxu1 }
 0x208   : > { %v2815_v43 = vadd.f32 %v1645_v18, %v4430_v15  ;;  %v1647_v46 = vpop.f32.mrb[51].mxu0 }
 0x20a   : > { %v4510_v17 = vpop.f32.mrb[116].mxu1  ;;  %v4512_v44 = vadd.f32 %v2815_v43, %v1870_v33 }
 0x20b   : > { %v1650_v13 = vpop.f32.mrb[52].mxu0  ;;  %v4514_v37 = vpop.f32.mrb[117].mxu1 }
 0x20c   : > { %v2817_v36 = vadd.f32 %v1650_v13, %v4432_v55  ;;  %v1652_v50 = vpop.f32.mrb[53].mxu0 }
 0x20e   : > { %v4517_v0 = vpop.f32.mrb[118].mxu1  ;;  %v4519_v16 = vadd.f32 %v2817_v36, %v1875_v1 }
 0x20f   : > { %v1655_v39 = vpop.f32.mrb[54].mxu0  ;;  %v4521_v49 = vpop.f32.mrb[119].mxu1 }
 0x210   : > { %v2819_v15 = vadd.f32 %v1655_v39, %v4434_v21  ;;  %v1657_v6 = vpop.f32.mrb[55].mxu0 }
 0x212   : > { %v2483_v55 = vpop.f32.mrb[120].mxu1  ;;  %v4531_v33 = vadd.f32 %v2819_v15, %v1880_v31 }
 0x213   : > { %v1660_v11 = vpop.f32.mrb[56].mxu0  ;;  %v4534_v1 = vadd.f32 %v4448_v22, %v2483_v55  ;;  %v2010_v7 = vpop.f32.mrb[121].mxu1 }
 0x214   : > { %v2821_v21 = vadd.f32 %v1660_v11, %v4436_v10  ;;  %v1662_v27 = vpop.f32.mrb[57].mxu0  ;;  %v4538_v26 = vadd.f32 %v4445_v52, %v2010_v7 }
 0x215   : > { %2246 = vst [vmem:[%s4529_s7 + $0x48] sm:$0xff] %v4534_v1 }
 0x216   : > { %2245 = vst [vmem:[%s4529_s7 + $0x40] sm:$0xff] %v4538_v26  ;;  %v2486_v32 = vpop.f32.mrb[122].mxu1  ;;  %v4544_v31 = vadd.f32 %v2821_v21, %v1885_v9 }
 0x217   : > { %v1665_v3 = vpop.f32.mrb[58].mxu0  ;;  %v4547_v22 = vadd.f32 %v4454_v25, %v2486_v32  ;;  %v2020_v54 = vpop.f32.mrb[123].mxu1 }
 0x218   : > { %v2823_v10 = vadd.f32 %v1665_v3, %v4438_v53  ;;  %v1667_v18 = vpop.f32.mrb[59].mxu0  ;;  %v4551_v52 = vadd.f32 %v4451_v4, %v2020_v54 }
 0x219   : > { %2248 = vst [vmem:[%s4529_s7 + $0x58] sm:$0xff] %v4547_v22 }
 0x21a   : > { %2247 = vst [vmem:[%s4529_s7 + $0x50] sm:$0xff] %v4551_v52  ;;  %v2489_v43 = vpop.f32.mrb[124].mxu1  ;;  %v4558_v9 = vadd.f32 %v2823_v10, %v4483_v5 }
 0x21b   : > { %v1670_v46 = vpop.f32.mrb[60].mxu0  ;;  %v4561_v25 = vadd.f32 %v4460_v57, %v2489_v43  ;;  %v2030_v13 = vpop.f32.mrb[125].mxu1 }
 0x21c   : > { %v2825_v53 = vadd.f32 %v1670_v46, %v4440_v62  ;;  %v1672_v36 = vpop.f32.mrb[61].mxu0  ;;  %v4565_v4 = vadd.f32 %v4457_v14, %v2030_v13 }
 0x21d   : > { %2250 = vst [vmem:[%s4529_s7 + $0x68] sm:$0xff] %v4561_v25 }
 0x21e   : > { %2249 = vst [vmem:[%s4529_s7 + $0x60] sm:$0xff] %v4565_v4  ;;  %v2492_v50 = vpop.f32.mrb[126].mxu1  ;;  %v4572_v5 = vadd.f32 %v2825_v53, %v4486_v42 }
 0x21f   : > { %v1675_v39 = vpop.f32.mrb[62].mxu0  ;;  %v4575_v57 = vadd.f32 %v4466_v61, %v2492_v50  ;;  %v2040_v15 = vpop.f32.mrb[127].mxu1 }
 0x220   : > { %v2827_v62 = vadd.f32 %v1675_v39, %v4442_v29  ;;  %v1677_v6 = vpop.f32.mrb[63].mxu0  ;;  %v4579_v14 = vadd.f32 %v4463_v30, %v2040_v15 }
 0x221   : > { %2252 = vst [vmem:[%s4529_s7 + $0x78] sm:$0xff] %v4575_v57 }
 0x222   : > { %2251 = vst [vmem:[%s4529_s7 + $0x70] sm:$0xff] %v4579_v14  ;;  %v2495_v42 = vpop.f32.mrb[128].mxu1  ;;  %v4586_v55 = vadd.f32 %v2827_v62, %v4491_v45 }
 0x223   : > { %v1745_v11 = vpop.f32.mrb[0].mxu0  ;;  %v4589_v61 = vadd.f32 %v4472_v38, %v2495_v42  ;;  %v2050_v7 = vpop.f32.mrb[129].mxu1 }
 0x224   : > { %v2773_v29 = vadd.f32 %v1745_v11, %v4313_v60  ;;  %v1747_v30 = vpop.f32.mrb[1].mxu0  ;;  %v4593_v21 = vadd.f32 %v4469_v56, %v2050_v7 }
 0x225   : > { %2254 = vst [vmem:[%s4529_s7 + $0x88] sm:$0xff] %v4589_v61 }
 0x226   : > { %v1971_v27 = vadd.f32 %v2773_v29, %v4500_v35  ;;  %2253 = vst [vmem:[%s4529_s7 + $0x80] sm:$0xff] %v4593_v21  ;;  %v2498_v45 = vpop.f32.mrb[130].mxu1 }
 0x227   : > { %v1750_v32 = vpop.f32.mrb[2].mxu0  ;;  %v4601_v38 = vadd.f32 %v4478_v34, %v2498_v45  ;;  %v2060_v3 = vpop.f32.mrb[131].mxu1 }
 0x228   : > { %2237 = vst [vmem:[%s4529_s7] sm:$0xff] %v1971_v27  ;;  %v2774_v60 = vadd.f32 %v1750_v32, %v4319_v58  ;;  %v1752_v54 = vpop.f32.mrb[3].mxu0  ;;  %v4606_v56 = vadd.f32 %v4475_v19, %v2060_v3  ;;  %v2167_v34 = vmul.f32 %v1971_v27, %v1971_v27 }
 0x229   : > { %2256 = vst [vmem:[%s4529_s7 + $0x98] sm:$0xff] %v4601_v38 }
 0x22a   : > { %v1976_v35 = vadd.f32 %v2774_v60, %v4496_v40  ;;  %2255 = vst [vmem:[%s4529_s7 + $0x90] sm:$0xff] %v4606_v56  ;;  %v2501_v10 = vpop.f32.mrb[132].mxu1 }
 0x22b   : > { %v1755_v18 = vpop.f32.mrb[4].mxu0  ;;  %v4614_v43 = vadd.f32 %v4488_v8, %v2501_v10  ;;  %v2070_v46 = vpop.f32.mrb[133].mxu1 }
 0x22c   : > { %v2129_v58 = vadd.f32 %v1976_v35, %v1971_v27  ;;  %v2168_v13 = vmul.f32 %v1976_v35, %v1976_v35  ;;  %2238 = vst [vmem:[%s4529_s7 + $0x8] sm:$0xff] %v1976_v35  ;;  %v2775_v19 = vadd.f32 %v1755_v18, %v4324_v51  ;;  %v1757_v53 = vpop.f32.mrb[5].mxu0  ;;  %v4619_v40 = vadd.f32 %v4481_v28, %v2070_v46 }
 0x22d   : > { %2258 = vst [vmem:[%s4529_s7 + $0xa8] sm:$0xff] %v4614_v43 }
 0x22e   : > { %v2199_v36 = vadd.f32 %v2168_v13, %v2167_v34  ;;  %v1981_v50 = vadd.f32 %v2775_v19, %v4507_v63  ;;  %2257 = vst [vmem:[%s4529_s7 + $0xa0] sm:$0xff] %v4619_v40  ;;  %v2504_v8 = vpop.f32.mrb[134].mxu1 }
 0x22f   : > { %v1760_v39 = vpop.f32.mrb[6].mxu0  ;;  %v4627_v15 = vadd.f32 %v4498_v59, %v2504_v8  ;;  %v2080_v62 = vpop.f32.mrb[135].mxu1 }
 0x230   : > { %v2130_v51 = vadd.f32 %v2129_v58, %v1981_v50  ;;  %v2169_v6 = vmul.f32 %v1981_v50, %v1981_v50  ;;  %2239 = vst [vmem:[%s4529_s7 + $0x10] sm:$0xff] %v1981_v50  ;;  %v2776_v28 = vadd.f32 %v1760_v39, %v4330_v2  ;;  %v1762_v42 = vpop.f32.mrb[7].mxu0  ;;  %v4632_v11 = vadd.f32 %v4493_v12, %v2080_v62 }
 0x231   : > { %2260 = vst [vmem:[%s4529_s7 + $0xb8] sm:$0xff] %v4627_v15 }
 0x232   : > { %v2200_v63 = vadd.f32 %v2199_v36, %v2169_v6  ;;  %v1986_v7 = vadd.f32 %v2776_v28, %v4503_v23  ;;  %2259 = vst [vmem:[%s4529_s7 + $0xb0] sm:$0xff] %v4632_v11  ;;  %v2507_v59 = vpop.f32.mrb[136].mxu1 }
 0x233   : > { %v1765_v29 = vpop.f32.mrb[8].mxu0  ;;  %v4640_v30 = vadd.f32 %v4512_v44, %v2507_v59  ;;  %v2090_v27 = vpop.f32.mrb[137].mxu1 }
 0x234   : > { %v2131_v2 = vadd.f32 %v2130_v51, %v1986_v7  ;;  %v2170_v45 = vmul.f32 %v1986_v7, %v1986_v7  ;;  %2240 = vst [vmem:[%s4529_s7 + $0x18] sm:$0xff] %v1986_v7  ;;  %v2777_v12 = vadd.f32 %v1765_v29, %v4336_v24  ;;  %v1767_v32 = vpop.f32.mrb[9].mxu0  ;;  %v4645_v3 = vadd.f32 %v4505_v47, %v2090_v27 }
 0x235   : > { %2262 = vst [vmem:[%s4529_s7 + $0xc8] sm:$0xff] %v4640_v30  ;;  %v2175_v29 = vmul.f32 %v4538_v26, %v4538_v26 }
 0x236   : > { %v2201_v23 = vadd.f32 %v2200_v63, %v2170_v45  ;;  %v1991_v60 = vadd.f32 %v2777_v12, %v4514_v37  ;;  %2261 = vst [vmem:[%s4529_s7 + $0xc0] sm:$0xff] %v4645_v3  ;;  %v2510_v44 = vpop.f32.mrb[138].mxu1 }
 0x237   : > { %v1770_v54 = vpop.f32.mrb[10].mxu0  ;;  %v4653_v35 = vadd.f32 %v4531_v33, %v2510_v44  ;;  %v2100_v10 = vpop.f32.mrb[139].mxu1 }
 0x238   : > { %v2132_v24 = vadd.f32 %v2131_v2, %v1991_v60  ;;  %v2171_v34 = vmul.f32 %v1991_v60, %v1991_v60  ;;  %2241 = vst [vmem:[%s4529_s7 + $0x20] sm:$0xff] %v1991_v60  ;;  %v2778_v47 = vadd.f32 %v1770_v54, %v4342_v41  ;;  %v1772_v18 = vpop.f32.mrb[11].mxu0  ;;  %v4658_v46 = vadd.f32 %v4519_v16, %v2100_v10 }
 0x239   : > { %2264 = vst [vmem:[%s4529_s7 + $0xd8] sm:$0xff] %v4653_v35 }
 0x23a   : > { %v2202_v37 = vadd.f32 %v2201_v23, %v2171_v34  ;;  %v1996_v58 = vadd.f32 %v2778_v47, %v4510_v17  ;;  %2263 = vst [vmem:[%s4529_s7 + $0xd0] sm:$0xff] %v4658_v46  ;;  %v2513_v33 = vpop.f32.mrb[140].mxu1  ;;  %v2178_v23 = vmul.f32 %v4547_v22, %v4547_v22 }
 0x23b   : > { %v1775_v13 = vpop.f32.mrb[12].mxu0  ;;  %v4666_v19 = vadd.f32 %v4558_v9, %v2513_v33  ;;  %v2110_v53 = vpop.f32.mrb[141].mxu1 }
 0x23c   : > { %v2133_v41 = vadd.f32 %v2132_v24, %v1996_v58  ;;  %v2172_v36 = vmul.f32 %v1996_v58, %v1996_v58  ;;  %2242 = vst [vmem:[%s4529_s7 + $0x28] sm:$0xff] %v1996_v58  ;;  %v2779_v16 = vadd.f32 %v1775_v13, %v4348_v20  ;;  %v1777_v50 = vpop.f32.mrb[13].mxu0  ;;  %v4671_v8 = vadd.f32 %v4544_v31, %v2110_v53 }
 0x23d   : > { %2266 = vst [vmem:[%s4529_s7 + $0xe8] sm:$0xff] %v4666_v19 }
 0x23e   : > { %v2203_v17 = vadd.f32 %v2202_v37, %v2172_v36  ;;  %v2001_v39 = vadd.f32 %v2779_v16, %v4521_v49  ;;  %2265 = vst [vmem:[%s4529_s7 + $0xe0] sm:$0xff] %v4671_v8  ;;  %v2516_v9 = vpop.f32.mrb[142].mxu1 }
 0x23f   : > { %v1780_v62 = vpop.f32.mrb[14].mxu0  ;;  %v4679_v51 = vadd.f32 %v4586_v55, %v2516_v9  ;;  %v2120_v20 = vpop.f32.mrb[143].mxu1 }
 0x240   : > { %v2134_v6 = vadd.f32 %v2133_v41, %v2001_v39  ;;  %v2173_v28 = vmul.f32 %v2001_v39, %v2001_v39  ;;  %2243 = vst [vmem:[%s4529_s7 + $0x30] sm:$0xff] %v2001_v39  ;;  %v2780_v31 = vadd.f32 %v1780_v62, %v4356_v48  ;;  %v1782_v42 = vpop.f32.mrb[15].mxu0  ;;  %v4684_v63 = vadd.f32 %v4572_v5, %v2120_v20 }
 0x241   : > { %2268 = vst [vmem:[%s4529_s7 + $0xf8] sm:$0xff] %v4679_v51  ;;  %v2176_v5 = vmul.f32 %v4534_v1, %v4534_v1 }
 0x242   : > { %v2204_v49 = vadd.f32 %v2203_v17, %v2173_v28  ;;  %v2006_v7 = vadd.f32 %v2780_v31, %v4517_v0  ;;  %2267 = vst [vmem:[%s4529_s7 + $0xf0] sm:$0xff] %v4684_v63  ;;  %v2177_v0 = vmul.f32 %v4551_v52, %v4551_v52 }
 0x244   : > { %v2135_v59 = vadd.f32 %v2134_v6, %v2006_v7  ;;  %v2174_v55 = vmul.f32 %v2006_v7, %v2006_v7  ;;  %2244 = vst [vmem:[%s4529_s7 + $0x38] sm:$0xff] %v2006_v7 }
 0x246   : > { %v2136_v27 = vadd.f32 %v2135_v59, %v4538_v26  ;;  %v2205_v48 = vadd.f32 %v2204_v49, %v2174_v55  ;;  %v2179_v26 = vmul.f32 %v4565_v4, %v4565_v4 }
 0x248   : > { %v2137_v2 = vadd.f32 %v2136_v27, %v4534_v1  ;;  %v2206_v45 = vadd.f32 %v2205_v48, %v2175_v29  ;;  %v2180_v1 = vmul.f32 %v4561_v25, %v4561_v25 }
 0x24a   : > { %v2138_v12 = vadd.f32 %v2137_v2, %v4551_v52  ;;  %v2207_v32 = vadd.f32 %v2206_v45, %v2176_v5  ;;  %v2181_v52 = vmul.f32 %v4579_v14, %v4579_v14 }
 0x24c   : > { %v2139_v60 = vadd.f32 %v2138_v12, %v4547_v22  ;;  %v2208_v44 = vadd.f32 %v2207_v32, %v2177_v0  ;;  %v2182_v22 = vmul.f32 %v4575_v57, %v4575_v57  ;;  %v2197_v32 = vmul.f32 %v4684_v63, %v4684_v63 }
 0x24e   : > { %v2140_v54 = vadd.f32 %v2139_v60, %v4565_v4  ;;  %v2209_v10 = vadd.f32 %v2208_v44, %v2178_v23  ;;  %v2183_v4 = vmul.f32 %v4593_v21, %v4593_v21  ;;  %v2198_v23 = vmul.f32 %v4679_v51, %v4679_v51 }
 0x250   : > { %v2141_v24 = vadd.f32 %v2140_v54, %v4561_v25  ;;  %v2210_v34 = vadd.f32 %v2209_v10, %v2179_v26  ;;  %v2184_v25 = vmul.f32 %v4589_v61, %v4589_v61 }
 0x252   : > { %v2142_v47 = vadd.f32 %v2141_v24, %v4579_v14  ;;  %v2211_v18 = vadd.f32 %v2210_v34, %v2180_v1  ;;  %v2185_v14 = vmul.f32 %v4606_v56, %v4606_v56 }
 0x254   : > { %v2143_v37 = vadd.f32 %v2142_v47, %v4575_v57  ;;  %v2212_v58 = vadd.f32 %v2211_v18, %v2181_v52  ;;  %v2186_v57 = vmul.f32 %v4601_v38, %v4601_v38 }
 0x256   : > { %v2144_v33 = vadd.f32 %v2143_v37, %v4593_v21  ;;  %v2213_v13 = vadd.f32 %v2212_v58, %v2182_v22  ;;  %v2187_v21 = vmul.f32 %v4619_v40, %v4619_v40 }
 0x258   : > { %v2145_v53 = vadd.f32 %v2144_v33, %v4589_v61  ;;  %v2214_v41 = vadd.f32 %v2213_v13, %v2183_v4  ;;  %v2188_v61 = vmul.f32 %v4614_v43, %v4614_v43 }
 0x25a   : > { %v2215_v36 = vadd.f32 %v2214_v41, %v2184_v25  ;;  %v2146_v16 = vadd.f32 %v2145_v53, %v4606_v56  ;;  %v2189_v56 = vmul.f32 %v4632_v11, %v4632_v11 }
 0x25c   : > { %v2147_v50 = vadd.f32 %v2146_v16, %v4601_v38  ;;  %v2216_v17 = vadd.f32 %v2215_v36, %v2185_v14  ;;  %v2190_v38 = vmul.f32 %v4627_v15, %v4627_v15 }
 0x25e   : > { %v2148_v39 = vadd.f32 %v2147_v50, %v4619_v40  ;;  %v2217_v9 = vadd.f32 %v2216_v17, %v2186_v57  ;;  %v2191_v40 = vmul.f32 %v4645_v3, %v4645_v3 }
 0x260   : > { %v2149_v62 = vadd.f32 %v2148_v39, %v4614_v43  ;;  %v2218_v20 = vadd.f32 %v2217_v9, %v2187_v21  ;;  %v2192_v43 = vmul.f32 %v4640_v30, %v4640_v30 }
 0x262   : > { %v2150_v6 = vadd.f32 %v2149_v62, %v4632_v11  ;;  %v2219_v28 = vadd.f32 %v2218_v20, %v2188_v61  ;;  %v2193_v11 = vmul.f32 %v4658_v46, %v4658_v46 }
 0x264   : > { %v2151_v31 = vadd.f32 %v2150_v6, %v4627_v15  ;;  %v2220_v42 = vadd.f32 %v2219_v28, %v2189_v56  ;;  %v2194_v15 = vmul.f32 %v4653_v35, %v4653_v35 }
 0x266   : > { %v2152_v49 = vadd.f32 %v2151_v31, %v4645_v3  ;;  %v2221_v7 = vadd.f32 %v2220_v42, %v2190_v38  ;;  %v2195_v3 = vmul.f32 %v4671_v8, %v4671_v8 }
 0x268   : > { %v2153_v59 = vadd.f32 %v2152_v49, %v4640_v30  ;;  %v2222_v55 = vadd.f32 %v2221_v7, %v2191_v40  ;;  %v2196_v30 = vmul.f32 %v4666_v19, %v4666_v19 }
 0x26a   : > { %v2154_v29 = vadd.f32 %v2153_v59, %v4658_v46  ;;  %v2223_v27 = vadd.f32 %v2222_v55, %v2192_v43 }
 0x26c   : > { %v2155_v48 = vadd.f32 %v2154_v29, %v4653_v35  ;;  %v2224_v5 = vadd.f32 %v2223_v27, %v2193_v11 }
 0x26e   : > { %v2156_v2 = vadd.f32 %v2155_v48, %v4671_v8  ;;  %v2225_v45 = vadd.f32 %v2224_v5, %v2194_v15 }
 0x270   : > { %v2157_v0 = vadd.f32 %v2156_v2, %v4666_v19  ;;  %v2226_v12 = vadd.f32 %v2225_v45, %v2195_v3 }
 0x272   : > { %v2158_v46 = vadd.f32 %v2157_v0, %v4684_v63  ;;  %v2227_v35 = vadd.f32 %v2226_v12, %v2196_v30 }
 0x274   : > { %v2159_v8 = vadd.f32 %v2158_v46, %v4679_v51  ;;  %v2228_v60 = vadd.f32 %v2227_v35, %v2197_v32 }
 0x276   : > { %v2160_v44 = vrot.slane %v2159_v8, 4  ;;  %v2229_v26 = vadd.f32 %v2228_v60, %v2198_v23 }
 0x278   : > { %v2161_v54 = vadd.f32 %v2160_v44, %v2159_v8  ;;  %v2230_v10 = vrot.slane %v2229_v26, 4 }
 0x27a   : > { %v2162_v19 = vrot.slane %v2161_v54, 2  ;;  %v2231_v1 = vadd.f32 %v2230_v10, %v2229_v26 }
 0x27c   : > { %v2163_v24 = vadd.f32 %v2162_v19, %v2161_v54  ;;  %v2232_v34 = vrot.slane %v2231_v1, 2 }
 0x27e   : > { %v2164_v52 = vrot.slane %v2163_v24, 1  ;;  %v2233_v47 = vadd.f32 %v2232_v34, %v2231_v1 }
 0x280   : > { %v2165_v63 = vadd.f32 %v2164_v52, %v2163_v24  ;;  %v2234_v18 = vrot.slane %v2233_v47, 1 }
 0x282   : > { %2166 = vst [vmem:[%s265_s9] sm:$0x1] %v2165_v63  ;;  %v2235_v51 = vadd.f32 %v2234_v18, %v2233_v47 }
 0x284   : > { %2236 = vst [vmem:[%s268_s12] sm:$0x1] %v2235_v51 }
 0x285 PF: > { %s17_s21 = sadd.s32 1, %s2934_s21  }
 0x286   : > { %p14_p4 = scmp.ge.s32.totalorder %s17_s21, 4  }
 0x288   :  { %16 = sbr.rel (!%p14_p4) target bundleno = 1 (0x1), region = 91 }

</bundles_post_ra>
